<compile_context>
chip_gen: v7x
topology: tpu7x:2x2x1
jax: 0.10.0
libtpu: 0.0.40
codegen_flags: <defaults>
</compile_context>

<pallas_src>
import functools

import jax
import jax.numpy as jnp
from jax.experimental import pallas as pl
from jax.experimental.pallas import tpu as pltpu

EPS = 1e-5

# Explicit scoped-VMEM cap (perf review): above the 16/32 MiB scoped defaults so
# large tiles can double-buffer, comfortably below v7x's 64 MiB physical VMEM
# (per-step footprints here are well under 8 MiB).
_VMEM_LIMIT_BYTES = 48 * 1024 * 1024
_PARALLEL_1D = pltpu.CompilerParams(
    dimension_semantics=("parallel",), vmem_limit_bytes=_VMEM_LIMIT_BYTES)


# ----------------------------- in-kernel helpers -----------------------------


def _bn_scale_shift(s, q, gamma, beta, inv_m):
    """Fold train-mode BatchNorm (biased var, eps=1e-5) into y*scale + shift."""
    mean = s * inv_m
    # Single-pass E[x^2]-E[x]^2, clamped at 0.
    # TODO(synk): compensated sums if production activations have |mean|>>std.
    var = jnp.maximum(q * inv_m - mean * mean, 0.0)
    scale = jax.lax.rsqrt(var + EPS) * gamma
    shift = beta - mean * scale
    return scale, shift


def _write_partial_stats(y_f32, s_ref, q_ref):
    """Per-tile partial sum / sum-of-squares folded to 8 sublane rows.

    Partials are written on a fully parallel grid axis and reduced by a tiny
    XLA sum in the wrapper (keeps both v7x TensorCores busy instead of
    serializing on a grid-resident accumulator).
    """
    c = y_f32.shape[-1]
    s_ref[...] = jnp.sum(y_f32.reshape(-1, 8, c), axis=0)
    q_ref[...] = jnp.sum((y_f32 * y_f32).reshape(-1, 8, c), axis=0)


# --------------------------------- kernels -----------------------------------


def _stage1_kernel(x_ref, w1_ref, y_ref, s_ref, q_ref):
    # conv1 (1x1): [tm, Cin] @ [Cin, width] in one bf16 MXU pass (f32 accum),
    # bf16 activation writeback + bn1 partial batch stats.
    y = jnp.dot(x_ref[...].astype(jnp.bfloat16), w1_ref[...],
                preferred_element_type=jnp.float32)
    yb = y.astype(jnp.bfloat16)
    y_ref[...] = yb
    _write_partial_stats(yb.astype(jnp.float32), s_ref, q_ref)


def _make_stage2_kernel(H, W, C, inv_m):
    def kernel(s1_ref, q1_ref, g1_ref, b1_ref, w2_ref, y1_ref,
               y_ref, s_ref, q_ref):
        # Fused bn1+relu -> 3x3 conv over one whole (H, W) image per grid step.
        # The 1-pixel halo is built in VMEM (zero rows/cols), so there is no
        # padded HBM copy and no halo re-DMA.  The contraction is 3 accumulated
        # dots of K=3*C (kw taps concatenated per kh tap), keeping the MXU
        # M-dim at H*W and avoiding a 9-way sub-128-lane concat.
        scale, shift = _bn_scale_shift(s1_ref[...], q1_ref[...],
                                       g1_ref[...], b1_ref[...], inv_m)
        a = jnp.maximum(y1_ref[...].astype(jnp.float32) * scale + shift, 0.0)
        a = a.astype(jnp.bfloat16).reshape(H, W, C)
        zrow = jnp.zeros((1, W, C), jnp.bfloat16)
        a = jnp.concatenate([zrow, a, zrow], axis=0)          # (H+2, W, C)
        zcol = jnp.zeros((H + 2, 1, C), jnp.bfloat16)
        a = jnp.concatenate([zcol, a, zcol], axis=1)          # (H+2, W+2, C)

        acc = jnp.zeros((H * W, C), jnp.float32)
        for kh in range(3):
            band = a[kh:kh + H]                               # (H, W+2, C)
            taps = jnp.concatenate([band[:, kw:kw + W, :] for kw in range(3)],
                                   axis=-1).reshape(H * W, 3 * C)
            acc = acc + jnp.dot(taps, w2_ref[kh],
                                preferred_element_type=jnp.float32)
        yb = acc.astype(jnp.bfloat16)
        y_ref[...] = yb
        _write_partial_stats(yb.astype(jnp.float32), s_ref, q_ref)

    return kernel


def _make_stage3a_kernel(inv_m):
    def kernel(y2_ref, s2_ref, q2_ref, g2_ref, b2_ref, w3_ref,
               y_ref, s_ref, q_ref):
        # Fused bn2+relu -> conv3 (1x1) + bn3 partial stats.
        scale, shift = _bn_scale_shift(s2_ref[...], q2_ref[...],
                                       g2_ref[...], b2_ref[...], inv_m)
        a = jnp.maximum(y2_ref[...].astype(jnp.float32) * scale + shift, 0.0)
        y = jnp.dot(a.astype(jnp.bfloat16), w3_ref[...],
                    preferred_element_type=jnp.float32)
        yb = y.astype(jnp.bfloat16)
        y_ref[...] = yb
        _write_partial_stats(yb.astype(jnp.float32), s_ref, q_ref)

    return kernel


def _make_stage3b_kernel(inv_m):
    def kernel(y3_ref, s3_ref, q3_ref, g3_ref, b3_ref, res_ref, o_ref):
        # bn3 -> residual add -> relu.
        scale, shift = _bn_scale_shift(s3_ref[...], q3_ref[...],
                                       g3_ref[...], b3_ref[...], inv_m)
        o_ref[...] = jnp.maximum(
            y3_ref[...].astype(jnp.float32) * scale + shift + res_ref[...], 0.0)

    return kernel


# --------------------------------- wrapper -----------------------------------


def bottleneck_forward(x_nchw, params, *, tm=1024):
    """Bottleneck block forward (stride=1, downsample=None). NCHW f32 in/out."""
    N, C, H, W = x_nchw.shape
    width = params["w1"].shape[1]
    cout = params["w3"].shape[1]
    assert C == cout, "identity shortcut needs inplanes == planes * expansion"

    HW = H * W
    M = N * HW
    # TODO(synk): general shapes (M % tm != 0, H*W % 8 != 0) need cdiv grids
    #             and masked edge tiles.
    assert HW % 8 == 0, (H, W)
    tm = min(tm, M)
    assert M % tm == 0 and tm % 8 == 0, (M, tm)
    n_mt = M // tm
    inv_m = 1.0 / float(M)
    f32, bf16 = jnp.float32, jnp.bfloat16

    # TODO(synk): drop these boundary transposes if the surrounding graph can
    #             produce/consume NHWC directly (they are a full HBM pass each).
    x = jnp.transpose(x_nchw, (0, 2, 3, 1)).astype(f32)
    x_flat = x.reshape(M, C)

    # Weights pre-cast to bf16 once in the wrapper: no per-grid-step cast/split
    # work in the kernels, half the weight DMA + VMEM residency.
    w1 = params["w1"].astype(bf16)                                # (C, width)
    w2 = params["w2"].reshape(3, 3 * width, width).astype(bf16)   # kh-major
    w3 = params["w3"].astype(bf16)                                # (width, cout)

    def bcast(c):        # broadcast a (1, c) vector to every grid step
        return pl.BlockSpec((1, c), lambda i: (0, 0))

    def stats_spec(c):   # per-tile (8, c) partial-stats block
        return pl.BlockSpec((8, c), lambda i: (i, 0))

    def stats_shape(n, c):
        return jax.ShapeDtypeStruct((8 * n, c), f32)

    # ---- stage 1: conv1 (1x1) over tm-row tiles + bn1 partial stats ----------
    y1, s1p, q1p = pl.pallas_call(
        _stage1_kernel,
        grid=(n_mt,),
        in_specs=[pl.BlockSpec((tm, C), lambda i: (i, 0)),
                  pl.BlockSpec((C, width), lambda i: (0, 0))],
        out_specs=(pl.BlockSpec((tm, width), lambda i: (i, 0)),
                   stats_spec(width), stats_spec(width)),
        out_shape=(jax.ShapeDtypeStruct((M, width), bf16),
                   stats_shape(n_mt, width), stats_shape(n_mt, width)),
        compiler_params=_PARALLEL_1D,
        cost_estimate=pl.CostEstimate(
            flops=2 * M * C * width, transcendentals=0,
            bytes_accessed=4 * M * C + 2 * C * width + 2 * M * width),
    )(x_flat, w1)
    s1 = jnp.sum(s1p, axis=0, keepdims=True)
    q1 = jnp.sum(q1p, axis=0, keepdims=True)

    # ---- stage 2: bn1+relu fused with the 3x3 conv, one image per grid step --
    y2, s2p, q2p = pl.pallas_call(
        _make_stage2_kernel(H, W, width, inv_m),
        grid=(N,),
        in_specs=[bcast(width), bcast(width), bcast(width), bcast(width),
                  pl.BlockSpec((3, 3 * width, width), lambda n: (0, 0, 0)),
                  pl.BlockSpec((HW, width), lambda n: (n, 0))],
        out_specs=(pl.BlockSpec((HW, width), lambda n: (n, 0)),
                   stats_spec(width), stats_spec(width)),
        out_shape=(jax.ShapeDtypeStruct((M, width), bf16),
                   stats_shape(N, width), stats_shape(N, width)),
        compiler_params=_PARALLEL_1D,
        cost_estimate=pl.CostEstimate(
            flops=2 * M * 9 * width * width, transcendentals=0,
            bytes_accessed=4 * M * width + 2 * 9 * width * width),
    )(s1, q1, params["g1"], params["b1"], w2, y1)
    s2 = jnp.sum(s2p, axis=0, keepdims=True)
    q2 = jnp.sum(q2p, axis=0, keepdims=True)

    # ---- stage 3a: bn2+relu fused with conv3 (1x1) + bn3 partial stats -------
    y3, s3p, q3p = pl.pallas_call(
        _make_stage3a_kernel(inv_m),
        grid=(n_mt,),
        in_specs=[pl.BlockSpec((tm, width), lambda i: (i, 0)),
                  bcast(width), bcast(width), bcast(width), bcast(width),
                  pl.BlockSpec((width, cout), lambda i: (0, 0))],
        out_specs=(pl.BlockSpec((tm, cout), lambda i: (i, 0)),
                   stats_spec(cout), stats_spec(cout)),
        out_shape=(jax.ShapeDtypeStruct((M, cout), bf16),
                   stats_shape(n_mt, cout), stats_shape(n_mt, cout)),
        compiler_params=_PARALLEL_1D,
        cost_estimate=pl.CostEstimate(
            flops=2 * M * width * cout, transcendentals=0,
            bytes_accessed=2 * M * width + 2 * width * cout + 2 * M * cout),
    )(y2, s2, q2, params["g2"], params["b2"], w3)
    s3 = jnp.sum(s3p, axis=0, keepdims=True)
    q3 = jnp.sum(q3p, axis=0, keepdims=True)

    # ---- stage 3b: bn3 -> += identity -> relu ---------------------------------
    out_flat = pl.pallas_call(
        _make_stage3b_kernel(inv_m),
        grid=(n_mt,),
        in_specs=[pl.BlockSpec((tm, cout), lambda i: (i, 0)),
                  bcast(cout), bcast(cout), bcast(cout), bcast(cout),
                  pl.BlockSpec((tm, cout), lambda i: (i, 0))],
        out_specs=pl.BlockSpec((tm, cout), lambda i: (i, 0)),
        out_shape=jax.ShapeDtypeStruct((M, cout), f32),
        compiler_params=_PARALLEL_1D,
        cost_estimate=pl.CostEstimate(
            flops=3 * M * cout, transcendentals=0,
            bytes_accessed=10 * M * cout),
    )(y3, s3, q3, params["g3"], params["b3"], x_flat)

    return jnp.transpose(out_flat.reshape(N, H, W, cout), (0, 3, 1, 2))  # NCHW


# ------------------------ deterministic params --------------------------------


def init_params(key, inplanes, planes, base_width=64, groups=1):
    width = int(planes * (base_width / 64.0)) * groups
    cout = planes * 4  # expansion = 4
    ks = jax.random.split(key, 9)
    s = 0.1
    return {
        # conv1: 1x1 inplanes->width, stored [Cin, Cout]
        "w1": s * jax.random.normal(ks[0], (inplanes, width), jnp.float32),
        "g1": 1.0 + s * jax.random.normal(ks[1], (1, width), jnp.float32),
        "b1": s * jax.random.normal(ks[2], (1, width), jnp.float32),
        # conv2: 3x3 width->width, stored [9 (kh*3+kw), Cin, Cout]
        "w2": s * jax.random.normal(ks[3], (9, width, width), jnp.float32),
        "g2": 1.0 + s * jax.random.normal(ks[4], (1, width), jnp.float32),
        "b2": s * jax.random.normal(ks[5], (1, width), jnp.float32),
        # conv3: 1x1 width->cout, stored [Cin, Cout]
        "w3": s * jax.random.normal(ks[6], (width, cout), jnp.float32),
        "g3": 1.0 + s * jax.random.normal(ks[7], (1, cout), jnp.float32),
        "b3": s * jax.random.normal(ks[8], (1, cout), jnp.float32),
    }


# --------------------------- pure-JAX reference --------------------------------


def reference_forward(x_nchw, params):
    x = x_nchw.astype(jnp.float32)
    width = params["w1"].shape[1]

    def bn(y, g, b):  # y NCHW, train-mode stats over (N,H,W)
        mean = jnp.mean(y, axis=(0, 2, 3), keepdims=True)
        var = jnp.mean((y - mean) ** 2, axis=(0, 2, 3), keepdims=True)
        return (y - mean) * jax.lax.rsqrt(var + EPS) * g.reshape(1, -1, 1, 1) \
            + b.reshape(1, -1, 1, 1)

    dn = ("NCHW", "OIHW", "NCHW")
    hi = jax.lax.Precision.HIGHEST
    w1 = params["w1"].T[:, :, None, None]
    w2 = jnp.transpose(params["w2"].reshape(3, 3, width, width), (3, 2, 0, 1))
    w3 = params["w3"].T[:, :, None, None]

    y = jax.lax.conv_general_dilated(x, w1, (1, 1), "VALID",
                                     dimension_numbers=dn, precision=hi)
    y = jnp.maximum(bn(y, params["g1"], params["b1"]), 0.0)
    y = jax.lax.conv_general_dilated(y, w2, (1, 1), ((1, 1), (1, 1)),
                                     dimension_numbers=dn, precision=hi)
    y = jnp.maximum(bn(y, params["g2"], params["b2"]), 0.0)
    y = jax.lax.conv_general_dilated(y, w3, (1, 1), "VALID",
                                     dimension_numbers=dn, precision=hi)
    y = bn(y, params["g3"], params["b3"]) + x
    return jnp.maximum(y, 0.0)


# ----------------------------------- main --------------------------------------

if __name__ == "__main__":
    key = jax.random.PRNGKey(0)
    kx, kp = jax.random.split(key)

    # A layer1 non-first block of LN_ResNet2 with a torchvision-style Bottleneck:
    # inplanes = planes * expansion = 64, planes = 16 -> width 16, identity
    # shortcut (stride=1, downsample=None).
    N, inplanes, H, W = 2, 64, 16, 16
    planes = 16

    x = jax.random.normal(kx, (N, inplanes, H, W), jnp.float32)
    params = init_params(kp, inplanes, planes)

    fwd = jax.jit(functools.partial(bottleneck_forward, tm=128))
    out = jax.block_until_ready(fwd(x, params))
    assert out.shape == (N, planes * 4, H, W), out.shape

    ref = reference_forward(x, params)
    # bf16 weights/activations + single-pass bf16 MXU (per the perf review) vs
    # an f32 HIGHEST-precision reference: expect ~0.3% relative-L2 error.
    rel_l2 = float(jnp.sqrt(jnp.sum((out - ref) ** 2) / jnp.sum(ref ** 2)))
    max_abs = float(jnp.max(jnp.abs(out - ref)))
    assert rel_l2 < 1e-2 and max_abs < 2e-1, (rel_l2, max_abs)
    print("KERNEL_OK")
</pallas_src>

<mosaic_0001>
module attributes {stable_mosaic.version = 11 : i64} {
  func.func @kernel(%arg0: i32, %arg1: memref<1x16xf32, #tpu.memory_space<vmem>>, %arg2: memref<1x16xf32, #tpu.memory_space<vmem>>, %arg3: memref<1x16xf32, #tpu.memory_space<vmem>>, %arg4: memref<1x16xf32, #tpu.memory_space<vmem>>, %arg5: memref<3x48x16xbf16, #tpu.memory_space<vmem>>, %arg6: memref<256x16xbf16, #tpu.memory_space<vmem>>, %arg7: memref<256x16xbf16, #tpu.memory_space<vmem>>, %arg8: memref<8x16xf32, #tpu.memory_space<vmem>>, %arg9: memref<8x16xf32, #tpu.memory_space<vmem>>) attributes {dimension_semantics = [#tpu.dimension_semantics<parallel>], iteration_bounds = array<i64: 2>, scalar_prefetch = 0 : i64, scratch_operands = 0 : i64, tpu.core_type = #tpu.core_type<tc>, window_params = [{pipeline_mode = #tpu.pipeline_mode<synchronous>, transform_indices = @transform_0, window_bounds = array<i64: 1, 16>}, {pipeline_mode = #tpu.pipeline_mode<synchronous>, transform_indices = @transform_1, window_bounds = array<i64: 1, 16>}, {pipeline_mode = #tpu.pipeline_mode<synchronous>, transform_indices = @transform_2, window_bounds = array<i64: 1, 16>}, {pipeline_mode = #tpu.pipeline_mode<synchronous>, transform_indices = @transform_3, window_bounds = array<i64: 1, 16>}, {pipeline_mode = #tpu.pipeline_mode<synchronous>, transform_indices = @transform_4, window_bounds = array<i64: 3, 48, 16>}, {transform_indices = @transform_5, window_bounds = array<i64: 256, 16>}, {transform_indices = @transform_6, window_bounds = array<i64: 256, 16>}, {transform_indices = @transform_7, window_bounds = array<i64: 8, 16>}, {transform_indices = @transform_8, window_bounds = array<i64: 8, 16>}]} {
    %c0 = arith.constant 0 : index
    %c0_0 = arith.constant 0 : index
    %0 = vector.load %arg1[%c0, %c0_0] : memref<1x16xf32, #tpu.memory_space<vmem>>, vector<1x16xf32>
    %c0_1 = arith.constant 0 : index
    %c0_2 = arith.constant 0 : index
    %1 = vector.load %arg2[%c0_1, %c0_2] : memref<1x16xf32, #tpu.memory_space<vmem>>, vector<1x16xf32>
    %c0_3 = arith.constant 0 : index
    %c0_4 = arith.constant 0 : index
    %2 = vector.load %arg3[%c0_3, %c0_4] : memref<1x16xf32, #tpu.memory_space<vmem>>, vector<1x16xf32>
    %c0_5 = arith.constant 0 : index
    %c0_6 = arith.constant 0 : index
    %3 = vector.load %arg4[%c0_5, %c0_6] : memref<1x16xf32, #tpu.memory_space<vmem>>, vector<1x16xf32>
    %cst = arith.constant 0.001953125 : f32
    %4 = vector.broadcast %cst : f32 to vector<1x16xf32>
    %5 = arith.mulf %0, %4 : vector<1x16xf32>
    %cst_7 = arith.constant 0.001953125 : f32
    %6 = vector.broadcast %cst_7 : f32 to vector<1x16xf32>
    %7 = arith.mulf %1, %6 : vector<1x16xf32>
    %8 = arith.mulf %5, %5 : vector<1x16xf32>
    %9 = arith.subf %7, %8 : vector<1x16xf32>
    %cst_8 = arith.constant 0.000000e+00 : f32
    %10 = vector.broadcast %cst_8 : f32 to vector<1x16xf32>
    %11 = arith.maximumf %9, %10 : vector<1x16xf32>
    %cst_9 = arith.constant 9.99999974E-6 : f32
    %12 = vector.broadcast %cst_9 : f32 to vector<1x16xf32>
    %13 = arith.addf %11, %12 : vector<1x16xf32>
    %14 = math.rsqrt %13 : vector<1x16xf32>
    %15 = arith.mulf %14, %2 : vector<1x16xf32>
    %16 = arith.mulf %5, %15 : vector<1x16xf32>
    %17 = arith.subf %3, %16 : vector<1x16xf32>
    %c0_10 = arith.constant 0 : index
    %c0_11 = arith.constant 0 : index
    %18 = vector.load %arg6[%c0_10, %c0_11] : memref<256x16xbf16, #tpu.memory_space<vmem>>, vector<256x16xbf16>
    %19 = arith.extf %18 : vector<256x16xbf16> to vector<256x16xf32>
    %20 = vector.broadcast %15 : vector<1x16xf32> to vector<256x16xf32>
    %21 = arith.mulf %19, %20 : vector<256x16xf32>
    %22 = vector.broadcast %17 : vector<1x16xf32> to vector<256x16xf32>
    %23 = arith.addf %21, %22 : vector<256x16xf32>
    %cst_12 = arith.constant 0.000000e+00 : f32
    %24 = vector.broadcast %cst_12 : f32 to vector<256x16xf32>
    %25 = arith.maximumf %23, %24 : vector<256x16xf32>
    %26 = arith.truncf %25 : vector<256x16xf32> to vector<256x16xbf16>
    %27 = vector.shape_cast %26 : vector<256x16xbf16> to vector<16x16x16xbf16>
    %cst_13 = arith.constant 0.000000e+00 : bf16
    %28 = vector.broadcast %cst_13 : bf16 to vector<1x16x16xbf16>
    %29 = tpu.concatenate %28, %27, %28 in 0 : vector<1x16x16xbf16>, vector<16x16x16xbf16>, vector<1x16x16xbf16> -> vector<18x16x16xbf16>
    %cst_14 = arith.constant 0.000000e+00 : bf16
    %30 = vector.broadcast %cst_14 : bf16 to vector<18x1x16xbf16>
    %31 = tpu.concatenate %30, %29, %30 in 1 : vector<18x1x16xbf16>, vector<18x16x16xbf16>, vector<18x1x16xbf16> -> vector<18x18x16xbf16>
    %cst_15 = arith.constant 0.000000e+00 : f32
    %32 = vector.broadcast %cst_15 : f32 to vector<256x16xf32>
    %33 = vector.extract_strided_slice %31 {offsets = [0, 0, 0], sizes = [16, 18, 16], strides = [1, 1, 1]} : vector<18x18x16xbf16> to vector<16x18x16xbf16>
    %34 = vector.extract_strided_slice %33 {offsets = [0, 0, 0], sizes = [16, 16, 16], strides = [1, 1, 1]} : vector<16x18x16xbf16> to vector<16x16x16xbf16>
    %35 = vector.extract_strided_slice %33 {offsets = [0, 1, 0], sizes = [16, 16, 16], strides = [1, 1, 1]} : vector<16x18x16xbf16> to vector<16x16x16xbf16>
    %36 = vector.extract_strided_slice %33 {offsets = [0, 2, 0], sizes = [16, 16, 16], strides = [1, 1, 1]} : vector<16x18x16xbf16> to vector<16x16x16xbf16>
    %37 = tpu.concatenate %34, %35, %36 in 2 : vector<16x16x16xbf16>, vector<16x16x16xbf16>, vector<16x16x16xbf16> -> vector<16x16x48xbf16>
    %38 = vector.shape_cast %37 : vector<16x16x48xbf16> to vector<256x48xbf16>
    %c0_16 = arith.constant 0 : index
    %c0_17 = arith.constant 0 : index
    %c0_18 = arith.constant 0 : index
    %39 = vector.load %arg5[%c0_16, %c0_17, %c0_18] : memref<3x48x16xbf16, #tpu.memory_space<vmem>>, vector<1x48x16xbf16>
    %40 = vector.shape_cast %39 : vector<1x48x16xbf16> to vector<48x16xbf16>
    %cst_19 = arith.constant dense<0.000000e+00> : vector<256x16xf32>
    %41 = tpu.matmul %38, %40, %cst_19 {dimension_numbers = #tpu.dot_dimension_numbers<[1], [0], [0], [1], [0, 0, 1, 1], [], []>} : vector<256x48xbf16>, vector<48x16xbf16>, vector<256x16xf32> -> vector<256x16xf32>
    %42 = arith.addf %32, %41 : vector<256x16xf32>
    %43 = vector.extract_strided_slice %31 {offsets = [1, 0, 0], sizes = [16, 18, 16], strides = [1, 1, 1]} : vector<18x18x16xbf16> to vector<16x18x16xbf16>
    %44 = vector.extract_strided_slice %43 {offsets = [0, 0, 0], sizes = [16, 16, 16], strides = [1, 1, 1]} : vector<16x18x16xbf16> to vector<16x16x16xbf16>
    %45 = vector.extract_strided_slice %43 {offsets = [0, 1, 0], sizes = [16, 16, 16], strides = [1, 1, 1]} : vector<16x18x16xbf16> to vector<16x16x16xbf16>
    %46 = vector.extract_strided_slice %43 {offsets = [0, 2, 0], sizes = [16, 16, 16], strides = [1, 1, 1]} : vector<16x18x16xbf16> to vector<16x16x16xbf16>
    %47 = tpu.concatenate %44, %45, %46 in 2 : vector<16x16x16xbf16>, vector<16x16x16xbf16>, vector<16x16x16xbf16> -> vector<16x16x48xbf16>
    %48 = vector.shape_cast %47 : vector<16x16x48xbf16> to vector<256x48xbf16>
    %c1 = arith.constant 1 : index
    %c0_20 = arith.constant 0 : index
    %c0_21 = arith.constant 0 : index
    %49 = vector.load %arg5[%c1, %c0_20, %c0_21] : memref<3x48x16xbf16, #tpu.memory_space<vmem>>, vector<1x48x16xbf16>
    %50 = vector.shape_cast %49 : vector<1x48x16xbf16> to vector<48x16xbf16>
    %cst_22 = arith.constant dense<0.000000e+00> : vector<256x16xf32>
    %51 = tpu.matmul %48, %50, %cst_22 {dimension_numbers = #tpu.dot_dimension_numbers<[1], [0], [0], [1], [0, 0, 1, 1], [], []>} : vector<256x48xbf16>, vector<48x16xbf16>, vector<256x16xf32> -> vector<256x16xf32>
    %52 = arith.addf %42, %51 : vector<256x16xf32>
    %53 = vector.extract_strided_slice %31 {offsets = [2, 0, 0], sizes = [16, 18, 16], strides = [1, 1, 1]} : vector<18x18x16xbf16> to vector<16x18x16xbf16>
    %54 = vector.extract_strided_slice %53 {offsets = [0, 0, 0], sizes = [16, 16, 16], strides = [1, 1, 1]} : vector<16x18x16xbf16> to vector<16x16x16xbf16>
    %55 = vector.extract_strided_slice %53 {offsets = [0, 1, 0], sizes = [16, 16, 16], strides = [1, 1, 1]} : vector<16x18x16xbf16> to vector<16x16x16xbf16>
    %56 = vector.extract_strided_slice %53 {offsets = [0, 2, 0], sizes = [16, 16, 16], strides = [1, 1, 1]} : vector<16x18x16xbf16> to vector<16x16x16xbf16>
    %57 = tpu.concatenate %54, %55, %56 in 2 : vector<16x16x16xbf16>, vector<16x16x16xbf16>, vector<16x16x16xbf16> -> vector<16x16x48xbf16>
    %58 = vector.shape_cast %57 : vector<16x16x48xbf16> to vector<256x48xbf16>
    %c2 = arith.constant 2 : index
    %c0_23 = arith.constant 0 : index
    %c0_24 = arith.constant 0 : index
    %59 = vector.load %arg5[%c2, %c0_23, %c0_24] : memref<3x48x16xbf16, #tpu.memory_space<vmem>>, vector<1x48x16xbf16>
    %60 = vector.shape_cast %59 : vector<1x48x16xbf16> to vector<48x16xbf16>
    %cst_25 = arith.constant dense<0.000000e+00> : vector<256x16xf32>
    %61 = tpu.matmul %58, %60, %cst_25 {dimension_numbers = #tpu.dot_dimension_numbers<[1], [0], [0], [1], [0, 0, 1, 1], [], []>} : vector<256x48xbf16>, vector<48x16xbf16>, vector<256x16xf32> -> vector<256x16xf32>
    %62 = arith.addf %52, %61 : vector<256x16xf32>
    %63 = arith.truncf %62 : vector<256x16xf32> to vector<256x16xbf16>
    %c0_26 = arith.constant 0 : index
    %c0_27 = arith.constant 0 : index
    %64 = vector.load %arg7[%c0_26, %c0_27] : memref<256x16xbf16, #tpu.memory_space<vmem>>, vector<256x16xbf16>
    tpu.vector_store %arg7[%c0_26, %c0_27], %63 {strides = array<i32>} : memref<256x16xbf16, #tpu.memory_space<vmem>>, vector<256x16xbf16>,
    %65 = arith.extf %63 : vector<256x16xbf16> to vector<256x16xf32>
    %66 = vector.shape_cast %65 : vector<256x16xf32> to vector<32x8x16xf32>
    %cst_28 = arith.constant dense<0.000000e+00> : vector<8x16xf32>
    %67 = vector.multi_reduction <add>, %66, %cst_28 [0] : vector<32x8x16xf32> to vector<8x16xf32>
    %c0_29 = arith.constant 0 : index
    %c0_30 = arith.constant 0 : index
    %68 = vector.load %arg8[%c0_29, %c0_30] : memref<8x16xf32, #tpu.memory_space<vmem>>, vector<8x16xf32>
    tpu.vector_store %arg8[%c0_29, %c0_30], %67 {strides = array<i32>} : memref<8x16xf32, #tpu.memory_space<vmem>>, vector<8x16xf32>,
    %69 = arith.mulf %65, %65 : vector<256x16xf32>
    %70 = vector.shape_cast %69 : vector<256x16xf32> to vector<32x8x16xf32>
    %cst_31 = arith.constant dense<0.000000e+00> : vector<8x16xf32>
    %71 = vector.multi_reduction <add>, %70, %cst_31 [0] : vector<32x8x16xf32> to vector<8x16xf32>
    %c0_32 = arith.constant 0 : index
    %c0_33 = arith.constant 0 : index
    %72 = vector.load %arg9[%c0_32, %c0_33] : memref<8x16xf32, #tpu.memory_space<vmem>>, vector<8x16xf32>
    tpu.vector_store %arg9[%c0_32, %c0_33], %71 {strides = array<i32>} : memref<8x16xf32, #tpu.memory_space<vmem>>, vector<8x16xf32>,
    return
  }
  func.func @transform_0(%arg0: i32) -> (i32, i32) {
    %c0_i32 = arith.constant 0 : i32
    %c0_i32_0 = arith.constant 0 : i32
    %c0_i32_1 = arith.constant 0 : i32
    return %c0_i32, %c0_i32_0 : i32, i32
  }
  func.func @transform_1(%arg0: i32) -> (i32, i32) {
    %c0_i32 = arith.constant 0 : i32
    %c0_i32_0 = arith.constant 0 : i32
    %c0_i32_1 = arith.constant 0 : i32
    return %c0_i32, %c0_i32_0 : i32, i32
  }
  func.func @transform_2(%arg0: i32) -> (i32, i32) {
    %c0_i32 = arith.constant 0 : i32
    %c0_i32_0 = arith.constant 0 : i32
    %c0_i32_1 = arith.constant 0 : i32
    return %c0_i32, %c0_i32_0 : i32, i32
  }
  func.func @transform_3(%arg0: i32) -> (i32, i32) {
    %c0_i32 = arith.constant 0 : i32
    %c0_i32_0 = arith.constant 0 : i32
    %c0_i32_1 = arith.constant 0 : i32
    return %c0_i32, %c0_i32_0 : i32, i32
  }
  func.func @transform_4(%arg0: i32) -> (i32, i32, i32) {
    %c0_i32 = arith.constant 0 : i32
    %c0_i32_0 = arith.constant 0 : i32
    %c0_i32_1 = arith.constant 0 : i32
    %c0_i32_2 = arith.constant 0 : i32
    return %c0_i32, %c0_i32_0, %c0_i32_1 : i32, i32, i32
  }
  func.func @transform_5(%arg0: i32) -> (i32, i32) {
    %c0_i32 = arith.constant 0 : i32
    %c0_i32_0 = arith.constant 0 : i32
    return %arg0, %c0_i32 : i32, i32
  }
  func.func @transform_6(%arg0: i32) -> (i32, i32) {
    %c0_i32 = arith.constant 0 : i32
    %c0_i32_0 = arith.constant 0 : i32
    return %arg0, %c0_i32 : i32, i32
  }
  func.func @transform_7(%arg0: i32) -> (i32, i32) {
    %c0_i32 = arith.constant 0 : i32
    %c0_i32_0 = arith.constant 0 : i32
    return %arg0, %c0_i32 : i32, i32
  }
  func.func @transform_8(%arg0: i32) -> (i32, i32) {
    %c0_i32 = arith.constant 0 : i32
    %c0_i32_0 = arith.constant 0 : i32
    return %arg0, %c0_i32 : i32, i32
  }
}

module attributes {stable_mosaic.version = 11 : i64} {
  func.func @_stage1_kernel(%arg0: i32, %arg1: memref<128x64xf32, #tpu.memory_space<vmem>>, %arg2: memref<64x16xbf16, #tpu.memory_space<vmem>>, %arg3: memref<128x16xbf16, #tpu.memory_space<vmem>>, %arg4: memref<8x16xf32, #tpu.memory_space<vmem>>, %arg5: memref<8x16xf32, #tpu.memory_space<vmem>>) attributes {dimension_semantics = [#tpu.dimension_semantics<parallel>], iteration_bounds = array<i64: 4>, scalar_prefetch = 0 : i64, scratch_operands = 0 : i64, tpu.core_type = #tpu.core_type<tc>, window_params = [{transform_indices = @transform_0, window_bounds = array<i64: 128, 64>}, {pipeline_mode = #tpu.pipeline_mode<synchronous>, transform_indices = @transform_1, window_bounds = array<i64: 64, 16>}, {transform_indices = @transform_2, window_bounds = array<i64: 128, 16>}, {transform_indices = @transform_3, window_bounds = array<i64: 8, 16>}, {transform_indices = @transform_4, window_bounds = array<i64: 8, 16>}]} {
    %c0 = arith.constant 0 : index
    %c0_0 = arith.constant 0 : index
    %0 = vector.load %arg1[%c0, %c0_0] : memref<128x64xf32, #tpu.memory_space<vmem>>, vector<128x64xf32>
    %1 = arith.truncf %0 : vector<128x64xf32> to vector<128x64xbf16>
    %c0_1 = arith.constant 0 : index
    %c0_2 = arith.constant 0 : index
    %2 = vector.load %arg2[%c0_1, %c0_2] : memref<64x16xbf16, #tpu.memory_space<vmem>>, vector<64x16xbf16>
    %cst = arith.constant dense<0.000000e+00> : vector<128x16xf32>
    %3 = tpu.matmul %1, %2, %cst {dimension_numbers = #tpu.dot_dimension_numbers<[1], [0], [0], [1], [0, 0, 1, 1], [], []>} : vector<128x64xbf16>, vector<64x16xbf16>, vector<128x16xf32> -> vector<128x16xf32>
    %4 = arith.truncf %3 : vector<128x16xf32> to vector<128x16xbf16>
    %c0_3 = arith.constant 0 : index
    %c0_4 = arith.constant 0 : index
    %5 = vector.load %arg3[%c0_3, %c0_4] : memref<128x16xbf16, #tpu.memory_space<vmem>>, vector<128x16xbf16>
    tpu.vector_store %arg3[%c0_3, %c0_4], %4 {strides = array<i32>} : memref<128x16xbf16, #tpu.memory_space<vmem>>, vector<128x16xbf16>,
    %6 = arith.extf %4 : vector<128x16xbf16> to vector<128x16xf32>
    %7 = vector.shape_cast %6 : vector<128x16xf32> to vector<16x8x16xf32>
    %cst_5 = arith.constant dense<0.000000e+00> : vector<8x16xf32>
    %8 = vector.multi_reduction <add>, %7, %cst_5 [0] : vector<16x8x16xf32> to vector<8x16xf32>
    %c0_6 = arith.constant 0 : index
    %c0_7 = arith.constant 0 : index
    %9 = vector.load %arg4[%c0_6, %c0_7] : memref<8x16xf32, #tpu.memory_space<vmem>>, vector<8x16xf32>
    tpu.vector_store %arg4[%c0_6, %c0_7], %8 {strides = array<i32>} : memref<8x16xf32, #tpu.memory_space<vmem>>, vector<8x16xf32>,
    %10 = arith.mulf %6, %6 : vector<128x16xf32>
    %11 = vector.shape_cast %10 : vector<128x16xf32> to vector<16x8x16xf32>
    %cst_8 = arith.constant dense<0.000000e+00> : vector<8x16xf32>
    %12 = vector.multi_reduction <add>, %11, %cst_8 [0] : vector<16x8x16xf32> to vector<8x16xf32>
    %c0_9 = arith.constant 0 : index
    %c0_10 = arith.constant 0 : index
    %13 = vector.load %arg5[%c0_9, %c0_10] : memref<8x16xf32, #tpu.memory_space<vmem>>, vector<8x16xf32>
    tpu.vector_store %arg5[%c0_9, %c0_10], %12 {strides = array<i32>} : memref<8x16xf32, #tpu.memory_space<vmem>>, vector<8x16xf32>,
    return
  }
  func.func @transform_0(%arg0: i32) -> (i32, i32) {
    %c0_i32 = arith.constant 0 : i32
    %c0_i32_0 = arith.constant 0 : i32
    return %arg0, %c0_i32 : i32, i32
  }
  func.func @transform_1(%arg0: i32) -> (i32, i32) {
    %c0_i32 = arith.constant 0 : i32
    %c0_i32_0 = arith.constant 0 : i32
    %c0_i32_1 = arith.constant 0 : i32
    return %c0_i32, %c0_i32_0 : i32, i32
  }
  func.func @transform_2(%arg0: i32) -> (i32, i32) {
    %c0_i32 = arith.constant 0 : i32
    %c0_i32_0 = arith.constant 0 : i32
    return %arg0, %c0_i32 : i32, i32
  }
  func.func @transform_3(%arg0: i32) -> (i32, i32) {
    %c0_i32 = arith.constant 0 : i32
    %c0_i32_0 = arith.constant 0 : i32
    return %arg0, %c0_i32 : i32, i32
  }
  func.func @transform_4(%arg0: i32) -> (i32, i32) {
    %c0_i32 = arith.constant 0 : i32
    %c0_i32_0 = arith.constant 0 : i32
    return %arg0, %c0_i32 : i32, i32
  }
}

module attributes {stable_mosaic.version = 11 : i64} {
  func.func @kernel(%arg0: i32, %arg1: memref<128x16xbf16, #tpu.memory_space<vmem>>, %arg2: memref<1x16xf32, #tpu.memory_space<vmem>>, %arg3: memref<1x16xf32, #tpu.memory_space<vmem>>, %arg4: memref<1x16xf32, #tpu.memory_space<vmem>>, %arg5: memref<1x16xf32, #tpu.memory_space<vmem>>, %arg6: memref<16x64xbf16, #tpu.memory_space<vmem>>, %arg7: memref<128x64xbf16, #tpu.memory_space<vmem>>, %arg8: memref<8x64xf32, #tpu.memory_space<vmem>>, %arg9: memref<8x64xf32, #tpu.memory_space<vmem>>) attributes {dimension_semantics = [#tpu.dimension_semantics<parallel>], iteration_bounds = array<i64: 4>, scalar_prefetch = 0 : i64, scratch_operands = 0 : i64, tpu.core_type = #tpu.core_type<tc>, window_params = [{transform_indices = @transform_0, window_bounds = array<i64: 128, 16>}, {pipeline_mode = #tpu.pipeline_mode<synchronous>, transform_indices = @transform_1, window_bounds = array<i64: 1, 16>}, {pipeline_mode = #tpu.pipeline_mode<synchronous>, transform_indices = @transform_2, window_bounds = array<i64: 1, 16>}, {pipeline_mode = #tpu.pipeline_mode<synchronous>, transform_indices = @transform_3, window_bounds = array<i64: 1, 16>}, {pipeline_mode = #tpu.pipeline_mode<synchronous>, transform_indices = @transform_4, window_bounds = array<i64: 1, 16>}, {pipeline_mode = #tpu.pipeline_mode<synchronous>, transform_indices = @transform_5, window_bounds = array<i64: 16, 64>}, {transform_indices = @transform_6, window_bounds = array<i64: 128, 64>}, {transform_indices = @transform_7, window_bounds = array<i64: 8, 64>}, {transform_indices = @transform_8, window_bounds = array<i64: 8, 64>}]} {
    %c0 = arith.constant 0 : index
    %c0_0 = arith.constant 0 : index
    %0 = vector.load %arg2[%c0, %c0_0] : memref<1x16xf32, #tpu.memory_space<vmem>>, vector<1x16xf32>
    %c0_1 = arith.constant 0 : index
    %c0_2 = arith.constant 0 : index
    %1 = vector.load %arg3[%c0_1, %c0_2] : memref<1x16xf32, #tpu.memory_space<vmem>>, vector<1x16xf32>
    %c0_3 = arith.constant 0 : index
    %c0_4 = arith.constant 0 : index
    %2 = vector.load %arg4[%c0_3, %c0_4] : memref<1x16xf32, #tpu.memory_space<vmem>>, vector<1x16xf32>
    %c0_5 = arith.constant 0 : index
    %c0_6 = arith.constant 0 : index
    %3 = vector.load %arg5[%c0_5, %c0_6] : memref<1x16xf32, #tpu.memory_space<vmem>>, vector<1x16xf32>
    %cst = arith.constant 0.001953125 : f32
    %4 = vector.broadcast %cst : f32 to vector<1x16xf32>
    %5 = arith.mulf %0, %4 : vector<1x16xf32>
    %cst_7 = arith.constant 0.001953125 : f32
    %6 = vector.broadcast %cst_7 : f32 to vector<1x16xf32>
    %7 = arith.mulf %1, %6 : vector<1x16xf32>
    %8 = arith.mulf %5, %5 : vector<1x16xf32>
    %9 = arith.subf %7, %8 : vector<1x16xf32>
    %cst_8 = arith.constant 0.000000e+00 : f32
    %10 = vector.broadcast %cst_8 : f32 to vector<1x16xf32>
    %11 = arith.maximumf %9, %10 : vector<1x16xf32>
    %cst_9 = arith.constant 9.99999974E-6 : f32
    %12 = vector.broadcast %cst_9 : f32 to vector<1x16xf32>
    %13 = arith.addf %11, %12 : vector<1x16xf32>
    %14 = math.rsqrt %13 : vector<1x16xf32>
    %15 = arith.mulf %14, %2 : vector<1x16xf32>
    %16 = arith.mulf %5, %15 : vector<1x16xf32>
    %17 = arith.subf %3, %16 : vector<1x16xf32>
    %c0_10 = arith.constant 0 : index
    %c0_11 = arith.constant 0 : index
    %18 = vector.load %arg1[%c0_10, %c0_11] : memref<128x16xbf16, #tpu.memory_space<vmem>>, vector<128x16xbf16>
    %19 = arith.extf %18 : vector<128x16xbf16> to vector<128x16xf32>
    %20 = vector.broadcast %15 : vector<1x16xf32> to vector<128x16xf32>
    %21 = arith.mulf %19, %20 : vector<128x16xf32>
    %22 = vector.broadcast %17 : vector<1x16xf32> to vector<128x16xf32>
    %23 = arith.addf %21, %22 : vector<128x16xf32>
    %cst_12 = arith.constant 0.000000e+00 : f32
    %24 = vector.broadcast %cst_12 : f32 to vector<128x16xf32>
    %25 = arith.maximumf %23, %24 : vector<128x16xf32>
    %26 = arith.truncf %25 : vector<128x16xf32> to vector<128x16xbf16>
    %c0_13 = arith.constant 0 : index
    %c0_14 = arith.constant 0 : index
    %27 = vector.load %arg6[%c0_13, %c0_14] : memref<16x64xbf16, #tpu.memory_space<vmem>>, vector<16x64xbf16>
    %cst_15 = arith.constant dense<0.000000e+00> : vector<128x64xf32>
    %28 = tpu.matmul %26, %27, %cst_15 {dimension_numbers = #tpu.dot_dimension_numbers<[1], [0], [0], [1], [0, 0, 1, 1], [], []>} : vector<128x16xbf16>, vector<16x64xbf16>, vector<128x64xf32> -> vector<128x64xf32>
    %29 = arith.truncf %28 : vector<128x64xf32> to vector<128x64xbf16>
    %c0_16 = arith.constant 0 : index
    %c0_17 = arith.constant 0 : index
    %30 = vector.load %arg7[%c0_16, %c0_17] : memref<128x64xbf16, #tpu.memory_space<vmem>>, vector<128x64xbf16>
    tpu.vector_store %arg7[%c0_16, %c0_17], %29 {strides = array<i32>} : memref<128x64xbf16, #tpu.memory_space<vmem>>, vector<128x64xbf16>,
    %31 = arith.extf %29 : vector<128x64xbf16> to vector<128x64xf32>
    %32 = vector.shape_cast %31 : vector<128x64xf32> to vector<16x8x64xf32>
    %cst_18 = arith.constant dense<0.000000e+00> : vector<8x64xf32>
    %33 = vector.multi_reduction <add>, %32, %cst_18 [0] : vector<16x8x64xf32> to vector<8x64xf32>
    %c0_19 = arith.constant 0 : index
    %c0_20 = arith.constant 0 : index
    %34 = vector.load %arg8[%c0_19, %c0_20] : memref<8x64xf32, #tpu.memory_space<vmem>>, vector<8x64xf32>
    tpu.vector_store %arg8[%c0_19, %c0_20], %33 {strides = array<i32>} : memref<8x64xf32, #tpu.memory_space<vmem>>, vector<8x64xf32>,
    %35 = arith.mulf %31, %31 : vector<128x64xf32>
    %36 = vector.shape_cast %35 : vector<128x64xf32> to vector<16x8x64xf32>
    %cst_21 = arith.constant dense<0.000000e+00> : vector<8x64xf32>
    %37 = vector.multi_reduction <add>, %36, %cst_21 [0] : vector<16x8x64xf32> to vector<8x64xf32>
    %c0_22 = arith.constant 0 : index
    %c0_23 = arith.constant 0 : index
    %38 = vector.load %arg9[%c0_22, %c0_23] : memref<8x64xf32, #tpu.memory_space<vmem>>, vector<8x64xf32>
    tpu.vector_store %arg9[%c0_22, %c0_23], %37 {strides = array<i32>} : memref<8x64xf32, #tpu.memory_space<vmem>>, vector<8x64xf32>,
    return
  }
  func.func @transform_0(%arg0: i32) -> (i32, i32) {
    %c0_i32 = arith.constant 0 : i32
    %c0_i32_0 = arith.constant 0 : i32
    return %arg0, %c0_i32 : i32, i32
  }
  func.func @transform_1(%arg0: i32) -> (i32, i32) {
    %c0_i32 = arith.constant 0 : i32
    %c0_i32_0 = arith.constant 0 : i32
    %c0_i32_1 = arith.constant 0 : i32
    return %c0_i32, %c0_i32_0 : i32, i32
  }
  func.func @transform_2(%arg0: i32) -> (i32, i32) {
    %c0_i32 = arith.constant 0 : i32
    %c0_i32_0 = arith.constant 0 : i32
    %c0_i32_1 = arith.constant 0 : i32
    return %c0_i32, %c0_i32_0 : i32, i32
  }
  func.func @transform_3(%arg0: i32) -> (i32, i32) {
    %c0_i32 = arith.constant 0 : i32
    %c0_i32_0 = arith.constant 0 : i32
    %c0_i32_1 = arith.constant 0 : i32
    return %c0_i32, %c0_i32_0 : i32, i32
  }
  func.func @transform_4(%arg0: i32) -> (i32, i32) {
    %c0_i32 = arith.constant 0 : i32
    %c0_i32_0 = arith.constant 0 : i32
    %c0_i32_1 = arith.constant 0 : i32
    return %c0_i32, %c0_i32_0 : i32, i32
  }
  func.func @transform_5(%arg0: i32) -> (i32, i32) {
    %c0_i32 = arith.constant 0 : i32
    %c0_i32_0 = arith.constant 0 : i32
    %c0_i32_1 = arith.constant 0 : i32
    return %c0_i32, %c0_i32_0 : i32, i32
  }
  func.func @transform_6(%arg0: i32) -> (i32, i32) {
    %c0_i32 = arith.constant 0 : i32
    %c0_i32_0 = arith.constant 0 : i32
    return %arg0, %c0_i32 : i32, i32
  }
  func.func @transform_7(%arg0: i32) -> (i32, i32) {
    %c0_i32 = arith.constant 0 : i32
    %c0_i32_0 = arith.constant 0 : i32
    return %arg0, %c0_i32 : i32, i32
  }
  func.func @transform_8(%arg0: i32) -> (i32, i32) {
    %c0_i32 = arith.constant 0 : i32
    %c0_i32_0 = arith.constant 0 : i32
    return %arg0, %c0_i32 : i32, i32
  }
}

module attributes {stable_mosaic.version = 11 : i64} {
  func.func @kernel(%arg0: i32, %arg1: memref<128x64xbf16, #tpu.memory_space<vmem>>, %arg2: memref<1x64xf32, #tpu.memory_space<vmem>>, %arg3: memref<1x64xf32, #tpu.memory_space<vmem>>, %arg4: memref<1x64xf32, #tpu.memory_space<vmem>>, %arg5: memref<1x64xf32, #tpu.memory_space<vmem>>, %arg6: memref<128x64xf32, #tpu.memory_space<vmem>>, %arg7: memref<128x64xf32, #tpu.memory_space<vmem>>) attributes {dimension_semantics = [#tpu.dimension_semantics<parallel>], iteration_bounds = array<i64: 4>, scalar_prefetch = 0 : i64, scratch_operands = 0 : i64, tpu.core_type = #tpu.core_type<tc>, window_params = [{transform_indices = @transform_0, window_bounds = array<i64: 128, 64>}, {pipeline_mode = #tpu.pipeline_mode<synchronous>, transform_indices = @transform_1, window_bounds = array<i64: 1, 64>}, {pipeline_mode = #tpu.pipeline_mode<synchronous>, transform_indices = @transform_2, window_bounds = array<i64: 1, 64>}, {pipeline_mode = #tpu.pipeline_mode<synchronous>, transform_indices = @transform_3, window_bounds = array<i64: 1, 64>}, {pipeline_mode = #tpu.pipeline_mode<synchronous>, transform_indices = @transform_4, window_bounds = array<i64: 1, 64>}, {transform_indices = @transform_5, window_bounds = array<i64: 128, 64>}, {transform_indices = @transform_6, window_bounds = array<i64: 128, 64>}]} {
    %c0 = arith.constant 0 : index
    %c0_0 = arith.constant 0 : index
    %0 = vector.load %arg2[%c0, %c0_0] : memref<1x64xf32, #tpu.memory_space<vmem>>, vector<1x64xf32>
    %c0_1 = arith.constant 0 : index
    %c0_2 = arith.constant 0 : index
    %1 = vector.load %arg3[%c0_1, %c0_2] : memref<1x64xf32, #tpu.memory_space<vmem>>, vector<1x64xf32>
    %c0_3 = arith.constant 0 : index
    %c0_4 = arith.constant 0 : index
    %2 = vector.load %arg4[%c0_3, %c0_4] : memref<1x64xf32, #tpu.memory_space<vmem>>, vector<1x64xf32>
    %c0_5 = arith.constant 0 : index
    %c0_6 = arith.constant 0 : index
    %3 = vector.load %arg5[%c0_5, %c0_6] : memref<1x64xf32, #tpu.memory_space<vmem>>, vector<1x64xf32>
    %cst = arith.constant 0.001953125 : f32
    %4 = vector.broadcast %cst : f32 to vector<1x64xf32>
    %5 = arith.mulf %0, %4 : vector<1x64xf32>
    %cst_7 = arith.constant 0.001953125 : f32
    %6 = vector.broadcast %cst_7 : f32 to vector<1x64xf32>
    %7 = arith.mulf %1, %6 : vector<1x64xf32>
    %8 = arith.mulf %5, %5 : vector<1x64xf32>
    %9 = arith.subf %7, %8 : vector<1x64xf32>
    %cst_8 = arith.constant 0.000000e+00 : f32
    %10 = vector.broadcast %cst_8 : f32 to vector<1x64xf32>
    %11 = arith.maximumf %9, %10 : vector<1x64xf32>
    %cst_9 = arith.constant 9.99999974E-6 : f32
    %12 = vector.broadcast %cst_9 : f32 to vector<1x64xf32>
    %13 = arith.addf %11, %12 : vector<1x64xf32>
    %14 = math.rsqrt %13 : vector<1x64xf32>
    %15 = arith.mulf %14, %2 : vector<1x64xf32>
    %16 = arith.mulf %5, %15 : vector<1x64xf32>
    %17 = arith.subf %3, %16 : vector<1x64xf32>
    %c0_10 = arith.constant 0 : index
    %c0_11 = arith.constant 0 : index
    %18 = vector.load %arg1[%c0_10, %c0_11] : memref<128x64xbf16, #tpu.memory_space<vmem>>, vector<128x64xbf16>
    %19 = arith.extf %18 : vector<128x64xbf16> to vector<128x64xf32>
    %20 = vector.broadcast %15 : vector<1x64xf32> to vector<128x64xf32>
    %21 = arith.mulf %19, %20 : vector<128x64xf32>
    %22 = vector.broadcast %17 : vector<1x64xf32> to vector<128x64xf32>
    %23 = arith.addf %21, %22 : vector<128x64xf32>
    %c0_12 = arith.constant 0 : index
    %c0_13 = arith.constant 0 : index
    %24 = vector.load %arg6[%c0_12, %c0_13] : memref<128x64xf32, #tpu.memory_space<vmem>>, vector<128x64xf32>
    %25 = arith.addf %23, %24 : vector<128x64xf32>
    %cst_14 = arith.constant 0.000000e+00 : f32
    %26 = vector.broadcast %cst_14 : f32 to vector<128x64xf32>
    %27 = arith.maximumf %25, %26 : vector<128x64xf32>
    %c0_15 = arith.constant 0 : index
    %c0_16 = arith.constant 0 : index
    %28 = vector.load %arg7[%c0_15, %c0_16] : memref<128x64xf32, #tpu.memory_space<vmem>>, vector<128x64xf32>
    tpu.vector_store %arg7[%c0_15, %c0_16], %27 {strides = array<i32>} : memref<128x64xf32, #tpu.memory_space<vmem>>, vector<128x64xf32>,
    return
  }
  func.func @transform_0(%arg0: i32) -> (i32, i32) {
    %c0_i32 = arith.constant 0 : i32
    %c0_i32_0 = arith.constant 0 : i32
    return %arg0, %c0_i32 : i32, i32
  }
  func.func @transform_1(%arg0: i32) -> (i32, i32) {
    %c0_i32 = arith.constant 0 : i32
    %c0_i32_0 = arith.constant 0 : i32
    %c0_i32_1 = arith.constant 0 : i32
    return %c0_i32, %c0_i32_0 : i32, i32
  }
  func.func @transform_2(%arg0: i32) -> (i32, i32) {
    %c0_i32 = arith.constant 0 : i32
    %c0_i32_0 = arith.constant 0 : i32
    %c0_i32_1 = arith.constant 0 : i32
    return %c0_i32, %c0_i32_0 : i32, i32
  }
  func.func @transform_3(%arg0: i32) -> (i32, i32) {
    %c0_i32 = arith.constant 0 : i32
    %c0_i32_0 = arith.constant 0 : i32
    %c0_i32_1 = arith.constant 0 : i32
    return %c0_i32, %c0_i32_0 : i32, i32
  }
  func.func @transform_4(%arg0: i32) -> (i32, i32) {
    %c0_i32 = arith.constant 0 : i32
    %c0_i32_0 = arith.constant 0 : i32
    %c0_i32_1 = arith.constant 0 : i32
    return %c0_i32, %c0_i32_0 : i32, i32
  }
  func.func @transform_5(%arg0: i32) -> (i32, i32) {
    %c0_i32 = arith.constant 0 : i32
    %c0_i32_0 = arith.constant 0 : i32
    return %arg0, %c0_i32 : i32, i32
  }
  func.func @transform_6(%arg0: i32) -> (i32, i32) {
    %c0_i32 = arith.constant 0 : i32
    %c0_i32_0 = arith.constant 0 : i32
    return %arg0, %c0_i32 : i32, i32
  }
}

</mosaic_0001>

<bundles_post_ra>
// kernel: bottleneck_forward.6
= control target key start
LH: loop header
LB: loop body
LE: loop exit
PB: predicated region body
PF: predicated region fallthrough
CT: control target
= control target key end

     0   :  { %s1057_s27 = smov 0   ;;  %s1199_s0 = inlined_call_operand.vmem [shape: bf16[512,16], index: 0, kind: input, shape index: {}]   ;;  %s1200_s1 = inlined_call_operand.vmem [shape: f32[1,16], index: 1, kind: input, shape index: {}]   ;;  %s1201_s2 = inlined_call_operand.vmem [shape: f32[1,16], index: 2, kind: input, shape index: {}]   ;;  %s1202_s3 = inlined_call_operand.vmem [shape: f32[1,16], index: 3, kind: input, shape index: {}]   ;;  %s1203_s4 = inlined_call_operand.vmem [shape: f32[1,16], index: 4, kind: input, shape index: {}]   ;;  %s1204_s5 = inlined_call_operand.vmem [shape: bf16[16,64], index: 5, kind: input, shape index: {}]   ;;  %s1205_s6 = inlined_call_operand.vmem [shape: bf16[512,64], index: 6, kind: output, shape index: {0}]   ;;  %s1206_s7 = inlined_call_operand.vmem [shape: f32[32,64], index: 7, kind: output, shape index: {1}]   ;;  %s1207_s8 = inlined_call_operand.vmem [shape: f32[32,64], index: 8, kind: output, shape index: {2}]  }
   0x1 LB: > { %s1063_s28 = sadd.s32 4294967295, %s1010_s27   ;;  %p875_p0 = scmp.ge.s32.totalorder %s1010_s27, 1  ;;  %s1010_s27 = sphi %s1057_s27, %s19_s27  }
   0x2   : > { %p268_p1 = scmp.lt.s32.totalorder %s1010_s27, 5 }
   0x4   : > { %p269_p2 = pnand %p875_p0, %p268_p1 }
   0x5   : > { %v1001_v0 = vld [vmem:[%s1204_s5] sm:$0xff] (!%p269_p2)   ;;  %s876_s13 = sshll.u32 (!%p269_p2), %s1063_s28, 4  ;;  %v378_v9 = vlaneseq (!%p269_p2)  ;;  %vm453_vm0 = vcmask (!%p269_p2), 130048   ;;  %vm639_vm1 = vcmask (!%p269_p2), 519168   ;;  %vm672_vm2 = vcmask (!%p269_p2), 523264   ;;  %p322_p4 = scmp.lt.s32.totalorder (!%p269_p2), %s1063_s28, 3 }
   0x6   : > { %272 = sbr.rel (%p269_p2) target bundleno = 298 (0x12a), region = 44  ;;  %v331_v1 = vld [vmem:[%s1200_s1] sm:$0x1] (!%p269_p2)  ;;  %973 = vmatprep.subr.bf16.mxu0 (!%p269_p2), %v1001_v0  ;;  %991 = vmatprep.subr.bf16.mxu1 (!%p269_p2), %v1001_v0  ;;  %p311_p3 = scmp.lt.s32.totalorder (!%p269_p2), %s876_s13, 63 }
   0x7   : > { %v332_v2 = vld [vmem:[%s1201_s2] sm:$0x1] (!%p269_p2)  ;;  %v335_v3 = vmul.f32 (!%p269_p2), 0.001953125, %v331_v1  ;;  %974 = vmatpush3.bf16.msra.mxu0 (!%p269_p2), %v1001_v0  ;;  %992 = vmatpush3.bf16.msra.mxu1 (!%p269_p2), %v1001_v0  ;;  %v379_v10 = vshrl.u32 (!%p269_p2), %v378_v9, 7 }
   0x8   : > { %v336_v4 = vmul.f32 (!%p269_p2), 0.001953125, %v332_v2  ;;  %v333_v12 = vld [vmem:[%s1202_s3] sm:$0x1] (!%p269_p2) }
   0x9   : > { %v337_v5 = vmul.f32 (!%p269_p2), %v335_v3, %v335_v3  ;;  %v380_v15 = vsub.s32 (!%p269_p2), 0, %v379_v10  ;;  %v334_v28 = vld [vmem:[%s1203_s4] sm:$0x1] (!%p269_p2) }
   0xb   : > { %v338_v6 = vsub.f32 (!%p269_p2), %v336_v4, %v337_v5 }
   0xd   : > { %v339_v7 = vmax.f32 %v338_v6, 0.0  ;;  %s1209_s13 = smov (!%p311_p3, %s876_s13), 63  ;;  %s1211_s28 = smov (!%p322_p4, %s1063_s28), 3 }
   0xe   : > { %s877_s14 = sshll.u32 %s1209_s13, 2  ;;  %s880_s25 = sshll.u32 %s1211_s28, 3 }
   0xf   : > { %v340_v8 = vadd.f32 1e-05, %v339_v7  ;;  %s314_s17 = scalar_lea.vmem %s1199_s0, %s877_s14  ;;  %s1108_s24 = scalar_lea.vmem %s1205_s6, %s877_s14 }
  0x10   : > { %v926_v11 = vld [vmem:[%s314_s17] sm:$0xff]   ;;  %v957_v13 = vld [vmem:[%s314_s17 + $0x8] sm:$0xff]   ;;  %v958_v14 = vld [vmem:[%s314_s17 + $0x10] sm:$0xff]   ;;  %s325_s30 = scalar_lea.vmem %s1206_s7, %s880_s25  ;;  %s329_s10 = scalar_lea.vmem %s1207_s8, %s880_s25 }
  0x11   : > { %1002 = vrsqrt.f32 %v340_v8  ;;  %v959_v16 = vld [vmem:[%s314_s17 + $0x18] sm:$0xff]   ;;  %v960_v17 = vld [vmem:[%s314_s17 + $0x20] sm:$0xff]   ;;  %v927_v19 = vunpack.c.l.bf16 %v926_v11  ;;  %v928_v20 = vunpack.c.h.bf16 %v926_v11  ;;  %v961_v21 = vld [vmem:[%s314_s17 + $0x28] sm:$0xff]   ;;  %v931_v23 = vunpack.c.l.bf16 %v957_v13 }
  0x12   : > { %v932_v24 = vunpack.c.h.bf16 %v957_v13  ;;  %v935_v25 = vunpack.c.l.bf16 %v958_v14  ;;  %v962_v26 = vld [vmem:[%s314_s17 + $0x30] sm:$0xff]   ;;  %v1088_v27 = vld [vmem:[%s314_s17 + $0x38] sm:$0xff]   ;;  %v936_v29 = vunpack.c.h.bf16 %v958_v14  ;;  %v939_v30 = vunpack.c.l.bf16 %v959_v16 }
  0x13   : > { %v940_v31 = vunpack.c.h.bf16 %v959_v16  ;;  %v943_v32 = vunpack.c.l.bf16 %v960_v17  ;;  %v944_v35 = vunpack.c.h.bf16 %v960_v17  ;;  %v947_v36 = vunpack.c.l.bf16 %v961_v21 }
  0x14   : > { %v948_v37 = vunpack.c.h.bf16 %v961_v21  ;;  %v951_v38 = vunpack.c.l.bf16 %v962_v26  ;;  %v952_v39 = vunpack.c.h.bf16 %v962_v26  ;;  %v955_v40 = vunpack.c.l.bf16 %v1088_v27 }
  0x15   : > { %v956_v8 = vunpack.c.h.bf16 %v1088_v27 }
  0x1b   : > { %v1003_v18 = vpop.eup %1002 }
  0x1c   : > { %v342_v22 = vmul.f32 %v1003_v18, %v333_v12 }
  0x1e   : > { %v343_v33 = vmul.f32 %v342_v22, %v335_v3  ;;  %v381_v34 = vrot.slane %v342_v22, %v380_v15 }
  0x20   : > { %v344_v41 = vsub.f32 %v334_v28, %v343_v33  ;;  %v383_v42 = vmul.f32 %v927_v19, %v381_v34  ;;  %v384_v43 = vmul.f32 %v928_v20, %v381_v34  ;;  %v385_v44 = vmul.f32 %v931_v23, %v381_v34 }
  0x21   : > { %v386_v45 = vmul.f32 %v932_v24, %v381_v34  ;;  %v387_v46 = vmul.f32 %v935_v25, %v381_v34  ;;  %v388_v47 = vmul.f32 %v936_v29, %v381_v34  ;;  %v389_v48 = vmul.f32 %v939_v30, %v381_v34 }
  0x22   : > { %v403_v49 = vrot.slane %v344_v41, %v380_v15  ;;  %v390_v50 = vmul.f32 %v940_v31, %v381_v34  ;;  %v391_v51 = vmul.f32 %v943_v32, %v381_v34  ;;  %v392_v52 = vmul.f32 %v944_v35, %v381_v34 }
  0x23   : > { %v393_v53 = vmul.f32 %v947_v36, %v381_v34  ;;  %v394_v54 = vmul.f32 %v948_v37, %v381_v34  ;;  %v395_v55 = vmul.f32 %v951_v38, %v381_v34  ;;  %v396_v56 = vmul.f32 %v952_v39, %v381_v34 }
  0x24   : > { %v405_v57 = vadd.f32 %v403_v49, %v383_v42  ;;  %v406_v58 = vadd.f32 %v403_v49, %v384_v43  ;;  %v407_v59 = vadd.f32 %v403_v49, %v385_v44  ;;  %v408_v60 = vadd.f32 %v403_v49, %v386_v45 }
  0x25   : > { %v409_v61 = vadd.f32 %v403_v49, %v387_v46  ;;  %v410_v62 = vadd.f32 %v403_v49, %v388_v47  ;;  %v411_v63 = vadd.f32 %v403_v49, %v389_v48  ;;  %v412_v0 = vadd.f32 %v403_v49, %v390_v50 }
  0x26   : > { %v421_v1 = vmax.f32 %v405_v57, 0.0  ;;  %v422_v2 = vmax.f32 %v406_v58, 0.0  ;;  %v423_v3 = vmax.f32 %v407_v59, 0.0  ;;  %v424_v4 = vmax.f32 %v408_v60, 0.0 }
  0x27   : > { %v425_v5 = vmax.f32 %v409_v61, 0.0  ;;  %v426_v6 = vmax.f32 %v410_v62, 0.0  ;;  %v427_v7 = vmax.f32 %v411_v63, 0.0  ;;  %v413_v11 = vadd.f32 %v403_v49, %v391_v51 }
  0x28   : > { %v437_v9 = vpack.c.bf16 %v422_v2, %v421_v1  ;;  %v438_v10 = vpack.c.bf16 %v424_v4, %v423_v3  ;;  %v414_v12 = vadd.f32 %v403_v49, %v392_v52  ;;  %v428_v14 = vmax.f32 %v412_v0, 0.0 }
  0x29   : > { %v439_v13 = vpack.c.bf16 %v426_v6, %v425_v5  ;;  %v415_v15 = vadd.f32 %v403_v49, %v393_v53  ;;  %v416_v16 = vadd.f32 %v403_v49, %v394_v54  ;;  %v429_v17 = vmax.f32 %v413_v11, 0.0 }
  0x2a   : > { %975 = vmatprep.mubr.msk.bf16.mxu0 %vm453_vm0, %v437_v9  ;;  %v430_v18 = vmax.f32 %v414_v12, 0.0  ;;  %v417_v19 = vadd.f32 %v403_v49, %v395_v55  ;;  %v418_v20 = vadd.f32 %v403_v49, %v396_v56  ;;  %v397_v23 = vmul.f32 %v955_v40, %v381_v34 }
  0x2b   : > { %976 = vmatmul.mubr.msk.bf16.vlgmr.msra.gmra.mrb[0].mxu0 %vm453_vm0, %v438_v10  ;;  %v431_v21 = vmax.f32 %v415_v15, 0.0  ;;  %v432_v22 = vmax.f32 %v416_v16, 0.0  ;;  %v398_v24 = vmul.f32 %v956_v8, %v381_v34  ;;  %v440_v32 = vpack.c.bf16 %v428_v14, %v427_v7 }
  0x2c   : > { %979 = vmatprep.mubr.msk.bf16.mxu0 %vm453_vm0, %v439_v13  ;;  %v441_v25 = vpack.c.bf16 %v430_v18, %v429_v17  ;;  %v433_v26 = vmax.f32 %v417_v19, 0.0  ;;  %v434_v27 = vmax.f32 %v418_v20, 0.0  ;;  %v419_v29 = vadd.f32 %v403_v49, %v397_v23 }
  0x2d   : > { %v442_v28 = vpack.c.bf16 %v432_v22, %v431_v21  ;;  %v420_v30 = vadd.f32 %v403_v49, %v398_v24 }
  0x2e   : > { %983 = vmatprep.mubr.msk.bf16.mxu1 %vm453_vm0, %v441_v25  ;;  %v443_v31 = vpack.c.bf16 %v434_v27, %v433_v26  ;;  %v435_v33 = vmax.f32 %v419_v29, 0.0 }
  0x2f   : > { %984 = vmatmul.mubr.msk.bf16.vlgmr.msra.gmra.mrb[0].mxu1 %vm453_vm0, %v442_v28  ;;  %v436_v35 = vmax.f32 %v420_v30, 0.0 }
  0x30   : > { %987 = vmatprep.mubr.msk.bf16.mxu1 %vm453_vm0, %v443_v31 }
  0x31   : > { %v444_v34 = vpack.c.bf16 %v436_v35, %v435_v33 }
  0x33   : > { %980 = vmatmul.mubr.msk.bf16.gmra.mrb[4].mxu0 %vm453_vm0, %v440_v32 }
  0x37   : > { %988 = vmatmul.mubr.msk.bf16.gmra.mrb[4].mxu1 %vm453_vm0, %v444_v34 }
  0xfe   : > { %v977_v36 = vpop.f32.mrb[0].mxu0 }
  0xff   : > { %v911_v37 = vpack.c.bf16 %v977_v36, %v977_v36  ;;  %v512_v38 = vpop.f32.mrb[1].mxu0 }
 0x100   : > { %v909_v39 = vpack.c.bf16 %v512_v38, %v512_v38  ;;  %v978_v40 = vpop.f32.mrb[2].mxu0 }
 0x101   : > { %642 = vst.msk [vmem:[%s1108_s24 + $0x8] sm:$0xf] %vm639_vm1, %v911_v37  ;;  %v576_v41 = vpack.c.bf16 %v978_v40, %v977_v36  ;;  %v912_v42 = vpack.c.bf16 %v978_v40, %v978_v40  ;;  %v515_v43 = vpop.f32.mrb[3].mxu0 }
 0x102   : > { %640 = vst.msk [vmem:[%s1108_s24] sm:$0xf] %vm639_vm1, %v909_v39  ;;  %v575_v44 = vpack.c.bf16 %v515_v43, %v512_v38  ;;  %v910_v45 = vpack.c.bf16 %v515_v43, %v515_v43  ;;  %v985_v46 = vpop.f32.mrb[0].mxu1 }
 0x103   : > { %643 = vst.msk [vmem:[%s1108_s24 + $0xc] sm:$0xf] %vm639_vm1, %v912_v42  ;;  %v658_v47 = vunpack.c.l.bf16 %v576_v41  ;;  %v659_v48 = vunpack.c.h.bf16 %v576_v41  ;;  %v919_v49 = vpack.c.bf16 %v985_v46, %v985_v46  ;;  %v1116_v50 = vpop.f32.mrb[1].mxu1 }
 0x104   : > { %641 = vst.msk [vmem:[%s1108_s24 + $0x4] sm:$0xf] %vm639_vm1, %v910_v45  ;;  %v656_v51 = vunpack.c.l.bf16 %v575_v44  ;;  %v657_v52 = vunpack.c.h.bf16 %v575_v44  ;;  %v917_v53 = vpack.c.bf16 %v1116_v50, %v1116_v50  ;;  %v986_v54 = vpop.f32.mrb[2].mxu1 }
 0x105   : > { %v676_v55 = vsel %vm672_vm2, %v658_v47, 0.0  ;;  %v707_v56 = vmul.f32 %v658_v47, %v658_v47  ;;  %650 = vst.msk [vmem:[%s1108_s24 + $0x28] sm:$0xf] %vm639_vm1, %v919_v49  ;;  %v1125_v57 = vpop.f32.mrb[3].mxu1  ;;  %v678_v63 = vsel %vm672_vm2, %v659_v48, 0.0  ;;  %v708_v0 = vmul.f32 %v659_v48, %v659_v48 }
 0x106   : > { %v673_v58 = vsel %vm672_vm2, %v656_v51, 0.0  ;;  %v674_v59 = vsel %vm672_vm2, %v657_v52, 0.0  ;;  %v705_v60 = vmul.f32 %v656_v51, %v656_v51  ;;  %v706_v61 = vmul.f32 %v657_v52, %v657_v52  ;;  %v981_v62 = vpop.f32.mrb[4].mxu0  ;;  %648 = vst.msk [vmem:[%s1108_s24 + $0x20] sm:$0xf] %vm639_vm1, %v917_v53 }
 0x107   : > { %v675_v1 = vadd.f32 %v674_v59, %v673_v58  ;;  %v915_v2 = vpack.c.bf16 %v981_v62, %v981_v62  ;;  %v528_v3 = vpop.f32.mrb[5].mxu0  ;;  %v580_v8 = vpack.c.bf16 %v986_v54, %v985_v46  ;;  %v724_v14 = vsel %vm672_vm2, %v707_v56, 0.0 }
 0x108   : > { %v721_v4 = vsel %vm672_vm2, %v705_v60, 0.0  ;;  %v722_v5 = vsel %vm672_vm2, %v706_v61, 0.0  ;;  %v913_v6 = vpack.c.bf16 %v528_v3, %v528_v3  ;;  %v982_v7 = vpop.f32.mrb[6].mxu0  ;;  %v920_v17 = vpack.c.bf16 %v986_v54, %v986_v54 }
 0x109   : > { %v677_v9 = vadd.f32 %v676_v55, %v675_v1  ;;  %v723_v10 = vadd.f32 %v722_v5, %v721_v4  ;;  %646 = vst.msk [vmem:[%s1108_s24 + $0x18] sm:$0xf] %vm639_vm1, %v915_v2  ;;  %v578_v11 = vpack.c.bf16 %v982_v7, %v981_v62  ;;  %v916_v12 = vpack.c.bf16 %v982_v7, %v982_v7  ;;  %v531_v13 = vpop.f32.mrb[7].mxu0 }
 0x10a   : > { %644 = vst.msk [vmem:[%s1108_s24 + $0x10] sm:$0xf] %vm639_vm1, %v913_v6  ;;  %v577_v15 = vpack.c.bf16 %v531_v13, %v528_v3  ;;  %v914_v16 = vpack.c.bf16 %v531_v13, %v531_v13  ;;  %v989_v18 = vpop.f32.mrb[4].mxu1  ;;  %651 = vst.msk [vmem:[%s1108_s24 + $0x2c] sm:$0xf] %vm639_vm1, %v920_v17  ;;  %v726_v28 = vsel %vm672_vm2, %v708_v0, 0.0  ;;  %v666_v34 = vunpack.c.l.bf16 %v580_v8 }
 0x10b   : > { %v725_v19 = vadd.f32 %v724_v14, %v723_v10  ;;  %647 = vst.msk [vmem:[%s1108_s24 + $0x1c] sm:$0xf] %vm639_vm1, %v916_v12  ;;  %v662_v20 = vunpack.c.l.bf16 %v578_v11  ;;  %v679_v21 = vadd.f32 %v678_v63, %v677_v9  ;;  %v560_v22 = vpop.f32.mrb[5].mxu1  ;;  %v663_v23 = vunpack.c.h.bf16 %v578_v11 }
 0x10c   : > { %645 = vst.msk [vmem:[%s1108_s24 + $0x14] sm:$0xf] %vm639_vm1, %v914_v16  ;;  %v660_v24 = vunpack.c.l.bf16 %v577_v15  ;;  %v661_v25 = vunpack.c.h.bf16 %v577_v15  ;;  %v990_v26 = vpop.f32.mrb[6].mxu1  ;;  %v579_v43 = vpack.c.bf16 %v1125_v57, %v1116_v50  ;;  %v918_v45 = vpack.c.bf16 %v1125_v57, %v1125_v57 }
 0x10d   : > { %v563_v27 = vpop.f32.mrb[7].mxu1  ;;  %v711_v32 = vmul.f32 %v662_v20, %v662_v20  ;;  %v727_v35 = vadd.f32 %v726_v28, %v725_v19  ;;  %v684_v36 = vsel %vm672_vm2, %v662_v20, 0.0  ;;  %v686_v37 = vsel %vm672_vm2, %v663_v23, 0.0 }
 0x10e   : > { %v680_v29 = vsel %vm672_vm2, %v660_v24, 0.0  ;;  %v709_v30 = vmul.f32 %v660_v24, %v660_v24  ;;  %v710_v31 = vmul.f32 %v661_v25, %v661_v25  ;;  %v682_v38 = vsel %vm672_vm2, %v661_v25, 0.0  ;;  %649 = vst.msk [vmem:[%s1108_s24 + $0x24] sm:$0xf] %vm639_vm1, %v918_v45 }
 0x10f   : > { %v681_v33 = vadd.f32 %v680_v29, %v679_v21  ;;  %v712_v40 = vmul.f32 %v663_v23, %v663_v23  ;;  %v923_v46 = vpack.c.bf16 %v989_v18, %v989_v18  ;;  %v921_v47 = vpack.c.bf16 %v560_v22, %v560_v22 }
 0x110   : > { %v728_v39 = vsel %vm672_vm2, %v709_v30, 0.0  ;;  %v730_v44 = vsel %vm672_vm2, %v710_v31, 0.0  ;;  %v732_v48 = vsel %vm672_vm2, %v711_v32, 0.0  ;;  %v664_v52 = vunpack.c.l.bf16 %v579_v43 }
 0x111   : > { %v683_v41 = vadd.f32 %v682_v38, %v681_v33  ;;  %v729_v42 = vadd.f32 %v728_v39, %v727_v35  ;;  %v665_v53 = vunpack.c.h.bf16 %v579_v43  ;;  %654 = vst.msk [vmem:[%s1108_s24 + $0x38] sm:$0xf] %vm639_vm1, %v923_v46  ;;  %652 = vst.msk [vmem:[%s1108_s24 + $0x30] sm:$0xf] %vm639_vm1, %v921_v47  ;;  %v582_v50 = vpack.c.bf16 %v990_v26, %v989_v18 }
 0x112   : > { %v924_v54 = vpack.c.bf16 %v990_v26, %v990_v26  ;;  %v581_v55 = vpack.c.bf16 %v563_v27, %v560_v22  ;;  %v713_v58 = vmul.f32 %v664_v52, %v664_v52  ;;  %v734_v59 = vsel %vm672_vm2, %v712_v40, 0.0 }
 0x113   : > { %v685_v49 = vadd.f32 %v684_v36, %v683_v41  ;;  %v731_v51 = vadd.f32 %v730_v44, %v729_v42  ;;  %v667_v60 = vunpack.c.h.bf16 %v580_v8  ;;  %v688_v61 = vsel %vm672_vm2, %v664_v52, 0.0 }
 0x114   : > { %v714_v62 = vmul.f32 %v665_v53, %v665_v53  ;;  %655 = vst.msk [vmem:[%s1108_s24 + $0x3c] sm:$0xf] %vm639_vm1, %v924_v54  ;;  %v922_v1 = vpack.c.bf16 %v563_v27, %v563_v27  ;;  %v715_v2 = vmul.f32 %v666_v34, %v666_v34  ;;  %v690_v3 = vsel %vm672_vm2, %v665_v53, 0.0 }
 0x115   : > { %v733_v56 = vadd.f32 %v732_v48, %v731_v51  ;;  %v687_v57 = vadd.f32 %v686_v37, %v685_v49  ;;  %v736_v4 = vsel %vm672_vm2, %v713_v58, 0.0  ;;  %v668_v7 = vunpack.c.l.bf16 %v581_v55 }
 0x116   : > { %653 = vst.msk [vmem:[%s1108_s24 + $0x34] sm:$0xf] %vm639_vm1, %v922_v1  ;;  %v692_v8 = vsel %vm672_vm2, %v666_v34, 0.0  ;;  %v716_v9 = vmul.f32 %v667_v60, %v667_v60  ;;  %v738_v10 = vsel %vm672_vm2, %v714_v62, 0.0  ;;  %v669_v11 = vunpack.c.h.bf16 %v581_v55 }
 0x117   : > { %v689_v63 = vadd.f32 %v688_v61, %v687_v57  ;;  %v735_v0 = vadd.f32 %v734_v59, %v733_v56  ;;  %v694_v14 = vsel %vm672_vm2, %v667_v60, 0.0  ;;  %v740_v15 = vsel %vm672_vm2, %v715_v2, 0.0 }
 0x118   : > { %v670_v16 = vunpack.c.l.bf16 %v582_v50  ;;  %v717_v17 = vmul.f32 %v668_v7, %v668_v7  ;;  %v742_v20 = vsel %vm672_vm2, %v716_v9, 0.0  ;;  %v671_v21 = vunpack.c.h.bf16 %v582_v50 }
 0x119   : > { %v691_v5 = vadd.f32 %v690_v3, %v689_v63  ;;  %v737_v6 = vadd.f32 %v736_v4, %v735_v0  ;;  %v696_v22 = vsel %vm672_vm2, %v668_v7, 0.0  ;;  %v718_v23 = vmul.f32 %v669_v11, %v669_v11 }
 0x11a   : > { %v719_v26 = vmul.f32 %v670_v16, %v670_v16  ;;  %v698_v27 = vsel %vm672_vm2, %v669_v11, 0.0  ;;  %v744_v28 = vsel %vm672_vm2, %v717_v17, 0.0  ;;  %v700_v31 = vsel %vm672_vm2, %v670_v16, 0.0 }
 0x11b   : > { %v693_v12 = vadd.f32 %v692_v8, %v691_v5  ;;  %v739_v13 = vadd.f32 %v738_v10, %v737_v6  ;;  %v720_v32 = vmul.f32 %v671_v21, %v671_v21  ;;  %v746_v33 = vsel %vm672_vm2, %v718_v23, 0.0 }
 0x11c   : > { %v702_v36 = vsel %vm672_vm2, %v671_v21, 0.0  ;;  %v748_v37 = vsel %vm672_vm2, %v719_v26, 0.0 }
 0x11d   : > { %v741_v18 = vadd.f32 %v740_v15, %v739_v13  ;;  %v695_v19 = vadd.f32 %v694_v14, %v693_v12  ;;  %v750_v40 = vsel %vm672_vm2, %v720_v32, 0.0 }
 0x11f   : > { %v697_v24 = vadd.f32 %v696_v22, %v695_v19  ;;  %v743_v25 = vadd.f32 %v742_v20, %v741_v18 }
 0x121   : > { %v699_v29 = vadd.f32 %v698_v27, %v697_v24  ;;  %v745_v30 = vadd.f32 %v744_v28, %v743_v25 }
 0x123   : > { %v701_v35 = vadd.f32 %v700_v31, %v699_v29  ;;  %v747_v34 = vadd.f32 %v746_v33, %v745_v30 }
 0x125   : > { %v703_v38 = vadd.f32 %v702_v36, %v701_v35  ;;  %v749_v39 = vadd.f32 %v748_v37, %v747_v34 }
 0x127   : > { %704 = vst.msk [vmem:[%s325_s30] sm:$0xff] %vm672_vm2, %v703_v38  ;;  %v751_v41 = vadd.f32 %v750_v40, %v749_v39 }
 0x129   : > { %752 = vst.msk [vmem:[%s329_s10] sm:$0xff] %vm672_vm2, %v751_v41 }
 0x12a PF: > { %s19_s27 = sadd.s32 1, %s1010_s27  }
 0x12b   : > { %p16_p5 = scmp.ge.s32.totalorder %s19_s27, 6  }
 0x12d   :  { %18 = sbr.rel (!%p16_p5) target bundleno = 1 (0x1), region = 98 }

// kernel: bottleneck_forward.4
= control target key start
LH: loop header
LB: loop body
LE: loop exit
PB: predicated region body
PF: predicated region fallthrough
CT: control target
= control target key end

     0   :  { %10 = vsyncpa [#allocation3], 0  ;;  %s1195_s0 = inlined_call_operand.hbm [shape: f32[512,64], index: 0, kind: input, shape index: {}]   ;;  %s1196_s1 = inlined_call_operand.vmem [shape: bf16[64,16], index: 1, kind: input, shape index: {}]   ;;  %s1197_s2 = inlined_call_operand.vmem [shape: bf16[512,16], index: 2, kind: output, shape index: {0}]   ;;  %s1198_s3 = inlined_call_operand.vmem [shape: f32[32,16], index: 3, kind: output, shape index: {1}]   ;;  %s1199_s4 = inlined_call_operand.vmem [shape: f32[32,16], index: 4, kind: output, shape index: {2}]  }
   0x1   :  { %12 = vsyncpa [#allocation3 + $0x1], 0  ;;  %s970_s15 = smov 0   ;;  %s972_s16 = smov 0  }
   0x2   :  { %s974_s17 = smov 0   ;;  %s976_s18 = smov 0  }
   0x3 LB: > { %s989_s19 = sadd.s32 4294967295, %s940_s18   ;;  %s992_s20 = sadd.s32 1, %s940_s18   ;;  %s940_s18 = sphi %s976_s18, %s1206_s18   ;;  %s936_s17 = sphi %s974_s17, %s1205_s17   ;;  %s932_s16 = sphi %s972_s16, %s1204_s16   ;;  %s928_s15 = sphi %s970_s15, %s1203_s15  }
   0x4   : > { %s22_s21 = ssub.s32 %s940_s18, %s992_s20  ;;  %s25_s22 = sadd.s32 1, %s936_s17 }
   0x5   : > { %p23_p0 = scmp.eq.s32.totalorder %s22_s21, 0  ;;  %p32_p1 = scmp.ne.s32.totalorder %s936_s17, %s932_s16 }
   0x6   : > { %p33_p2 = scmp.eq.s32.totalorder %s940_s18, 0  ;;  %p38_p3 = scmp.ne.s32.totalorder %s932_s16, %s928_s15 }
   0x7   : > { %s1002_s23 = scalar_select %p23_p0, %s936_s17, %s25_s22  }
   0x8   : > { %p34_p4 = por %p33_p2, %p32_p1  ;;  %p39_p5 = scmp.eq.s32.totalorder %s989_s19, 0 }
   0x9   : > { %p837_p6 = scmp.lt.s32.totalorder %s940_s18, 4  ;;  %s164_s25 = sand.u32 1, %s936_s17  }
   0xa   : > { %p1006_p7 = por %p39_p5, %p38_p3  ;;  %s731_s26 = sshll.u32 %s164_s25, 7 }
   0xb   : > { %s770_s27 = sshll.u32 %s940_s18, 11  ;;  %s168_s5 = scalar_lea.vmem [#allocation2], %s731_s26 }
   0xc   : > { %s1015_s30 = scalar_lea.hbm %s1195_s0, %s770_s27  ;;  %s175_s6 = sshll.u32 %s168_s5, 4  ;;  %s1017_s6 = int_to_ptr.vmem [resolvable:$true] %s175_s6 }
   0xd   : > { %p1019_p8 = pnand %p837_p6, %p34_p4  ;;  %s1024_s8 = scalar_lea.sflag [#allocation3], %s164_s25 }
   0xe   : > { %s876_s9 = scalar_lea.hbm %s1015_s30, 2048  ;;  %s881_s12 = scalar_lea.hbm %s1195_s0, 8192 }
   0xf   : > { %p877_p10 = scmp.ne.s32.totalorder %s1015_s30, %s876_s9  ;;  %p878_p11 = pneg %p1019_p8 }
  0x10   : > { %p882_p0 = scmp.lt.u32.totalorder %s1015_s30, %s1195_s0  ;;  %p883_p1 = scmp.lt.u32.totalorder %s881_s12, %s876_s9 }
  0x11   : > { %p879_p12 = pnand %p878_p11, %p877_p10  ;;  %p885_p3 = scmp.lt.u32.totalorder %s876_s9, %s1015_s30 }
  0x12   : > { %p884_p2 = por %p883_p1, %p882_p0 }
  0x13   : > { %p880_p13 = pneg %p879_p12 }
  0x14   : > { %p886_p4 = por %p885_p3, %p884_p2 }
  0x16   : > { %p887_p5 = pnand %p886_p4, %p880_p13 }
  0x18   : > { %890 = shalt.err (!%p887_p5)
}
  0x19   : > { %s891_s15 = scalar_lea.vmem %s1017_s6, 2048  ;;  %s942_s21 = smov [#allocation2]  }
  0x1a   : > { %p892_p6 = scmp.ne.s32.totalorder %s1017_s6, %s891_s15  ;;  %s896_s22 = sshll.u32 %s942_s21, 4  ;;  %s897_s22 = int_to_ptr.vmem [resolvable:$false] %s896_s22 }
  0x1b   : > { %s898_s25 = scalar_lea.vmem %s897_s22, 4096  ;;  %p899_p9 = scmp.lt.s32.totalorder %s1017_s6, %s897_s22 }
  0x1c   : > { %p894_p10 = pnand %p892_p6, %p878_p11  ;;  %p900_p0 = scmp.lt.s32.totalorder %s898_s25, %s891_s15 }
  0x1e   : > { %p895_p12 = pneg %p894_p10  ;;  %p901_p1 = por %p900_p0, %p899_p9 }
  0x20   : > { %p902_p2 = pnand %p901_p1, %p895_p12 }
  0x22   : > { %905 = shalt.err (!%p902_p2)
}
  0x23   : > { %s943_s26 = smov 128   ;;  %s944_s27 = smov 8  }
  0x24   : > { %836 = dma.hbm_to_vmem [thread:$0]  (!%p1019_p8), %s1015_s30, 2048, %s1017_s6, %s1024_s8, %s943_s26, %s943_s26, %s944_s27  }
  0x25   : > { %p183_p11 = scmp.lt.s32.totalorder %s940_s18, 5  ;;  %p1202_p13 = scmp.ge.s32.totalorder %s940_s18, 1 }
  0x27   : > { %p184_p3 = pnand %p1202_p13, %p183_p11 }
  0x28   : > { %s189_s28 = sand.u32 (!%p184_p3), 1, %s932_s16  }
  0x29   : > { %187 = sbr.rel (%p184_p3) target bundleno = 321 (0x141), region = 28  ;;  %s735_s29 = sshll.u32 (!%p184_p3), %s189_s28, 7 }
  0x2a   : > { %s190_s5 = scalar_lea.sflag (!%p184_p3), [#allocation3], %s189_s28  ;;  %s1056_s9 = scalar_lea.vmem (!%p184_p3), [#allocation2], %s735_s29 }
  0x30   : > { %923 = dma.done.wait (%p1006_p7), %s190_s5, 2048  }
  0x31   : > { %925 = vsyncadd (%p1006_p7), %s190_s5, 4294965248  ;;  %v872_v0 = vld [vmem:[%s1196_s1] sm:$0xff]   ;;  %v873_v1 = vld [vmem:[%s1196_s1 + $0x8] sm:$0xff]   ;;  %vm298_vm0 = vcmask 523264   ;;  %s736_s12 = sshll.u32 %s989_s19, 4  ;;  %vm484_vm1 = vcmask 125952  }
  0x32   : > { %799 = vmatprep.subr.bf16.mxu0 %v872_v0  ;;  %823 = vmatprep.subr.bf16.mxu1 %v872_v0  ;;  %v874_v2 = vld [vmem:[%s1196_s1 + $0x10] sm:$0xff]   ;;  %v242_v3 = vld [vmem:[%s1056_s9] sm:$0xff]  ;;  %v243_v4 = vld [vmem:[%s1056_s9 + $0x8] sm:$0xff]  ;;  %p228_p7 = scmp.lt.s32.totalorder %s736_s12, 63  ;;  %vm517_vm2 = vcmask 130048   ;;  %p233_p8 = scmp.lt.s32.totalorder %s989_s19, 3 }
  0x33   : > { %800 = vmatpush3.bf16.msra.mxu0 %v872_v0  ;;  %827 = vmatpush3.bf16.msra.mxu1 %v872_v0  ;;  %v258_v5 = vpack.c.bf16 %v243_v4, %v242_v3  ;;  %v250_v6 = vld [vmem:[%s1056_s9 + $0x40] sm:$0xff]  ;;  %v251_v7 = vld [vmem:[%s1056_s9 + $0x48] sm:$0xff]  ;;  %v875_v8 = vld [vmem:[%s1196_s1 + $0x18] sm:$0xff]  }
  0x34   : > { %801 = vmatprep.subr.bf16.mxu0 %v873_v1  ;;  %824 = vmatprep.subr.bf16.mxu1 %v873_v1  ;;  %v262_v9 = vpack.c.bf16 %v251_v7, %v250_v6  ;;  %v244_v10 = vld [vmem:[%s1056_s9 + $0x10] sm:$0xff]  ;;  %v245_v11 = vld [vmem:[%s1056_s9 + $0x18] sm:$0xff]  ;;  %v246_v12 = vld [vmem:[%s1056_s9 + $0x20] sm:$0xff]  ;;  %s1208_s12 = smov (!%p228_p7, %s736_s12), 63  ;;  %s1210_s19 = smov (!%p233_p8, %s989_s19), 3 }
  0x35   : > { %807 = vmatprep.mubr.msk.bf16.mxu0 %vm298_vm0, %v258_v5  ;;  %v247_v13 = vld [vmem:[%s1056_s9 + $0x28] sm:$0xff]  ;;  %v252_v14 = vld [vmem:[%s1056_s9 + $0x50] sm:$0xff]  ;;  %v253_v15 = vld [vmem:[%s1056_s9 + $0x58] sm:$0xff]  ;;  %v259_v18 = vpack.c.bf16 %v245_v11, %v244_v10  ;;  %s737_s13 = sshll.u32 %s1208_s12, 2  ;;  %s738_s22 = sshll.u32 %s1210_s19, 3 }
  0x36   : > { %815 = vmatprep.mubr.msk.bf16.mxu1 %vm298_vm0, %v262_v9  ;;  %v254_v16 = vld [vmem:[%s1056_s9 + $0x60] sm:$0xff]  ;;  %v255_v17 = vld [vmem:[%s1056_s9 + $0x68] sm:$0xff]  ;;  %v260_v19 = vpack.c.bf16 %v247_v13, %v246_v12  ;;  %v263_v20 = vpack.c.bf16 %v253_v15, %v252_v14  ;;  %v248_v22 = vld [vmem:[%s1056_s9 + $0x30] sm:$0xff]  ;;  %s1102_s21 = scalar_lea.vmem %s1197_s2, %s737_s13  ;;  %s236_s27 = scalar_lea.vmem %s1198_s3, %s738_s22 }
  0x37   : > { %802 = vmatpush3.bf16.msra.mxu0 %v873_v1  ;;  %828 = vmatpush3.bf16.msra.mxu1 %v873_v1  ;;  %v264_v21 = vpack.c.bf16 %v255_v17, %v254_v16  ;;  %v249_v23 = vld [vmem:[%s1056_s9 + $0x38] sm:$0xff]  ;;  %v256_v24 = vld [vmem:[%s1056_s9 + $0x70] sm:$0xff]  ;;  %s240_s29 = scalar_lea.vmem %s1199_s4, %s738_s22 }
  0x38   : > { %803 = vmatprep.subr.bf16.mxu0 %v874_v2  ;;  %825 = vmatprep.subr.bf16.mxu1 %v874_v2  ;;  %v257_v25 = vld [vmem:[%s1056_s9 + $0x78] sm:$0xff]  ;;  %v261_v26 = vpack.c.bf16 %v249_v23, %v248_v22 }
  0x39   : > { %v265_v27 = vpack.c.bf16 %v257_v25, %v256_v24 }
  0x3b   : > { %804 = vmatpush3.bf16.msra.mxu0 %v874_v2  ;;  %829 = vmatpush3.bf16.msra.mxu1 %v874_v2 }
  0x3c   : > { %805 = vmatprep.subr.bf16.mxu0 %v875_v8  ;;  %826 = vmatprep.subr.bf16.mxu1 %v875_v8 }
  0x3f   : > { %806 = vmatpush3.bf16.msra.mxu0 %v875_v8  ;;  %830 = vmatpush3.bf16.msra.mxu1 %v875_v8 }
  0x42   : > { %808 = vmatmul.mubr.msk.bf16.vlgmr.msra.gmra.mrb[0].mxu0 %vm298_vm0, %v259_v18  ;;  %816 = vmatmul.mubr.msk.bf16.vlgmr.msra.gmra.mrb[0].mxu1 %vm298_vm0, %v263_v20 }
  0x43   : > { %811 = vmatprep.mubr.msk.bf16.mxu0 %vm298_vm0, %v260_v19  ;;  %819 = vmatprep.mubr.msk.bf16.mxu1 %vm298_vm0, %v264_v21 }
  0x4a   : > { %812 = vmatmul.mubr.msk.bf16.gmra.mrb[4].mxu0 %vm298_vm0, %v261_v26  ;;  %820 = vmatmul.mubr.msk.bf16.gmra.mrb[4].mxu1 %vm298_vm0, %v265_v27 }
 0x115   : > { %v809_v28 = vpop.f32.mrb[0].mxu0  ;;  %v817_v31 = vpop.f32.mrb[0].mxu1 }
 0x116   : > { %v773_v29 = vpack.c.bf16 %v809_v28, %v809_v28  ;;  %v357_v30 = vpop.f32.mrb[1].mxu0  ;;  %v781_v34 = vpack.c.bf16 %v817_v31, %v817_v31  ;;  %v389_v35 = vpop.f32.mrb[1].mxu1 }
 0x117   : > { %v771_v32 = vpack.c.bf16 %v357_v30, %v357_v30  ;;  %v810_v33 = vpop.f32.mrb[2].mxu0  ;;  %v779_v39 = vpack.c.bf16 %v389_v35, %v389_v35  ;;  %v818_v40 = vpop.f32.mrb[2].mxu1 }
 0x118   : > { %487 = vst.msk [vmem:[%s1102_s21 + $0x8] sm:$0xf] %vm484_vm1, %v773_v29  ;;  %v421_v36 = vpack.c.bf16 %v810_v33, %v809_v28  ;;  %v774_v37 = vpack.c.bf16 %v810_v33, %v810_v33  ;;  %v360_v38 = vpop.f32.mrb[3].mxu0  ;;  %495 = vst.msk [vmem:[%s1102_s21 + $0x28] sm:$0xf] %vm484_vm1, %v781_v34  ;;  %v1110_v43 = vpack.c.bf16 %v818_v40, %v817_v31  ;;  %v392_v45 = vpop.f32.mrb[3].mxu1 }
 0x119   : > { %485 = vst.msk [vmem:[%s1102_s21] sm:$0xf] %vm484_vm1, %v771_v32  ;;  %v420_v41 = vpack.c.bf16 %v360_v38, %v357_v30  ;;  %v772_v42 = vpack.c.bf16 %v360_v38, %v360_v38  ;;  %v782_v44 = vpack.c.bf16 %v818_v40, %v818_v40  ;;  %493 = vst.msk [vmem:[%s1102_s21 + $0x20] sm:$0xf] %vm484_vm1, %v779_v39 }
 0x11a   : > { %488 = vst.msk [vmem:[%s1102_s21 + $0xc] sm:$0xf] %vm484_vm1, %v774_v37  ;;  %v503_v46 = vunpack.c.l.bf16 %v421_v36  ;;  %v424_v47 = vpack.c.bf16 %v392_v45, %v389_v35  ;;  %v780_v48 = vpack.c.bf16 %v392_v45, %v392_v45  ;;  %v504_v49 = vunpack.c.h.bf16 %v421_v36 }
 0x11b   : > { %486 = vst.msk [vmem:[%s1102_s21 + $0x4] sm:$0xf] %vm484_vm1, %v772_v42  ;;  %v501_v50 = vunpack.c.l.bf16 %v420_v41  ;;  %v502_v51 = vunpack.c.h.bf16 %v420_v41  ;;  %496 = vst.msk [vmem:[%s1102_s21 + $0x2c] sm:$0xf] %vm484_vm1, %v782_v44  ;;  %v511_v44 = vunpack.c.l.bf16 %v1110_v43 }
 0x11c   : > { %v552_v52 = vmul.f32 %v503_v46, %v503_v46  ;;  %494 = vst.msk [vmem:[%s1102_s21 + $0x24] sm:$0xf] %vm484_vm1, %v780_v48  ;;  %v521_v58 = vsel %vm517_vm2, %v503_v46, 0.0  ;;  %v523_v63 = vsel %vm517_vm2, %v504_v49, 0.0  ;;  %v553_v11 = vmul.f32 %v504_v49, %v504_v49 }
 0x11d   : > { %v518_v53 = vsel %vm517_vm2, %v501_v50, 0.0  ;;  %v519_v54 = vsel %vm517_vm2, %v502_v51, 0.0  ;;  %v550_v55 = vmul.f32 %v501_v50, %v501_v50  ;;  %v551_v56 = vmul.f32 %v502_v51, %v502_v51  ;;  %v813_v57 = vpop.f32.mrb[4].mxu0  ;;  %v821_v62 = vpop.f32.mrb[4].mxu1 }
 0x11e   : > { %v520_v59 = vadd.f32 %v519_v54, %v518_v53  ;;  %v777_v60 = vpack.c.bf16 %v813_v57, %v813_v57  ;;  %v373_v61 = vpop.f32.mrb[5].mxu0  ;;  %v405_v4 = vpop.f32.mrb[5].mxu1  ;;  %v569_v12 = vsel %vm517_vm2, %v552_v52, 0.0  ;;  %v571_v22 = vsel %vm517_vm2, %v553_v11, 0.0 }
 0x11f   : > { %v566_v0 = vsel %vm517_vm2, %v550_v55, 0.0  ;;  %v567_v1 = vsel %vm517_vm2, %v551_v56, 0.0  ;;  %v775_v2 = vpack.c.bf16 %v373_v61, %v373_v61  ;;  %v814_v3 = vpop.f32.mrb[6].mxu0  ;;  %v822_v10 = vpop.f32.mrb[6].mxu1  ;;  %v509_v32 = vunpack.c.l.bf16 %v424_v47 }
 0x120   : > { %v522_v5 = vadd.f32 %v521_v58, %v520_v59  ;;  %v568_v6 = vadd.f32 %v567_v1, %v566_v0  ;;  %491 = vst.msk [vmem:[%s1102_s21 + $0x18] sm:$0xf] %vm484_vm1, %v777_v60  ;;  %v423_v7 = vpack.c.bf16 %v814_v3, %v813_v57  ;;  %v778_v8 = vpack.c.bf16 %v814_v3, %v814_v3  ;;  %v376_v9 = vpop.f32.mrb[7].mxu0  ;;  %v408_v15 = vpop.f32.mrb[7].mxu1 }
 0x121   : > { %489 = vst.msk [vmem:[%s1102_s21 + $0x10] sm:$0xf] %vm484_vm1, %v775_v2  ;;  %v422_v13 = vpack.c.bf16 %v376_v9, %v373_v61  ;;  %v776_v14 = vpack.c.bf16 %v376_v9, %v376_v9  ;;  %v785_v36 = vpack.c.bf16 %v821_v62, %v821_v62  ;;  %v510_v38 = vunpack.c.h.bf16 %v424_v47 }
 0x122   : > { %v570_v16 = vadd.f32 %v569_v12, %v568_v6  ;;  %492 = vst.msk [vmem:[%s1102_s21 + $0x1c] sm:$0xf] %vm484_vm1, %v778_v8  ;;  %v507_v17 = vunpack.c.l.bf16 %v423_v7  ;;  %v524_v18 = vadd.f32 %v523_v63, %v522_v5  ;;  %v508_v21 = vunpack.c.h.bf16 %v423_v7 }
 0x123   : > { %490 = vst.msk [vmem:[%s1102_s21 + $0x14] sm:$0xf] %vm484_vm1, %v776_v14  ;;  %v505_v19 = vunpack.c.l.bf16 %v422_v13  ;;  %v506_v20 = vunpack.c.h.bf16 %v422_v13  ;;  %v783_v39 = vpack.c.bf16 %v405_v4, %v405_v4  ;;  %v427_v40 = vpack.c.bf16 %v822_v10, %v821_v62  ;;  %499 = vst.msk [vmem:[%s1102_s21 + $0x38] sm:$0xf] %vm484_vm1, %v785_v36 }
 0x124   : > { %v529_v26 = vsel %vm517_vm2, %v507_v17, 0.0  ;;  %v572_v28 = vadd.f32 %v571_v22, %v570_v16  ;;  %v556_v29 = vmul.f32 %v507_v17, %v507_v17  ;;  %v557_v33 = vmul.f32 %v508_v21, %v508_v21 }
 0x125   : > { %v525_v23 = vsel %vm517_vm2, %v505_v19, 0.0  ;;  %v554_v24 = vmul.f32 %v505_v19, %v505_v19  ;;  %v555_v25 = vmul.f32 %v506_v20, %v506_v20  ;;  %v527_v30 = vsel %vm517_vm2, %v506_v20, 0.0  ;;  %497 = vst.msk [vmem:[%s1102_s21 + $0x30] sm:$0xf] %vm484_vm1, %v783_v39 }
 0x126   : > { %v526_v27 = vadd.f32 %v525_v23, %v524_v18  ;;  %v531_v45 = vsel %vm517_vm2, %v508_v21, 0.0  ;;  %v577_v46 = vsel %vm517_vm2, %v556_v29, 0.0  ;;  %v558_v48 = vmul.f32 %v509_v32, %v509_v32 }
 0x127   : > { %v573_v31 = vsel %vm517_vm2, %v554_v24, 0.0  ;;  %v575_v37 = vsel %vm517_vm2, %v555_v25, 0.0  ;;  %v786_v49 = vpack.c.bf16 %v822_v10, %v822_v10  ;;  %v426_v47 = vpack.c.bf16 %v408_v15, %v405_v4 }
 0x128   : > { %v528_v34 = vadd.f32 %v527_v30, %v526_v27  ;;  %v574_v35 = vadd.f32 %v573_v31, %v572_v28  ;;  %v579_v52 = vsel %vm517_vm2, %v557_v33, 0.0  ;;  %v512_v53 = vunpack.c.h.bf16 %v1110_v43 }
 0x129   : > { %v533_v54 = vsel %vm517_vm2, %v509_v32, 0.0  ;;  %v559_v55 = vmul.f32 %v510_v38, %v510_v38  ;;  %500 = vst.msk [vmem:[%s1102_s21 + $0x3c] sm:$0xf] %vm484_vm1, %v786_v49  ;;  %v784_v58 = vpack.c.bf16 %v408_v15, %v408_v15  ;;  %v560_v59 = vmul.f32 %v511_v44, %v511_v44 }
 0x12a   : > { %v530_v41 = vadd.f32 %v529_v26, %v528_v34  ;;  %v576_v42 = vadd.f32 %v575_v37, %v574_v35  ;;  %v535_v60 = vsel %vm517_vm2, %v510_v38, 0.0  ;;  %v581_v61 = vsel %vm517_vm2, %v558_v48, 0.0 }
 0x12b   : > { %v513_v62 = vunpack.c.l.bf16 %v426_v47  ;;  %498 = vst.msk [vmem:[%s1102_s21 + $0x34] sm:$0xf] %vm484_vm1, %v784_v58  ;;  %v537_v43 = vsel %vm517_vm2, %v511_v44, 0.0  ;;  %v561_v1 = vmul.f32 %v512_v53, %v512_v53  ;;  %v583_v2 = vsel %vm517_vm2, %v559_v55, 0.0 }
 0x12c   : > { %v578_v50 = vadd.f32 %v577_v46, %v576_v42  ;;  %v532_v51 = vadd.f32 %v531_v45, %v530_v41  ;;  %v514_v3 = vunpack.c.h.bf16 %v426_v47  ;;  %v539_v6 = vsel %vm517_vm2, %v512_v53, 0.0 }
 0x12d   : > { %v585_v7 = vsel %vm517_vm2, %v560_v59, 0.0  ;;  %v515_v8 = vunpack.c.l.bf16 %v427_v40  ;;  %v562_v9 = vmul.f32 %v513_v62, %v513_v62  ;;  %v587_v12 = vsel %vm517_vm2, %v561_v1, 0.0 }
 0x12e   : > { %v534_v56 = vadd.f32 %v533_v54, %v532_v51  ;;  %v580_v57 = vadd.f32 %v579_v52, %v578_v50  ;;  %v516_v13 = vunpack.c.h.bf16 %v427_v40  ;;  %v541_v14 = vsel %vm517_vm2, %v513_v62, 0.0 }
 0x12f   : > { %v563_v15 = vmul.f32 %v514_v3, %v514_v3  ;;  %v564_v18 = vmul.f32 %v515_v8, %v515_v8  ;;  %v543_v19 = vsel %vm517_vm2, %v514_v3, 0.0  ;;  %v589_v20 = vsel %vm517_vm2, %v562_v9, 0.0 }
 0x130   : > { %v536_v63 = vadd.f32 %v535_v60, %v534_v56  ;;  %v582_v0 = vadd.f32 %v581_v61, %v580_v57  ;;  %v545_v23 = vsel %vm517_vm2, %v515_v8, 0.0  ;;  %v565_v24 = vmul.f32 %v516_v13, %v516_v13 }
 0x131   : > { %v591_v25 = vsel %vm517_vm2, %v563_v15, 0.0  ;;  %v547_v28 = vsel %vm517_vm2, %v516_v13, 0.0  ;;  %v593_v29 = vsel %vm517_vm2, %v564_v18, 0.0 }
 0x132   : > { %v538_v4 = vadd.f32 %v537_v43, %v536_v63  ;;  %v584_v5 = vadd.f32 %v583_v2, %v582_v0  ;;  %v595_v32 = vsel %vm517_vm2, %v565_v24, 0.0 }
 0x134   : > { %v586_v10 = vadd.f32 %v585_v7, %v584_v5  ;;  %v540_v11 = vadd.f32 %v539_v6, %v538_v4 }
 0x136   : > { %v542_v16 = vadd.f32 %v541_v14, %v540_v11  ;;  %v588_v17 = vadd.f32 %v587_v12, %v586_v10 }
 0x138   : > { %v544_v21 = vadd.f32 %v543_v19, %v542_v16  ;;  %v590_v22 = vadd.f32 %v589_v20, %v588_v17 }
 0x13a   : > { %v546_v26 = vadd.f32 %v545_v23, %v544_v21  ;;  %v592_v27 = vadd.f32 %v591_v25, %v590_v22 }
 0x13c   : > { %v548_v30 = vadd.f32 %v547_v28, %v546_v26  ;;  %v594_v31 = vadd.f32 %v593_v29, %v592_v27 }
 0x13e   : > { %549 = vst.msk [vmem:[%s236_s27] sm:$0xff] %vm517_vm2, %v548_v30  ;;  %v596_v33 = vadd.f32 %v595_v32, %v594_v31 }
 0x140   : > { %597 = vst.msk [vmem:[%s240_s29] sm:$0xff] %vm517_vm2, %v596_v33 }
 0x141 PF: > { %p15_p9 = scmp.ge.s32.totalorder %s992_s20, 6   ;;  %s1203_s15 = smov %s932_s16 }
 0x142   : > { %s1204_s16 = smov %s936_s17  ;;  %s1205_s17 = smov %s1002_s23 }
 0x143   : > { %s1206_s18 = smov %s992_s20  ;;  %17 = sbr.rel (!%p15_p9) target bundleno = 3 (0x3), region = 92 }
 0x14a   :  { %648 = vsyncpa [#allocation3], 1 }
 0x14b   :  { %650 = vsyncpa [#allocation3 + $0x1], 1 }

// kernel: bottleneck_forward.7
= control target key start
LH: loop header
LB: loop body
LE: loop exit
PB: predicated region body
PF: predicated region fallthrough
CT: control target
= control target key end

     0   :  { %11 = vsyncpa [#allocation3], 0  ;;  %s942_s0 = inlined_call_operand.vmem [shape: bf16[512,64], index: 0, kind: input, shape index: {}]   ;;  %s943_s1 = inlined_call_operand.vmem [shape: f32[1,64], index: 1, kind: input, shape index: {}]   ;;  %s944_s2 = inlined_call_operand.vmem [shape: f32[1,64], index: 2, kind: input, shape index: {}]   ;;  %s945_s3 = inlined_call_operand.vmem [shape: f32[1,64], index: 3, kind: input, shape index: {}]   ;;  %s946_s4 = inlined_call_operand.vmem [shape: f32[1,64], index: 4, kind: input, shape index: {}]   ;;  %s947_s5 = inlined_call_operand.vmem [shape: f32[512,64], index: 5, kind: input, shape index: {}]   ;;  %s948_s6 = inlined_call_operand.hbm [shape: f32[512,64], index: 6, kind: output, shape index: {}]  }
   0x1   :  { %13 = vsyncpa [#allocation3 + $0x1], 0  ;;  %s717_s21 = smov 0   ;;  %s719_s22 = smov 0  }
   0x2   :  { %s721_s23 = smov 0   ;;  %s723_s24 = smov 0  }
   0x3 LB: > { %s738_s25 = sadd.s32 4294967295, %s677_s24   ;;  %s518_s26 = sadd.s32 4294967294, %s677_s24   ;;  %s677_s24 = sphi %s723_s24, %s954_s24   ;;  %s673_s23 = sphi %s721_s23, %s953_s23   ;;  %s669_s22 = sphi %s719_s22, %s952_s22   ;;  %s665_s21 = sphi %s717_s21, %s951_s21  }
   0x4   : > { %s742_s27 = sadd.s32 1, %s677_s24   ;;  %s162_s28 = sadd.s32 1, %s673_s23 }
   0x5   : > { %s159_s29 = ssub.s32 %s677_s24, %s742_s27  ;;  %p172_p0 = scmp.ne.s32.totalorder %s673_s23, %s669_s22 }
   0x6   : > { %p160_p1 = scmp.eq.s32.totalorder %s159_s29, 0  ;;  %p173_p2 = scmp.eq.s32.totalorder %s738_s25, 3 }
   0x7   : > { %p178_p3 = scmp.ne.s32.totalorder %s669_s22, %s665_s21  ;;  %p179_p4 = scmp.eq.s32.totalorder %s518_s26, 3 }
   0x8   : > { %s753_s30 = scalar_select %p160_p1, %s673_s23, %s162_s28  }
   0x9   : > { %p755_p5 = por %p173_p2, %p172_p0  ;;  %p759_p6 = por %p179_p4, %p178_p3 }
   0xa   : > { %p521_p7 = scmp.ge.s32.totalorder %s677_s24, 1  ;;  %p227_p8 = scmp.lt.s32.totalorder %s677_s24, 5 }
   0xc   : > { %p228_p9 = pnand %p521_p7, %p227_p8 }
   0xd   : > { %v275_v0 = vld [vmem:[%s943_s1] sm:$0x1] (!%p228_p9)  ;;  %s523_s13 = sshll.u32 (!%p228_p9), %s738_s25, 4  ;;  %v322_v8 = vlaneseq (!%p228_p9)  ;;  %vm413_vm0 = vcmask (!%p228_p9), 523264   ;;  %s259_s11 = sand.u32 (!%p228_p9), 1, %s669_s22  }
   0xe   : > { %231 = sbr.rel (%p228_p9) target bundleno = 74 (0x4a), region = 44  ;;  %v276_v1 = vld [vmem:[%s944_s2] sm:$0x1] (!%p228_p9)  ;;  %v279_v2 = vmul.f32 (!%p228_p9), 0.001953125, %v275_v0  ;;  %p263_p10 = scmp.lt.s32.totalorder (!%p228_p9), %s523_s13, 63 }
   0xf   : > { %v280_v3 = vmul.f32 (!%p228_p9), 0.001953125, %v276_v1  ;;  %v323_v9 = vshrl.u32 (!%p228_p9), %v322_v8, 7  ;;  %v277_v12 = vld [vmem:[%s945_s3] sm:$0x1] (!%p228_p9)  ;;  %s820_s12 = sshll.u32 (!%p228_p9), %s259_s11, 7  ;;  %s901_s18 = scalar_lea.sflag (!%p228_p9), [#allocation3], %s259_s11 }
  0x10   : > { %v281_v4 = vmul.f32 (!%p228_p9), %v279_v2, %v279_v2  ;;  %v278_v28 = vld [vmem:[%s946_s4] sm:$0x1] (!%p228_p9) }
  0x11   : > { %v324_v14 = vsub.s32 (!%p228_p9), 0, %v323_v9 }
  0x12   : > { %v282_v5 = vsub.f32 (!%p228_p9), %v280_v3, %v281_v4 }
  0x14   : > { %v283_v6 = vmax.f32 (!%p228_p9), %v282_v5, 0.0 }
  0x15   : > { %s956_s13 = smov (!%p263_p10, %s523_s13), 63 }
  0x16   : > { %v284_v7 = vadd.f32 1e-05, %v283_v6  ;;  %s524_s14 = sshll.u32 %s956_s13, 2  ;;  %s526_s20 = sshll.u32 %s956_s13, 3 }
  0x17   : > { %s266_s17 = scalar_lea.vmem %s942_s0, %s524_s14  ;;  %s792_s10 = scalar_lea.vmem %s947_s5, %s526_s20 }
  0x18   : > { %613 = vrsqrt.f32 %v284_v7  ;;  %v534_v10 = vld [vmem:[%s266_s17] sm:$0xff]   ;;  %v565_v11 = vld [vmem:[%s266_s17 + $0x8] sm:$0xff]   ;;  %v566_v13 = vld [vmem:[%s266_s17 + $0x10] sm:$0xff]   ;;  %s838_s13 = scalar_lea.vmem [#allocation2], %s820_s12  ;;  %s532_s14 = sshll.u32 %s738_s25, 11 }
  0x19   : > { %v567_v15 = vld [vmem:[%s266_s17 + $0x18] sm:$0xff]   ;;  %v568_v16 = vld [vmem:[%s266_s17 + $0x20] sm:$0xff]   ;;  %v535_v18 = vunpack.c.l.bf16 %v534_v10  ;;  %v536_v19 = vunpack.c.h.bf16 %v534_v10  ;;  %v539_v20 = vunpack.c.l.bf16 %v565_v11  ;;  %v569_v21 = vld [vmem:[%s266_s17 + $0x28] sm:$0xff]   ;;  %v540_v23 = vunpack.c.h.bf16 %v565_v11  ;;  %s444_s15 = sshll.u32 %s838_s13, 4  ;;  %s679_s20 = smov [#allocation2]   ;;  %s889_s15 = int_to_ptr.vmem [resolvable:$true] %s444_s15 }
  0x1a   : > { %v543_v24 = vunpack.c.l.bf16 %v566_v13  ;;  %v544_v25 = vunpack.c.h.bf16 %v566_v13  ;;  %v570_v26 = vld [vmem:[%s266_s17 + $0x30] sm:$0xff]   ;;  %v782_v27 = vld [vmem:[%s266_s17 + $0x38] sm:$0xff]   ;;  %v547_v29 = vunpack.c.l.bf16 %v567_v15  ;;  %v548_v30 = vunpack.c.h.bf16 %v567_v15  ;;  %v365_v50 = vld [vmem:[%s792_s10] sm:$0xff]  ;;  %s887_s17 = scalar_lea.hbm %s948_s6, %s532_s14  ;;  %s615_s19 = scalar_lea.vmem %s889_s15, 2048 }
  0x1b   : > { %v551_v31 = vunpack.c.l.bf16 %v568_v16  ;;  %v552_v32 = vunpack.c.h.bf16 %v568_v16  ;;  %v555_v35 = vunpack.c.l.bf16 %v569_v21  ;;  %v556_v36 = vunpack.c.h.bf16 %v569_v21  ;;  %v366_v51 = vld [vmem:[%s792_s10 + $0x8] sm:$0xff]  ;;  %v367_v55 = vld [vmem:[%s792_s10 + $0x10] sm:$0xff]  ;;  %v368_v56 = vld [vmem:[%s792_s10 + $0x18] sm:$0xff]  ;;  %p616_p11 = scmp.ne.s32.totalorder %s889_s15, %s615_s19  ;;  %s619_s26 = sshll.u32 %s679_s20, 4  ;;  %s620_s26 = int_to_ptr.vmem [resolvable:$false] %s619_s26 }
  0x1c   : > { %v559_v37 = vunpack.c.l.bf16 %v570_v26  ;;  %v560_v38 = vunpack.c.h.bf16 %v570_v26  ;;  %v563_v39 = vunpack.c.l.bf16 %v782_v27  ;;  %v564_v40 = vunpack.c.h.bf16 %v782_v27  ;;  %v369_v57 = vld [vmem:[%s792_s10 + $0x20] sm:$0xff]  ;;  %v371_v3 = vld [vmem:[%s792_s10 + $0x30] sm:$0xff]  ;;  %v372_v4 = vld [vmem:[%s792_s10 + $0x38] sm:$0xff]  ;;  %s621_s28 = scalar_lea.vmem %s620_s26, 4096  ;;  %p622_p0 = scmp.lt.s32.totalorder %s889_s15, %s620_s26 }
  0x1d   : > { %v373_v21 = vld [vmem:[%s792_s10 + $0x40] sm:$0xff]  ;;  %p617_p12 = pnand %p616_p11, %p755_p5  ;;  %p623_p1 = scmp.lt.s32.totalorder %s621_s28, %s615_s19 }
  0x1f   : > { %p618_p13 = pneg %p617_p12  ;;  %p624_p2 = por %p623_p1, %p622_p0 }
  0x21   : > { %p625_p3 = pnand %p624_p2, %p618_p13 }
  0x22   : > { %v614_v17 = vpop.eup %613 }
  0x23   : > { %v286_v22 = vmul.f32 %v614_v17, %v277_v12 }
  0x25   : > { %v287_v33 = vmul.f32 %v286_v22, %v279_v2  ;;  %v787_v34 = vrot.slane %v286_v22, %v324_v14  ;;  %v370_v2 = vld [vmem:[%s792_s10 + $0x28] sm:$0xff] }
  0x26   : > { %v374_v22 = vld [vmem:[%s792_s10 + $0x48] sm:$0xff] }
  0x27   : > { %v288_v41 = vsub.f32 %v278_v28, %v287_v33  ;;  %v327_v42 = vmul.f32 %v535_v18, %v787_v34  ;;  %v328_v43 = vmul.f32 %v536_v19, %v787_v34  ;;  %v329_v44 = vmul.f32 %v539_v20, %v787_v34  ;;  %v375_v28 = vld [vmem:[%s792_s10 + $0x50] sm:$0xff] }
  0x28   : > { %v330_v45 = vmul.f32 %v540_v23, %v787_v34  ;;  %v331_v46 = vmul.f32 %v543_v24, %v787_v34  ;;  %v332_v47 = vmul.f32 %v544_v25, %v787_v34  ;;  %v333_v48 = vmul.f32 %v547_v29, %v787_v34  ;;  %v376_v29 = vld [vmem:[%s792_s10 + $0x58] sm:$0xff] }
  0x29   : > { %v804_v49 = vrot.slane %v288_v41, %v324_v14  ;;  %v334_v52 = vmul.f32 %v548_v30, %v787_v34  ;;  %v335_v53 = vmul.f32 %v551_v31, %v787_v34  ;;  %v336_v54 = vmul.f32 %v552_v32, %v787_v34 }
  0x2a   : > { %v337_v58 = vmul.f32 %v555_v35, %v787_v34  ;;  %v338_v59 = vmul.f32 %v556_v36, %v787_v34  ;;  %v339_v60 = vmul.f32 %v559_v37, %v787_v34  ;;  %v340_v61 = vmul.f32 %v560_v38, %v787_v34  ;;  %v377_v35 = vld [vmem:[%s792_s10 + $0x60] sm:$0xff]  ;;  %v378_v36 = vld [vmem:[%s792_s10 + $0x68] sm:$0xff] }
  0x2b   : > { %v349_v62 = vadd.f32 %v804_v49, %v327_v42  ;;  %v350_v63 = vadd.f32 %v804_v49, %v328_v43  ;;  %v351_v0 = vadd.f32 %v804_v49, %v329_v44  ;;  %v352_v1 = vadd.f32 %v804_v49, %v330_v45 }
  0x2c   : > { %v353_v5 = vadd.f32 %v804_v49, %v331_v46  ;;  %v354_v6 = vadd.f32 %v804_v49, %v332_v47  ;;  %v355_v7 = vadd.f32 %v804_v49, %v333_v48  ;;  %v356_v8 = vadd.f32 %v804_v49, %v334_v52  ;;  %v379_v47 = vld [vmem:[%s792_s10 + $0x70] sm:$0xff]  ;;  %v380_v48 = vld [vmem:[%s792_s10 + $0x78] sm:$0xff] }
  0x2d   : > { %v381_v9 = vadd.f32 %v365_v50, %v349_v62  ;;  %v382_v10 = vadd.f32 %v366_v51, %v350_v63  ;;  %v383_v11 = vadd.f32 %v367_v55, %v351_v0  ;;  %v384_v12 = vadd.f32 %v368_v56, %v352_v1 }
  0x2e   : > { %v385_v13 = vadd.f32 %v369_v57, %v353_v5  ;;  %v386_v14 = vadd.f32 %v370_v2, %v354_v6  ;;  %v387_v15 = vadd.f32 %v371_v3, %v355_v7  ;;  %v388_v16 = vadd.f32 %v372_v4, %v356_v8 }
  0x2f   : > { %v397_v17 = vmax.f32 %v381_v9, 0.0  ;;  %v398_v18 = vmax.f32 %v382_v10, 0.0  ;;  %v399_v19 = vmax.f32 %v383_v11, 0.0  ;;  %v400_v20 = vmax.f32 %v384_v12, 0.0 }
  0x30   : > { %v401_v23 = vmax.f32 %v385_v13, 0.0  ;;  %v402_v24 = vmax.f32 %v386_v14, 0.0  ;;  %v403_v25 = vmax.f32 %v387_v15, 0.0  ;;  %v404_v26 = vmax.f32 %v388_v16, 0.0 }
  0x31   : > { %414 = vst.msk [vmem:[%s838_s13] sm:$0xff] %vm413_vm0, %v397_v17  ;;  %415 = vst.msk [vmem:[%s838_s13 + $0x8] sm:$0xff] %vm413_vm0, %v398_v18  ;;  %v357_v30 = vadd.f32 %v804_v49, %v335_v53  ;;  %v358_v31 = vadd.f32 %v804_v49, %v336_v54  ;;  %v359_v32 = vadd.f32 %v804_v49, %v337_v58 }
  0x32   : > { %416 = vst.msk [vmem:[%s838_s13 + $0x10] sm:$0xff] %vm413_vm0, %v399_v19  ;;  %417 = vst.msk [vmem:[%s838_s13 + $0x18] sm:$0xff] %vm413_vm0, %v400_v20  ;;  %v360_v33 = vadd.f32 %v804_v49, %v338_v59  ;;  %v361_v37 = vadd.f32 %v804_v49, %v339_v60  ;;  %v362_v38 = vadd.f32 %v804_v49, %v340_v61 }
  0x33   : > { %418 = vst.msk [vmem:[%s838_s13 + $0x20] sm:$0xff] %vm413_vm0, %v401_v23  ;;  %419 = vst.msk [vmem:[%s838_s13 + $0x28] sm:$0xff] %vm413_vm0, %v402_v24  ;;  %v341_v41 = vmul.f32 %v563_v39, %v787_v34  ;;  %v342_v42 = vmul.f32 %v564_v40, %v787_v34  ;;  %v389_v43 = vadd.f32 %v373_v21, %v357_v30 }
  0x34   : > { %420 = vst.msk [vmem:[%s838_s13 + $0x30] sm:$0xff] %vm413_vm0, %v403_v25  ;;  %421 = vst.msk [vmem:[%s838_s13 + $0x38] sm:$0xff] %vm413_vm0, %v404_v26  ;;  %v390_v44 = vadd.f32 %v374_v22, %v358_v31  ;;  %v391_v45 = vadd.f32 %v375_v28, %v359_v32  ;;  %v392_v46 = vadd.f32 %v376_v29, %v360_v33 }
  0x35   : > { %v393_v50 = vadd.f32 %v377_v35, %v361_v37  ;;  %v394_v51 = vadd.f32 %v378_v36, %v362_v38  ;;  %v363_v52 = vadd.f32 %v804_v49, %v341_v41  ;;  %v364_v39 = vadd.f32 %v804_v49, %v342_v42 }
  0x36   : > { %v405_v27 = vmax.f32 %v389_v43, 0.0  ;;  %v406_v34 = vmax.f32 %v390_v44, 0.0  ;;  %v407_v40 = vmax.f32 %v391_v45, 0.0  ;;  %v408_v53 = vmax.f32 %v392_v46, 0.0 }
  0x37   : > { %v409_v54 = vmax.f32 %v393_v50, 0.0  ;;  %v410_v55 = vmax.f32 %v394_v51, 0.0  ;;  %v395_v56 = vadd.f32 %v379_v47, %v363_v52  ;;  %v396_v57 = vadd.f32 %v380_v48, %v364_v39 }
  0x38   : > { %422 = vst.msk [vmem:[%s838_s13 + $0x40] sm:$0xff] %vm413_vm0, %v405_v27  ;;  %423 = vst.msk [vmem:[%s838_s13 + $0x48] sm:$0xff] %vm413_vm0, %v406_v34 }
  0x39   : > { %424 = vst.msk [vmem:[%s838_s13 + $0x50] sm:$0xff] %vm413_vm0, %v407_v40  ;;  %425 = vst.msk [vmem:[%s838_s13 + $0x58] sm:$0xff] %vm413_vm0, %v408_v53  ;;  %v411_v49 = vmax.f32 %v395_v56, 0.0  ;;  %v412_v58 = vmax.f32 %v396_v57, 0.0 }
  0x3a   : > { %426 = vst.msk [vmem:[%s838_s13 + $0x60] sm:$0xff] %vm413_vm0, %v409_v54  ;;  %427 = vst.msk [vmem:[%s838_s13 + $0x68] sm:$0xff] %vm413_vm0, %v410_v55 }
  0x3b   : > { %428 = vst.msk [vmem:[%s838_s13 + $0x70] sm:$0xff] %vm413_vm0, %v411_v49  ;;  %429 = vst.msk [vmem:[%s838_s13 + $0x78] sm:$0xff] %vm413_vm0, %v412_v58 }
  0x3c   : > { %628 = shalt.err (!%p625_p3)
}
  0x3d   : > { %s629_s29 = scalar_lea.hbm %s887_s17, 2048  ;;  %s633_s11 = scalar_lea.hbm %s948_s6, 8192 }
  0x3e   : > { %p630_p4 = scmp.ne.s32.totalorder %s887_s17, %s629_s29  ;;  %p634_p9 = scmp.lt.u32.totalorder %s887_s17, %s948_s6 }
  0x3f   : > { %p635_p10 = scmp.lt.u32.totalorder %s633_s11, %s629_s29  ;;  %p637_p12 = scmp.lt.u32.totalorder %s629_s29, %s887_s17 }
  0x40   : > { %p631_p7 = pnand %p630_p4, %p755_p5 }
  0x41   : > { %p636_p11 = por %p635_p10, %p634_p9 }
  0x42   : > { %p632_p8 = pneg %p631_p7 }
  0x43   : > { %p638_p13 = por %p637_p12, %p636_p11 }
  0x45   : > { %p639_p0 = pnand %p638_p13, %p632_p8 }
  0x47   : > { %642 = shalt.err (!%p639_p0)
}
  0x48   : > { %s680_s14 = smov 128   ;;  %s681_s25 = smov 8  }
  0x49   : > { %572 = dma.vmem_to_hbm [thread:$0]  (%p755_p5), %s889_s15, 2048, %s887_s17, %s901_s18, %s680_s14, %s680_s14, %s681_s25  }
  0x4a PF: > { %p578_p1 = scmp.ge.s32.totalorder %s677_s24, 2  ;;  %s459_s16 = sand.u32 1, %s665_s21  }
  0x4b   : > { %s460_s19 = scalar_lea.sflag [#allocation3], %s459_s16 }
  0x4c   : > { %p575_p2 = pnand %p578_p1, %p759_p6 }
  0x4e   : > { %660 = dma.done.wait (!%p575_p2), %s460_s19, 2048  }
  0x4f   : > { %662 = vsyncadd (!%p575_p2), %s460_s19, 4294965248  ;;  %p16_p3 = scmp.ge.s32.totalorder %s742_s27, 6   ;;  %s951_s21 = smov %s669_s22 }
  0x50   : > { %s952_s22 = smov %s673_s23  ;;  %s953_s23 = smov %s753_s30 }
  0x51   : > { %s954_s24 = smov %s742_s27  ;;  %18 = sbr.rel (!%p16_p3) target bundleno = 3 (0x3), region = 82 }
  0x58   :  { %465 = vsyncpa [#allocation3], 1 }
  0x59   :  { %467 = vsyncpa [#allocation3 + $0x1], 1 }

// kernel: bottleneck_forward.5
= control target key start
LH: loop header
LB: loop body
LE: loop exit
PB: predicated region body
PF: predicated region fallthrough
CT: control target
= control target key end

     0   :  { %s2793_s27 = smov 0   ;;  %s3602_s0 = inlined_call_operand.vmem [shape: f32[1,16], index: 0, kind: input, shape index: {}]   ;;  %s3603_s1 = inlined_call_operand.vmem [shape: f32[1,16], index: 1, kind: input, shape index: {}]   ;;  %s3604_s2 = inlined_call_operand.vmem [shape: f32[1,16], index: 2, kind: input, shape index: {}]   ;;  %s3605_s3 = inlined_call_operand.vmem [shape: f32[1,16], index: 3, kind: input, shape index: {}]   ;;  %s3606_s4 = inlined_call_operand.vmem [shape: bf16[3,48,16], index: 4, kind: input, shape index: {}]   ;;  %s3607_s5 = inlined_call_operand.vmem [shape: bf16[512,16], index: 5, kind: input, shape index: {}]   ;;  %s3608_s6 = inlined_call_operand.vmem [shape: bf16[512,16], index: 6, kind: output, shape index: {0}]   ;;  %s3609_s7 = inlined_call_operand.vmem [shape: f32[16,16], index: 7, kind: output, shape index: {1}]   ;;  %s3610_s8 = inlined_call_operand.vmem [shape: f32[16,16], index: 8, kind: output, shape index: {2}]  }
   0x1 LB: > { %s2799_s28 = sadd.s32 4294967295, %s2743_s27   ;;  %p2251_p0 = scmp.ge.s32.totalorder %s2743_s27, 1  ;;  %s2743_s27 = sphi %s2793_s27, %s19_s27  }
   0x2   : > { %p268_p1 = scmp.lt.s32.totalorder %s2743_s27, 3 }
   0x4   : > { %p269_p2 = pnand %p2251_p0, %p268_p1 }
   0x5   : > { %vm686_vm0 = vcmask (!%p269_p2), 1040384   ;;  %vm687_vm1 = vsmask.f32 (!%p269_p2), 256  ;;  %v2745_v0 = vmov (!%p269_p2), 0   ;;  %s2252_s29 = sshll.u32 (!%p269_p2), %s2799_s28, 5  ;;  %vm980_vm3 = vcmask (!%p269_p2), 1046528  }
   0x6   : > { %272 = sbr.rel (%p269_p2) target bundleno = 519 (0x207), region = 44  ;;  %v536_v1 = vrot.slane (!%p269_p2), %v2745_v0, 7  ;;  %vm2803_vm2 = vmand (!%p269_p2), %vm686_vm0, %vm687_vm1  ;;  %v331_v3 = vld [vmem:[%s3602_s0] sm:$0x1] (!%p269_p2)  ;;  %vm723_vm4 = vsmask.f32 (!%p269_p2), 7424  ;;  %v410_v24 = vlaneseq (!%p269_p2) }
   0x7   : > { %v332_v4 = vld [vmem:[%s3603_s1] sm:$0x1] (!%p269_p2)  ;;  %p2823_p3 = scmp.lt.s32.totalorder (!%p269_p2), %s2252_s29, 63  ;;  %v2724_v11 = vld [vmem:[%s3606_s4 + $0x18] sm:$0xff] (!%p269_p2)   ;;  %v2830_v13 = vmul.f32 (!%p269_p2), 0.001953125, %v331_v3  ;;  %s2746_s15 = smov (!%p269_p2), 32  }
   0x8   : > { %v2816_v5 = vsel (!%p269_p2), %vm2803_vm2, 0, %v536_v1  ;;  %v706_v6 = vsel (!%p269_p2), %vm2803_vm2, %v536_v1, 0  ;;  %v336_v14 = vmul.f32 (!%p269_p2), 0.001953125, %v332_v4  ;;  %2529 = vmatprep.subr.bf16.mxu1 (!%p269_p2), %v2724_v11  ;;  %v2839_v19 = vld [vmem:[%s3606_s4] sm:$0xff] (!%p269_p2)   ;;  %s2747_s18 = smov (!%p269_p2), 16   ;;  %v2860_v27 = vshrl.u32 (!%p269_p2), %v410_v24, 7 }
   0x9   : > { %v981_v7 = vrot.slane (!%p269_p2), %v2816_v5, 1  ;;  %v982_v8 = vrot.slane (!%p269_p2), %v706_v6, 1  ;;  %v725_v9 = vshrl.u32 (!%p269_p2), %v2816_v5, 16  ;;  %v727_v10 = vshll.u32 (!%p269_p2), %v2816_v5, 16  ;;  %2530 = vmatpush3.bf16.msra.mxu1 (!%p269_p2), %v2724_v11  ;;  %2567 = vmatprep.subr.bf16.mxu0 (!%p269_p2), %v2839_v19  ;;  %v2726_v26 = vld [vmem:[%s3606_s4 + $0x20] sm:$0xff] (!%p269_p2)   ;;  %v2865_v28 = vld [vmem:[%s3606_s4 + $0x8] sm:$0xff] (!%p269_p2)  }
   0xa   : > { %v732_v12 = vshll.u32 (!%p269_p2), %v706_v6, 16  ;;  %v337_v18 = vmul.f32 (!%p269_p2), %v2830_v13, %v2830_v13  ;;  %2568 = vmatpush3.bf16.msra.mxu0 (!%p269_p2), %v2839_v19  ;;  %2531 = vmatprep.subr.bf16.mxu1 (!%p269_p2), %v2726_v26  ;;  %v412_v36 = vsub.s32 (!%p269_p2), 0, %v2860_v27  ;;  %v333_v45 = vld [vmem:[%s3604_s2] sm:$0x1] (!%p269_p2)  ;;  %vm1061_vm5 = vcmask (!%p269_p2), 130048   ;;  %p322_p4 = scmp.lt.s32.totalorder (!%p269_p2), %s2799_s28, 1 }
   0xb   : > { %v983_v15 = vsel (!%p269_p2), %vm980_vm3, %v981_v7, %v982_v8  ;;  %v729_v16 = vrot.slane (!%p269_p2), %v727_v10, 1  ;;  %2569 = vmatprep.subr.bf16.mxu0 (!%p269_p2), %v2865_v28  ;;  %v334_v8 = vld [vmem:[%s3605_s3] sm:$0x1] (!%p269_p2)  ;;  %vm1094_vm6 = vcmask (!%p269_p2), 261120   ;;  %vm1183_vm7 = vcmask (!%p269_p2), 392192  }
   0xc   : > { %1029 = vrot.lane.b32.xlu1 (!%p269_p2), %v983_v15, %s2746_s15  ;;  %v734_v17 = vrot.slane (!%p269_p2), %v732_v12, 1  ;;  %v338_v21 = vsub.f32 (!%p269_p2), %v336_v14, %v337_v18  ;;  %vm1904_vm8 = vcmask (!%p269_p2), 125952  }
   0xd   : > { %v730_v20 = vor.u32 %v729_v16, %v725_v9  ;;  %s3622_s29 = smov (!%p2823_p3, %s2252_s29), 63  ;;  %2532 = vmatpush3.bf16.msra.mxu1 %v2726_v26  ;;  %s3624_s28 = smov (!%p322_p4, %s2799_s28), 1 }
   0xe   : > { %v339_v23 = vmax.f32 %v338_v21, 0.0  ;;  %s2253_s19 = sshll.u32 %s3622_s29, 2  ;;  %2570 = vmatpush3.bf16.msra.mxu0 %v2865_v28  ;;  %s2256_s29 = sshll.u32 %s3624_s28, 3 }
   0xf   : > { %v735_v22 = vsel %vm723_vm4, %v730_v20, %v734_v17  ;;  %s2858_s24 = scalar_lea.vmem %s3607_s5, %s2253_s19  ;;  %s3428_s10 = scalar_lea.vmem %s3608_s6, %s2253_s19 }
  0x10   : > { %916 = vrot.lane.b32.xlu0 %v735_v22, %s2747_s18  ;;  %v340_v25 = vadd.f32 1e-05, %v339_v23  ;;  %v2457_v29 = vld [vmem:[%s2858_s24 + $0x8] sm:$0xff]   ;;  %v2394_v30 = vld [vmem:[%s2858_s24] sm:$0xff]   ;;  %v2459_v31 = vld [vmem:[%s2858_s24 + $0x18] sm:$0xff]   ;;  %s325_s12 = scalar_lea.vmem %s3609_s7, %s2256_s29  ;;  %s329_s14 = scalar_lea.vmem %s3610_s8, %s2256_s29 }
  0x11   : > { %v2458_v32 = vld [vmem:[%s2858_s24 + $0x10] sm:$0xff]   ;;  %v2874_v33 = vld [vmem:[%s2858_s24 + $0x28] sm:$0xff]   ;;  %v2399_v34 = vunpack.c.l.bf16 %v2457_v29  ;;  %v2400_v35 = vunpack.c.h.bf16 %v2457_v29  ;;  %v2460_v37 = vld [vmem:[%s2858_s24 + $0x20] sm:$0xff]   ;;  %v2395_v39 = vunpack.c.l.bf16 %v2394_v30  ;;  %v2396_v40 = vunpack.c.h.bf16 %v2394_v30 }
  0x12   : > { %2733 = vrsqrt.f32 %v340_v25  ;;  %v2879_v38 = vld [vmem:[%s2858_s24 + $0x38] sm:$0xff]   ;;  %v2407_v41 = vunpack.c.l.bf16 %v2459_v31  ;;  %v2408_v42 = vunpack.c.h.bf16 %v2459_v31  ;;  %v2882_v43 = vld [vmem:[%s2858_s24 + $0x30] sm:$0xff]   ;;  %v2885_v44 = vld [vmem:[%s2858_s24 + $0x48] sm:$0xff]   ;;  %v2403_v46 = vunpack.c.l.bf16 %v2458_v32 }
  0x13   : > { %v2404_v47 = vunpack.c.h.bf16 %v2458_v32  ;;  %v2415_v48 = vunpack.c.l.bf16 %v2874_v33  ;;  %v2416_v49 = vunpack.c.h.bf16 %v2874_v33  ;;  %v2893_v50 = vld [vmem:[%s2858_s24 + $0x40] sm:$0xff]   ;;  %v2896_v51 = vld [vmem:[%s2858_s24 + $0x58] sm:$0xff]   ;;  %v2411_v52 = vunpack.c.l.bf16 %v2460_v37  ;;  %v2901_v56 = vld [vmem:[%s2858_s24 + $0x50] sm:$0xff]  }
  0x14   : > { %v2412_v53 = vunpack.c.h.bf16 %v2460_v37  ;;  %v2423_v54 = vunpack.c.l.bf16 %v2879_v38  ;;  %v2424_v55 = vunpack.c.h.bf16 %v2879_v38  ;;  %v2904_v57 = vld [vmem:[%s2858_s24 + $0x68] sm:$0xff]   ;;  %v2419_v59 = vunpack.c.l.bf16 %v2882_v43  ;;  %v2911_v63 = vld [vmem:[%s2858_s24 + $0x60] sm:$0xff]   ;;  %v2917_v6 = vld [vmem:[%s2858_s24 + $0x70] sm:$0xff]  }
  0x15   : > { %v2420_v60 = vunpack.c.h.bf16 %v2882_v43  ;;  %v2431_v61 = vunpack.c.l.bf16 %v2885_v44  ;;  %v2432_v62 = vunpack.c.h.bf16 %v2885_v44  ;;  %v2427_v1 = vunpack.c.l.bf16 %v2893_v50  ;;  %v2920_v7 = vld [vmem:[%s2858_s24 + $0x78] sm:$0xff]  }
  0x16   : > { %v2428_v3 = vunpack.c.h.bf16 %v2893_v50  ;;  %v2439_v4 = vunpack.c.l.bf16 %v2896_v51  ;;  %v2440_v9 = vunpack.c.h.bf16 %v2896_v51  ;;  %v2435_v10 = vunpack.c.l.bf16 %v2901_v56 }
  0x17   : > { %v2436_v11 = vunpack.c.h.bf16 %v2901_v56  ;;  %v2447_v12 = vunpack.c.l.bf16 %v2904_v57 }
  0x1c   : > { %v2734_v58 = vpop.eup %2733 }
  0x1d   : > { %v342_v0 = vmul.f32 %v2734_v58, %v333_v45 }
  0x1f   : > { %v343_v14 = vmul.f32 %v342_v0, %v2830_v13  ;;  %v2930_v15 = vrot.slane %v342_v0, %v412_v36 }
  0x21   : > { %v344_v23 = vsub.f32 %v334_v8, %v343_v14  ;;  %v417_v24 = vmul.f32 %v2399_v34, %v2930_v15  ;;  %v418_v25 = vmul.f32 %v2400_v35, %v2930_v15  ;;  %v415_v13 = vmul.f32 %v2395_v39, %v2930_v15 }
  0x22   : > { %v416_v26 = vmul.f32 %v2396_v40, %v2930_v15  ;;  %v421_v27 = vmul.f32 %v2407_v41, %v2930_v15  ;;  %v422_v29 = vmul.f32 %v2408_v42, %v2930_v15  ;;  %v419_v30 = vmul.f32 %v2403_v46, %v2930_v15 }
  0x23   : > { %v2945_v31 = vrot.slane %v344_v23, %v412_v36  ;;  %v420_v32 = vmul.f32 %v2404_v47, %v2930_v15  ;;  %v425_v33 = vmul.f32 %v2415_v48, %v2930_v15  ;;  %v426_v35 = vmul.f32 %v2416_v49, %v2930_v15 }
  0x24   : > { %v423_v37 = vmul.f32 %v2411_v52, %v2930_v15  ;;  %v424_v39 = vmul.f32 %v2412_v53, %v2930_v15  ;;  %v2954_v40 = vmul.f32 %v2423_v54, %v2930_v15  ;;  %v435_v51 = vmul.f32 %v2435_v10, %v2930_v15 }
  0x25   : > { %v455_v41 = vadd.f32 %v2945_v31, %v417_v24  ;;  %v456_v36 = vadd.f32 %v2945_v31, %v418_v25  ;;  %v453_v42 = vadd.f32 %v2945_v31, %v415_v13  ;;  %v454_v45 = vadd.f32 %v2945_v31, %v416_v26 }
  0x26   : > { %v459_v46 = vadd.f32 %v2945_v31, %v421_v27  ;;  %v460_v47 = vadd.f32 %v2945_v31, %v422_v29  ;;  %v457_v48 = vadd.f32 %v2945_v31, %v419_v30  ;;  %v458_v49 = vadd.f32 %v2945_v31, %v420_v32 }
  0x27   : > { %v487_v52 = vmax.f32 %v455_v41, 0.0  ;;  %v488_v53 = vmax.f32 %v456_v36, 0.0  ;;  %v485_v54 = vmax.f32 %v453_v42, 0.0  ;;  %v486_v58 = vmax.f32 %v454_v45, 0.0 }
  0x28   : > { %v491_v0 = vmax.f32 %v459_v46, 0.0  ;;  %v492_v8 = vmax.f32 %v460_v47, 0.0  ;;  %v489_v14 = vmax.f32 %v457_v48, 0.0  ;;  %v490_v23 = vmax.f32 %v458_v49, 0.0 }
  0x29   : > { %v518_v24 = vpack.c.bf16 %v488_v53, %v487_v52  ;;  %v517_v25 = vpack.c.bf16 %v486_v58, %v485_v54  ;;  %v2965_v13 = vadd.f32 %v2945_v31, %v425_v33  ;;  %v2970_v26 = vmul.f32 %v2424_v55, %v2930_v15 }
  0x2a   : > { %v520_v27 = vpack.c.bf16 %v492_v8, %v491_v0  ;;  %v519_v29 = vpack.c.bf16 %v490_v23, %v489_v14  ;;  %v2973_v30 = vadd.f32 %v2945_v31, %v426_v35  ;;  %v2976_v32 = vadd.f32 %v2945_v31, %v423_v37  ;;  %v2728_v35 = vld [vmem:[%s3606_s4 + $0x28] sm:$0xff]   ;;  %v2988_v37 = vld [vmem:[%s3606_s4 + $0x10] sm:$0xff]  }
  0x2b   : > { %v548_v41 = vshrl.u32 %v518_v24, 16  ;;  %v551_v36 = vshll.u32 %v518_v24, 16  ;;  %v541_v42 = vshrl.u32 %v517_v25, 16  ;;  %v544_v45 = vshll.u32 %v517_v25, 16  ;;  %2533 = vmatprep.subr.bf16.mxu1 %v2728_v35  ;;  %2571 = vmatprep.subr.bf16.mxu0 %v2988_v37 }
  0x2c   : > { %v562_v46 = vshrl.u32 %v520_v27, 16  ;;  %v565_v33 = vshll.u32 %v520_v27, 16  ;;  %v555_v47 = vshrl.u32 %v519_v29, 16  ;;  %v2979_v48 = vadd.f32 %v2945_v31, %v424_v39  ;;  %2534 = vmatpush3.bf16.msra.mxu1 %v2728_v35  ;;  %2572 = vmatpush3.bf16.msra.mxu0 %v2988_v37 }
  0x2d   : > { %v550_v38 = vrot.slane %v548_v41, 7  ;;  %v543_v55 = vrot.slane %v541_v42, 7  ;;  %v558_v49 = vshll.u32 %v519_v29, 16  ;;  %v495_v52 = vmax.f32 %v2965_v13, 0.0  ;;  %2643 = vmatprep.subr.bf16.mxu1 %v2839_v19 }
  0x2e   : > { %v564_v53 = vrot.slane %v562_v46, 7  ;;  %v557_v54 = vrot.slane %v555_v47, 7  ;;  %v496_v58 = vmax.f32 %v2973_v30, 0.0  ;;  %v493_v39 = vmax.f32 %v2976_v32, 0.0 }
  0x2f   : > { %v553_v0 = vor.u32 %v551_v36, %v550_v38  ;;  %v708_v8 = vsel %vm2803_vm2, %v550_v38, 0  ;;  %v546_v14 = vor.u32 %v544_v45, %v543_v55  ;;  %v707_v23 = vsel %vm2803_vm2, %v543_v55, 0 }
  0x30   : > { %v756_v24 = vshll.u32 %v708_v8, 16  ;;  %v744_v25 = vshll.u32 %v707_v23, 16  ;;  %v988_v27 = vrot.slane %v708_v8, 1  ;;  %v494_v29 = vmax.f32 %v2979_v48, 0.0  ;;  %v3015_v48 = vld [vmem:[%s3606_s4 + $0x30] sm:$0xff]  }
  0x31   : > { %v3001_v30 = vsel %vm2803_vm2, 0, %v553_v0  ;;  %v3005_v32 = vsel %vm2803_vm2, 0, %v546_v14  ;;  %v567_v41 = vor.u32 %v565_v33, %v564_v53  ;;  %v710_v36 = vsel %vm2803_vm2, %v564_v53, 0  ;;  %2605 = vmatprep.subr.bf16.mxu0 %v3015_v48 }
  0x32   : > { %v749_v42 = vshrl.u32 %v3001_v30, 16  ;;  %v751_v45 = vshll.u32 %v3001_v30, 16  ;;  %v758_v46 = vrot.slane %v756_v24, 1  ;;  %v985_v47 = vrot.slane %v707_v23, 1 }
  0x33   : > { %v737_v38 = vshrl.u32 %v3005_v32, 16  ;;  %v739_v33 = vshll.u32 %v3005_v32, 16  ;;  %v746_v55 = vrot.slane %v744_v25, 1  ;;  %v987_v35 = vrot.slane %v3001_v30, 1 }
  0x34   : > { %v753_v53 = vrot.slane %v751_v45, 1  ;;  %v3022_v19 = vsel %vm2803_vm2, 0, %v567_v41  ;;  %v780_v0 = vshll.u32 %v710_v36, 16  ;;  %v560_v8 = vor.u32 %v558_v49, %v557_v54 }
  0x35   : > { %v741_v14 = vrot.slane %v739_v33, 1  ;;  %v989_v23 = vsel %vm980_vm3, %v987_v35, %v988_v27  ;;  %v984_v24 = vrot.slane %v3005_v32, 1  ;;  %v773_v34 = vshrl.u32 %v3022_v19, 16 }
  0x36   : > { %v754_v22 = vor.u32 %v753_v53, %v749_v42  ;;  %v775_v25 = vshll.u32 %v3022_v19, 16  ;;  %v782_v21 = vrot.slane %v780_v0, 1  ;;  %v3031_v45 = vsel %vm2803_vm2, 0, %v560_v8 }
  0x37   : > { %v742_v41 = vor.u32 %v741_v14, %v737_v38  ;;  %v709_v49 = vsel %vm2803_vm2, %v557_v54, 0  ;;  %v761_v33 = vshrl.u32 %v3031_v45, 16  ;;  %v763_v27 = vshll.u32 %v3031_v45, 16 }
  0x38   : > { %v759_v35 = vsel %vm723_vm4, %v754_v22, %v758_v46  ;;  %v777_v20 = vrot.slane %v775_v25, 1  ;;  %v768_v18 = vshll.u32 %v709_v49, 16  ;;  %v993_v42 = vrot.slane %v3022_v19, 1 }
  0x39   : > { %920 = vrot.lane.b32.xlu1 %v759_v35, %s2747_s18  ;;  %v747_v53 = vsel %vm723_vm4, %v742_v41, %v746_v55  ;;  %v765_v0 = vrot.slane %v763_v27, 1  ;;  %v994_v8 = vrot.slane %v710_v36, 1  ;;  %v990_v38 = vrot.slane %v3031_v45, 1 }
  0x3a   : > { %918 = vrot.lane.b32.xlu0 %v747_v53, %s2747_s18  ;;  %v986_v54 = vsel %vm980_vm3, %v984_v24, %v985_v47  ;;  %v778_v14 = vor.u32 %v777_v20, %v773_v34  ;;  %v991_v17 = vrot.slane %v709_v49, 1  ;;  %v522_v22 = vpack.c.bf16 %v496_v58, %v495_v52 }
  0x3b   : > { %v766_v46 = vor.u32 %v765_v0, %v761_v33  ;;  %v770_v25 = vrot.slane %v768_v18, 1  ;;  %v521_v16 = vpack.c.bf16 %v494_v29, %v493_v39  ;;  %v467_v35 = vadd.f32 %v2945_v31, %v2954_v40 }
  0x3c   : > { %v783_v55 = vsel %vm723_vm4, %v778_v14, %v782_v21  ;;  %v995_v36 = vsel %vm980_vm3, %v993_v42, %v994_v8  ;;  %v576_v41 = vshrl.u32 %v522_v22, 16  ;;  %v579_v27 = vshll.u32 %v522_v22, 16 }
  0x3d   : > { %1033 = vrot.lane.b32.xlu1 %v989_v23, %s2746_s15  ;;  %v992_v20 = vsel %vm980_vm3, %v990_v38, %v991_v17  ;;  %v569_v34 = vshrl.u32 %v521_v16, 16  ;;  %v572_v47 = vshll.u32 %v521_v16, 16  ;;  %v468_v13 = vadd.f32 %v2945_v31, %v2970_v26 }
  0x3e   : > { %1031 = vrot.lane.b32.xlu0 %v986_v54, %s2746_s15  ;;  %v578_v18 = vrot.slane %v576_v41, 7  ;;  %v499_v52 = vmax.f32 %v467_v35, 0.0  ;;  %v427_v21 = vmul.f32 %v2419_v59, %v2930_v15  ;;  %v428_v40 = vmul.f32 %v2420_v60, %v2930_v15 }
  0x3f   : > { %v771_v58 = vsel %vm723_vm4, %v766_v46, %v770_v25  ;;  %v571_v17 = vrot.slane %v569_v34, 7  ;;  %v500_v39 = vmax.f32 %v468_v13, 0.0  ;;  %v433_v16 = vmul.f32 %v2431_v61, %v2930_v15 }
  0x40   : > { %v581_v26 = vor.u32 %v579_v27, %v578_v18  ;;  %v712_v29 = vsel %vm2803_vm2, %v578_v18, 0  ;;  %v465_v23 = vadd.f32 %v2945_v31, %v427_v21  ;;  %v434_v59 = vmul.f32 %v2432_v62, %v2930_v15 }
  0x41   : > { %924 = vrot.lane.b32.xlu1 %v783_v55, %s2747_s18  ;;  %v804_v43 = vshll.u32 %v712_v29, 16  ;;  %v574_v60 = vor.u32 %v572_v47, %v571_v17  ;;  %v711_v24 = vsel %vm2803_vm2, %v571_v17, 0  ;;  %v466_v49 = vadd.f32 %v2945_v31, %v428_v40 }
  0x42   : > { %922 = vrot.lane.b32.xlu0 %v771_v58, %s2747_s18  ;;  %v3078_v61 = vsel %vm2803_vm2, 0, %v581_v26  ;;  %v792_v33 = vshll.u32 %v711_v24, 16  ;;  %v1000_v42 = vrot.slane %v712_v29, 1  ;;  %v524_v53 = vpack.c.bf16 %v500_v39, %v499_v52 }
  0x43   : > { %v797_v44 = vshrl.u32 %v3078_v61, 16  ;;  %v799_v62 = vshll.u32 %v3078_v61, 16  ;;  %v3084_v0 = vsel %vm2803_vm2, 0, %v574_v60  ;;  %v997_v8 = vrot.slane %v711_v24, 1 }
  0x44   : > { %v806_v38 = vrot.slane %v804_v43, 1  ;;  %v785_v54 = vshrl.u32 %v3084_v0, 16  ;;  %v787_v14 = vshll.u32 %v3084_v0, 16  ;;  %v999_v22 = vrot.slane %v3078_v61, 1 }
  0x45   : > { %1037 = vrot.lane.b32.xlu1 %v995_v36, %s2746_s15  ;;  %v801_v46 = vrot.slane %v799_v62, 1  ;;  %v794_v25 = vrot.slane %v792_v33, 1  ;;  %v590_v35 = vshrl.u32 %v524_v53, 16  ;;  %v593_v55 = vshll.u32 %v524_v53, 16 }
  0x46   : > { %1035 = vrot.lane.b32.xlu0 %v992_v20, %s2746_s15  ;;  %v789_v41 = vrot.slane %v787_v14, 1  ;;  %v996_v27 = vrot.slane %v3084_v0, 1  ;;  %v497_v34 = vmax.f32 %v465_v23, 0.0  ;;  %v498_v47 = vmax.f32 %v466_v49, 0.0 }
  0x47   : > { %v802_v13 = vor.u32 %v801_v46, %v797_v44  ;;  %v1001_v18 = vsel %vm980_vm3, %v999_v22, %v1000_v42  ;;  %v592_v52 = vrot.slane %v590_v35, 7  ;;  %v471_v21 = vadd.f32 %v2945_v31, %v433_v16 }
  0x48   : > { %v790_v40 = vor.u32 %v789_v41, %v785_v54  ;;  %v523_v58 = vpack.c.bf16 %v498_v47, %v497_v34  ;;  %v472_v36 = vadd.f32 %v2945_v31, %v434_v59  ;;  %v431_v17 = vmul.f32 %v2427_v1, %v2930_v15 }
  0x49   : > { %v807_v20 = vsel %vm723_vm4, %v802_v13, %v806_v38  ;;  %v595_v39 = vor.u32 %v593_v55, %v592_v52  ;;  %v714_v26 = vsel %vm2803_vm2, %v592_v52, 0  ;;  %v503_v29 = vmax.f32 %v471_v21, 0.0 }
  0x4a   : > { %928 = vrot.lane.b32.xlu1 %v807_v20, %s2747_s18  ;;  %v795_v23 = vsel %vm723_vm4, %v790_v40, %v794_v25  ;;  %v828_v16 = vshll.u32 %v714_v26, 16  ;;  %v583_v43 = vshrl.u32 %v523_v58, 16  ;;  %v586_v60 = vshll.u32 %v523_v58, 16 }
  0x4b   : > { %926 = vrot.lane.b32.xlu0 %v795_v23, %s2747_s18  ;;  %v998_v59 = vsel %vm980_vm3, %v996_v27, %v997_v8  ;;  %v3107_v1 = vsel %vm2803_vm2, 0, %v595_v39  ;;  %v504_v24 = vmax.f32 %v472_v36, 0.0  ;;  %v432_v49 = vmul.f32 %v2428_v3, %v2930_v15 }
  0x4c   : > { %v821_v33 = vshrl.u32 %v3107_v1, 16  ;;  %v823_v42 = vshll.u32 %v3107_v1, 16  ;;  %v585_v53 = vrot.slane %v583_v43, 7  ;;  %v1006_v44 = vrot.slane %v714_v26, 1 }
  0x4d   : > { %v830_v62 = vrot.slane %v828_v16, 1  ;;  %v1005_v38 = vrot.slane %v3107_v1, 1  ;;  %v526_v54 = vpack.c.bf16 %v504_v24, %v503_v29  ;;  %v469_v8 = vadd.f32 %v2945_v31, %v431_v17 }
  0x4e   : > { %1041 = vrot.lane.b32.xlu1 %v1001_v18, %s2746_s15  ;;  %v825_v14 = vrot.slane %v823_v42, 1  ;;  %v588_v22 = vor.u32 %v586_v60, %v585_v53  ;;  %v713_v50 = vsel %vm2803_vm2, %v585_v53, 0  ;;  %v470_v3 = vadd.f32 %v2945_v31, %v432_v49 }
  0x4f   : > { %1039 = vrot.lane.b32.xlu0 %v998_v59, %s2746_s15  ;;  %v816_v46 = vshll.u32 %v713_v50, 16  ;;  %v1003_v25 = vrot.slane %v713_v50, 1  ;;  %v604_v35 = vshrl.u32 %v526_v54, 16  ;;  %v437_v55 = vmul.f32 %v2439_v4, %v2930_v15 }
  0x50   : > { %v826_v41 = vor.u32 %v825_v14, %v821_v33  ;;  %v3126_v27 = vsel %vm2803_vm2, 0, %v588_v22  ;;  %v607_v34 = vshll.u32 %v526_v54, 16  ;;  %v501_v47 = vmax.f32 %v469_v8, 0.0 }
  0x51   : > { %v809_v13 = vshrl.u32 %v3126_v27, 16  ;;  %v811_v18 = vshll.u32 %v3126_v27, 16  ;;  %v1007_v52 = vsel %vm980_vm3, %v1005_v38, %v1006_v44  ;;  %v1002_v21 = vrot.slane %v3126_v27, 1 }
  0x52   : > { %v831_v40 = vsel %vm723_vm4, %v826_v41, %v830_v62  ;;  %v606_v58 = vrot.slane %v604_v35, 7  ;;  %v502_v36 = vmax.f32 %v470_v3, 0.0  ;;  %v438_v4 = vmul.f32 %v2440_v9, %v2930_v15 }
  0x53   : > { %932 = vrot.lane.b32.xlu1 %v831_v40, %s2747_s18  ;;  %v813_v17 = vrot.slane %v811_v18, 1  ;;  %v818_v20 = vrot.slane %v816_v46, 1  ;;  %v1004_v39 = vsel %vm980_vm3, %v1002_v21, %v1003_v25  ;;  %v475_v26 = vadd.f32 %v2945_v31, %v437_v55 }
  0x54   : > { %v609_v29 = vor.u32 %v607_v34, %v606_v58  ;;  %v716_v23 = vsel %vm2803_vm2, %v606_v58, 0  ;;  %v525_v16 = vpack.c.bf16 %v502_v36, %v501_v47  ;;  %v476_v43 = vadd.f32 %v2945_v31, %v438_v4 }
  0x55   : > { %v814_v60 = vor.u32 %v813_v17, %v809_v13  ;;  %v852_v59 = vshll.u32 %v716_v23, 16  ;;  %v507_v24 = vmax.f32 %v475_v26, 0.0  ;;  %v1012_v38 = vrot.slane %v716_v23, 1 }
  0x56   : > { %v3147_v9 = vsel %vm2803_vm2, 0, %v609_v29  ;;  %v597_v49 = vshrl.u32 %v525_v16, 16  ;;  %v600_v33 = vshll.u32 %v525_v16, 16  ;;  %v508_v42 = vmax.f32 %v476_v43, 0.0 }
  0x57   : > { %v819_v53 = vsel %vm723_vm4, %v814_v60, %v818_v20  ;;  %1045 = vrot.lane.b32.xlu1 %v1007_v52, %s2746_s15  ;;  %v845_v44 = vshrl.u32 %v3147_v9, 16  ;;  %v847_v62 = vshll.u32 %v3147_v9, 16  ;;  %v1011_v10 = vrot.slane %v3147_v9, 1 }
  0x58   : > { %930 = vrot.lane.b32.xlu0 %v819_v53, %s2747_s18  ;;  %v599_v54 = vrot.slane %v597_v49, 7  ;;  %v528_v8 = vpack.c.bf16 %v508_v42, %v507_v24  ;;  %v436_v14 = vmul.f32 %v2436_v11, %v2930_v15  ;;  %v854_v50 = vrot.slane %v852_v59, 1 }
  0x59   : > { %v849_v22 = vrot.slane %v847_v62, 1  ;;  %v473_v3 = vadd.f32 %v2945_v31, %v435_v51  ;;  %v441_v46 = vmul.f32 %v2447_v12, %v2930_v15  ;;  %v3614_v41 = vunpack.c.h.bf16 %v2904_v57 }
  0x5a   : > { %v602_v25 = vor.u32 %v600_v33, %v599_v54  ;;  %v715_v35 = vsel %vm2803_vm2, %v599_v54, 0  ;;  %v618_v55 = vshrl.u32 %v528_v8, 16  ;;  %v1013_v11 = vsel %vm980_vm3, %v1011_v10, %v1012_v38 }
  0x5b   : > { %v442_v34 = vmul.f32 %v3614_v41, %v2930_v15  ;;  %v850_v47 = vor.u32 %v849_v22, %v845_v44  ;;  %v840_v56 = vshll.u32 %v715_v35, 16  ;;  %v621_v13 = vshll.u32 %v528_v8, 16 }
  0x5c   : > { %1043 = vrot.lane.b32.xlu0 %v1004_v39, %s2746_s15  ;;  %v3171_v18 = vsel %vm2803_vm2, 0, %v602_v25  ;;  %v620_v12 = vrot.slane %v618_v55, 7  ;;  %v474_v52 = vadd.f32 %v2945_v31, %v436_v14  ;;  %v505_v21 = vmax.f32 %v473_v3, 0.0 }
  0x5d   : > { %v855_v40 = vsel %vm723_vm4, %v850_v47, %v854_v50  ;;  %v833_v57 = vshrl.u32 %v3171_v18, 16  ;;  %v835_v58 = vshll.u32 %v3171_v18, 16  ;;  %v1009_v36 = vrot.slane %v715_v35, 1 }
  0x5e   : > { %936 = vrot.lane.b32.xlu1 %v855_v40, %s2747_s18  ;;  %v842_v4 = vrot.slane %v840_v56, 1  ;;  %v623_v17 = vor.u32 %v621_v13, %v620_v12  ;;  %v718_v20 = vsel %vm2803_vm2, %v620_v12, 0  ;;  %v506_v39 = vmax.f32 %v474_v52, 0.0 }
  0x5f   : > { %v837_v26 = vrot.slane %v835_v58, 1  ;;  %v1008_v29 = vrot.slane %v3171_v18, 1  ;;  %v876_v23 = vshll.u32 %v718_v20, 16  ;;  %v479_v16 = vadd.f32 %v2945_v31, %v441_v46 }
  0x60   : > { %v3184_v43 = vsel %vm2803_vm2, 0, %v623_v17  ;;  %v527_v60 = vpack.c.bf16 %v506_v39, %v505_v21  ;;  %v1018_v59 = vrot.slane %v718_v20, 1  ;;  %v480_v24 = vadd.f32 %v2945_v31, %v442_v34 }
  0x61   : > { %v838_v51 = vor.u32 %v837_v26, %v833_v57  ;;  %v869_v49 = vshrl.u32 %v3184_v43, 16  ;;  %v871_v33 = vshll.u32 %v3184_v43, 16  ;;  %v878_v42 = vrot.slane %v876_v23, 1 }
  0x62   : > { %1049 = vrot.lane.b32.xlu1 %v1013_v11, %s2746_s15  ;;  %v611_v53 = vshrl.u32 %v527_v60, 16  ;;  %v614_v44 = vshll.u32 %v527_v60, 16  ;;  %v1017_v62 = vrot.slane %v3184_v43, 1  ;;  %v511_v38 = vmax.f32 %v479_v16, 0.0 }
  0x63   : > { %v843_v54 = vsel %vm723_vm4, %v838_v51, %v842_v4  ;;  %v873_v10 = vrot.slane %v871_v33, 1  ;;  %v512_v8 = vmax.f32 %v480_v24, 0.0  ;;  %v3615_v14 = vunpack.c.l.bf16 %v2911_v63 }
  0x64   : > { %934 = vrot.lane.b32.xlu0 %v843_v54, %s2747_s18  ;;  %v1010_v50 = vsel %vm980_vm3, %v1008_v29, %v1009_v36  ;;  %v613_v3 = vrot.slane %v611_v53, 7  ;;  %v3616_v46 = vunpack.c.h.bf16 %v2911_v63  ;;  %v3617_v35 = vunpack.c.l.bf16 %v2917_v6 }
  0x65   : > { %v439_v22 = vmul.f32 %v3615_v14, %v2930_v15  ;;  %v874_v41 = vor.u32 %v873_v10, %v869_v49  ;;  %v1019_v34 = vsel %vm980_vm3, %v1017_v62, %v1018_v59  ;;  %v530_v47 = vpack.c.bf16 %v512_v8, %v511_v38 }
  0x66   : > { %v440_v25 = vmul.f32 %v3616_v46, %v2930_v15  ;;  %v443_v55 = vmul.f32 %v3617_v35, %v2930_v15  ;;  %v616_v11 = vor.u32 %v614_v44, %v613_v3  ;;  %v717_v13 = vsel %vm2803_vm2, %v613_v3, 0 }
  0x67   : > { %v477_v56 = vadd.f32 %v2945_v31, %v439_v22  ;;  %v3618_v63 = vunpack.c.h.bf16 %v2917_v6  ;;  %v879_v21 = vsel %vm723_vm4, %v874_v41, %v878_v42  ;;  %v864_v40 = vshll.u32 %v717_v13, 16 }
  0x68   : > { %v478_v12 = vadd.f32 %v2945_v31, %v440_v25  ;;  %v632_v57 = vshrl.u32 %v530_v47, 16  ;;  %v481_v58 = vadd.f32 %v2945_v31, %v443_v55  ;;  %1047 = vrot.lane.b32.xlu0 %v1010_v50, %s2746_s15  ;;  %940 = vrot.lane.b32.xlu1 %v879_v21, %s2747_s18  ;;  %v3217_v36 = vsel %vm2803_vm2, 0, %v616_v11 }
  0x69   : > { %v444_v52 = vmul.f32 %v3618_v63, %v2930_v15  ;;  %v635_v4 = vshll.u32 %v530_v47, 16  ;;  %v509_v17 = vmax.f32 %v477_v56, 0.0  ;;  %v857_v6 = vshrl.u32 %v3217_v36, 16 }
  0x6a   : > { %v510_v20 = vmax.f32 %v478_v12, 0.0  ;;  %v859_v39 = vshll.u32 %v3217_v36, 16  ;;  %v866_v26 = vrot.slane %v864_v40, 1  ;;  %v1015_v29 = vrot.slane %v717_v13, 1 }
  0x6b   : > { %v1014_v23 = vrot.slane %v3217_v36, 1  ;;  %v634_v16 = vrot.slane %v632_v57, 7  ;;  %v482_v59 = vadd.f32 %v2945_v31, %v444_v52  ;;  %v513_v51 = vmax.f32 %v481_v58, 0.0 }
  0x6c   : > { %v529_v60 = vpack.c.bf16 %v510_v20, %v509_v17  ;;  %v861_v24 = vrot.slane %v859_v39, 1  ;;  %v3619_v49 = vunpack.c.l.bf16 %v2920_v7  ;;  %v3620_v42 = vunpack.c.h.bf16 %v2920_v7  ;;  %1053 = vrot.lane.b32.xlu1 %v1019_v34, %s2746_s15 }
  0x6d   : > { %v637_v44 = vor.u32 %v635_v4, %v634_v16  ;;  %v720_v62 = vsel %vm2803_vm2, %v634_v16, 0  ;;  %v514_v14 = vmax.f32 %v482_v59, 0.0 }
  0x6e   : > { %v445_v33 = vmul.f32 %v3619_v49, %v2930_v15  ;;  %v446_v53 = vmul.f32 %v3620_v42, %v2930_v15  ;;  %v625_v38 = vshrl.u32 %v529_v60, 16  ;;  %v628_v54 = vshll.u32 %v529_v60, 16 }
  0x6f   : > { %v862_v10 = vor.u32 %v861_v24, %v857_v6  ;;  %v900_v8 = vshll.u32 %v720_v62, 16  ;;  %v3234_v22 = vsel %vm2803_vm2, 0, %v637_v44  ;;  %v1016_v15 = vsel %vm980_vm3, %v1014_v23, %v1015_v29 }
  0x70   : > { %v627_v50 = vrot.slane %v625_v38, 7  ;;  %v483_v3 = vadd.f32 %v2945_v31, %v445_v33  ;;  %v893_v46 = vshrl.u32 %v3234_v22, 16  ;;  %v895_v25 = vshll.u32 %v3234_v22, 16 }
  0x71   : > { %v867_v7 = vsel %vm723_vm4, %v862_v10, %v866_v26  ;;  %v531_v41 = vpack.c.bf16 %v514_v14, %v513_v51  ;;  %v484_v34 = vadd.f32 %v2945_v31, %v446_v53  ;;  %v902_v56 = vrot.slane %v900_v8, 1 }
  0x72   : > { %938 = vrot.lane.b32.xlu0 %v867_v7, %s2747_s18  ;;  %v630_v35 = vor.u32 %v628_v54, %v627_v50  ;;  %v719_v55 = vsel %vm2803_vm2, %v627_v50, 0  ;;  %v897_v47 = vrot.slane %v895_v25, 1  ;;  %v1024_v13 = vrot.slane %v720_v62, 1 }
  0x73   : > { %v888_v11 = vshll.u32 %v719_v55, 16  ;;  %v639_v63 = vshrl.u32 %v531_v41, 16  ;;  %v642_v52 = vshll.u32 %v531_v41, 16  ;;  %v515_v21 = vmax.f32 %v483_v3, 0.0 }
  0x74   : > { %v3247_v12 = vsel %vm2803_vm2, 0, %v630_v35  ;;  %v898_v40 = vor.u32 %v897_v47, %v893_v46  ;;  %v1023_v4 = vrot.slane %v3234_v22, 1  ;;  %v516_v17 = vmax.f32 %v484_v34, 0.0 }
  0x75   : > { %v881_v57 = vshrl.u32 %v3247_v12, 16  ;;  %v883_v58 = vshll.u32 %v3247_v12, 16  ;;  %v641_v31 = vrot.slane %v639_v63, 7  ;;  %v890_v39 = vrot.slane %v888_v11, 1 }
  0x76   : > { %1051 = vrot.lane.b32.xlu0 %v1016_v15, %s2746_s15  ;;  %v903_v20 = vsel %vm723_vm4, %v898_v40, %v902_v56  ;;  %v1021_v26 = vrot.slane %v719_v55, 1  ;;  %v532_v16 = vpack.c.bf16 %v516_v17, %v515_v21  ;;  %v1025_v59 = vsel %vm980_vm3, %v1023_v4, %v1024_v13 }
  0x77   : > { %v885_v6 = vrot.slane %v883_v58, 1  ;;  %944 = vrot.lane.b32.xlu1 %v903_v20, %s2747_s18  ;;  %v644_v29 = vor.u32 %v642_v52, %v641_v31  ;;  %v721_v23 = vsel %vm2803_vm2, %v641_v31, 0  ;;  %v1020_v24 = vrot.slane %v3247_v12, 1 }
  0x78   : > { %v912_v51 = vshll.u32 %v721_v23, 16  ;;  %v1027_v33 = vrot.slane %v721_v23, 1  ;;  %v646_v42 = vshrl.u32 %v532_v16, 16  ;;  %v649_v53 = vshll.u32 %v532_v16, 16  ;;  %v2732_v16 = vld [vmem:[%s3606_s4 + $0x40] sm:$0xff]  }
  0x79   : > { %v886_v60 = vor.u32 %v885_v6, %v881_v57  ;;  %v3261_v49 = vsel %vm2803_vm2, 0, %v644_v29  ;;  %v1022_v8 = vsel %vm980_vm3, %v1020_v24, %v1021_v26  ;;  %v2731_v29 = vld [vmem:[%s3606_s4 + $0x38] sm:$0xff]  }
  0x7a   : > { %v905_v62 = vshrl.u32 %v3261_v49, 16  ;;  %v907_v38 = vshll.u32 %v3261_v49, 16  ;;  %v1026_v54 = vrot.slane %v3261_v49, 1  ;;  %v648_v10 = vrot.slane %v646_v42, 7 }
  0x7b   : > { %v891_v44 = vsel %vm723_vm4, %v886_v60, %v890_v39  ;;  %1057 = vrot.lane.b32.xlu1 %v1025_v59, %s2746_s15  ;;  %v914_v50 = vrot.slane %v912_v51, 1 }
  0x7c   : > { %942 = vrot.lane.b32.xlu0 %v891_v44, %s2747_s18  ;;  %v909_v14 = vrot.slane %v907_v38, 1  ;;  %v1028_v3 = vsel %vm980_vm3, %v1026_v54, %v1027_v33  ;;  %v651_v7 = vor.u32 %v649_v53, %v648_v10  ;;  %v722_v15 = vsel %vm2803_vm2, %v648_v10, 0 }
  0x7d   : > { %v1141_v25 = vshll.u32 %v722_v15, 16  ;;  %v1150_v55 = vrot.slane %v722_v15, 1 }
  0x7e   : > { %v910_v46 = vor.u32 %v909_v14, %v905_v62  ;;  %v3277_v35 = vsel %vm2803_vm2, 0, %v651_v7  ;;  %v1030_v56 = vpop.permute.xlu1 %1029 }
  0x7f   : > { %1059 = vrot.lane.b32.xlu1 %v1028_v3, %s2746_s15  ;;  %v1134_v34 = vshrl.u32 %v3277_v35, 16  ;;  %v1136_v47 = vshll.u32 %v3277_v35, 16  ;;  %v1149_v11 = vrot.slane %v3277_v35, 1  ;;  %v1143_v52 = vrot.slane %v1141_v25, 1 }
  0x80   : > { %1055 = vrot.lane.b32.xlu0 %v1022_v8, %s2746_s15  ;;  %v915_v41 = vsel %vm723_vm4, %v910_v46, %v914_v50 }
  0x81   : > { %v1138_v63 = vrot.slane %v1136_v47, 1  ;;  %v1151_v21 = vsel %vm980_vm3, %v1149_v11, %v1150_v55 }
  0x82   : > { %v917_v13 = vpop.permute.xlu0 %916 }
  0x83   : > { %v1063_v2 = vsel %vm1061_vm5, %v2816_v5, %v917_v13  ;;  %v1139_v57 = vor.u32 %v1138_v63, %v1134_v34  ;;  %1152 = vrot.lane.b32.xlu1 %v1151_v21, %s2746_s15 }
  0x84   : > { %946 = vrot.lane.b32.xlu0 %v915_v41, %s2747_s18  ;;  %v3288_v40 = vsel %vm1094_vm6, %v1063_v2, %v1030_v56 }
  0x85   : > { %2573 = vmatprep.mubr.msk.bf16.mxu0 %vm1183_vm7, %v3288_v40  ;;  %v1144_v58 = vsel %vm723_vm4, %v1139_v57, %v1143_v52 }
  0x88   : > { %1145 = vrot.lane.b32.xlu0 %v1144_v58, %s2747_s18 }
  0xab   : > { %v921_v4 = vpop.permute.xlu1 %920 }
  0xac   : > { %v919_v31 = vpop.permute.xlu0 %918  ;;  %v1067_v5 = vsel %vm1061_vm5, %v3001_v30, %v921_v4 }
  0xad   : > { %v1065_v20 = vsel %vm1061_vm5, %v3005_v32, %v919_v31  ;;  %v2735_v32 = vld [vmem:[%s3606_s4] sm:$0xff]  }
  0xaf   : > { %v1034_v17 = vpop.permute.xlu1 %1033 }
  0xb0   : > { %v1100_v6 = vsel %vm1094_vm6, %v1067_v5, %v1034_v17  ;;  %v1032_v39 = vpop.permute.xlu0 %1031 }
  0xb1   : > { %v1098_v26 = vsel %vm1094_vm6, %v1065_v20, %v1032_v39 }
  0xb2   : > { %2535 = vmatprep.mubr.msk.bf16.mxu1 %vm1183_vm7, %v1098_v26  ;;  %2574 = vmatmul.mubr.msk.bf16.vlgmr.msra.gmra.mrb[0].mxu0 %vm1183_vm7, %v1098_v26 }
  0xb3   : > { %2536 = vmatmul.mubr.msk.bf16.vlgmr.msra.gmra.mrb[0].mxu1 %vm1183_vm7, %v1100_v6  ;;  %2577 = vmatprep.mubr.msk.bf16.mxu0 %vm1183_vm7, %v1100_v6  ;;  %v925_v30 = vpop.permute.xlu1 %924 }
  0xb4   : > { %2646 = vmatpush3.bf16.msra.mxu1 %v2735_v32  ;;  %2606 = vmatpush3.bf16.msra.mxu0 %v3015_v48  ;;  %v923_v23 = vpop.permute.xlu0 %922  ;;  %v1071_v60 = vsel %vm1061_vm5, %v3022_v19, %v925_v30  ;;  %v2736_v48 = vld [vmem:[%s3606_s4 + $0x8] sm:$0xff]  }
  0xb5   : > { %2607 = vmatprep.subr.bf16.mxu0 %v2731_v29  ;;  %2644 = vmatprep.subr.bf16.mxu1 %v2865_v28  ;;  %v1069_v24 = vsel %vm1061_vm5, %v3031_v45, %v923_v23 }
  0xb7   : > { %v1038_v59 = vpop.permute.xlu1 %1037 }
  0xb8   : > { %v1104_v51 = vsel %vm1094_vm6, %v1071_v60, %v1038_v59  ;;  %v1036_v33 = vpop.permute.xlu0 %1035  ;;  %2608 = vmatpush3.bf16.msra.mxu0 %v2731_v29  ;;  %2647 = vmatpush3.bf16.msra.mxu1 %v2736_v48 }
  0xb9   : > { %v1102_v28 = vsel %vm1094_vm6, %v1069_v24, %v1036_v33  ;;  %2609 = vmatprep.subr.bf16.mxu0 %v2732_v16  ;;  %2645 = vmatprep.subr.bf16.mxu1 %v2988_v37 }
  0xba   : > { %2539 = vmatprep.mubr.msk.bf16.mxu1 %vm1183_vm7, %v1102_v28  ;;  %2578 = vmatmul.mubr.msk.bf16.gmra.mrb[4].mxu0 %vm1183_vm7, %v1102_v28 }
  0xbb   : > { %2540 = vmatmul.mubr.msk.bf16.gmra.mrb[4].mxu1 %vm1183_vm7, %v1104_v51  ;;  %2581 = vmatprep.mubr.msk.bf16.mxu0 %vm1183_vm7, %v1104_v51 }
  0xbc   : > { %v929_v19 = vpop.permute.xlu1 %928  ;;  %2610 = vmatpush3.bf16.msra.mxu0 %v2732_v16  ;;  %2648 = vmatpush3.bf16.msra.mxu1 %v2988_v37 }
  0xbd   : > { %v927_v45 = vpop.permute.xlu0 %926  ;;  %v1075_v42 = vsel %vm1061_vm5, %v3078_v61, %v929_v19 }
  0xbe   : > { %v1073_v44 = vsel %vm1061_vm5, %v3084_v0, %v927_v45 }
  0xc0   : > { %v1042_v53 = vpop.permute.xlu1 %1041 }
  0xc1   : > { %v1108_v62 = vsel %vm1094_vm6, %v1075_v42, %v1042_v53  ;;  %v1040_v38 = vpop.permute.xlu0 %1039 }
  0xc2   : > { %v1106_v54 = vsel %vm1094_vm6, %v1073_v44, %v1040_v38 }
  0xc3   : > { %2543 = vmatprep.mubr.msk.bf16.mxu1 %vm1183_vm7, %v1106_v54  ;;  %2582 = vmatmul.mubr.msk.bf16.gmra.mrb[8].mxu0 %vm1183_vm7, %v1106_v54 }
  0xc4   : > { %2544 = vmatmul.mubr.msk.bf16.gmra.mrb[8].mxu1 %vm1183_vm7, %v1108_v62  ;;  %2585 = vmatprep.mubr.msk.bf16.mxu0 %vm1183_vm7, %v1108_v62 }
  0xc5   : > { %v933_v37 = vpop.permute.xlu1 %932 }
  0xc6   : > { %v1079_v8 = vsel %vm1061_vm5, %v3107_v1, %v933_v37 }
  0xc9   : > { %v1046_v61 = vpop.permute.xlu1 %1045 }
  0xca   : > { %v931_v10 = vpop.permute.xlu0 %930  ;;  %v1112_v14 = vsel %vm1094_vm6, %v1079_v8, %v1046_v61 }
  0xcb   : > { %v1077_v0 = vsel %vm1061_vm5, %v3126_v27, %v931_v10 }
  0xce   : > { %v1044_v50 = vpop.permute.xlu0 %1043 }
  0xcf   : > { %v1110_v3 = vsel %vm1094_vm6, %v1077_v0, %v1044_v50 }
  0xd0   : > { %2547 = vmatprep.mubr.msk.bf16.mxu1 %vm1183_vm7, %v1110_v3  ;;  %2586 = vmatmul.mubr.msk.bf16.gmra.mrb[12].mxu0 %vm1183_vm7, %v1110_v3  ;;  %v937_v7 = vpop.permute.xlu1 %936 }
  0xd1   : > { %2548 = vmatmul.mubr.msk.bf16.gmra.mrb[12].mxu1 %vm1183_vm7, %v1112_v14  ;;  %2611 = vmatprep.mubr.msk.bf16.mxu0 %vm1183_vm7, %v1100_v6  ;;  %v1083_v1 = vsel %vm1061_vm5, %v3147_v9, %v937_v7 }
  0xd4   : > { %v1050_v46 = vpop.permute.xlu1 %1049 }
  0xd5   : > { %v1116_v25 = vsel %vm1094_vm6, %v1083_v1, %v1050_v46 }
  0xd6   : > { %v935_v15 = vpop.permute.xlu0 %934 }
  0xd7   : > { %v1081_v27 = vsel %vm1061_vm5, %v3171_v18, %v935_v15 }
  0xd8   : > { %2612 = vmatmul.mubr.msk.bf16.vlgmr.msra.gmra.mrb[0].mxu0 %vm1183_vm7, %v1102_v28 }
  0xd9   : > { %2615 = vmatprep.mubr.msk.bf16.mxu0 %vm1183_vm7, %v1104_v51 }
  0xda   : > { %v1048_v55 = vpop.permute.xlu0 %1047  ;;  %v941_v34 = vpop.permute.xlu1 %940 }
  0xdb   : > { %v1114_v41 = vsel %vm1094_vm6, %v1081_v27, %v1048_v55  ;;  %v1087_v56 = vsel %vm1061_vm5, %v3184_v43, %v941_v34 }
  0xdc   : > { %2551 = vmatprep.mubr.msk.bf16.mxu1 %vm1183_vm7, %v1114_v41 }
  0xdd   : > { %2552 = vmatmul.mubr.msk.bf16.gmra.mrb[16].mxu1 %vm1183_vm7, %v1116_v25 }
  0xde   : > { %v1054_v47 = vpop.permute.xlu1 %1053 }
  0xdf   : > { %v1120_v11 = vsel %vm1094_vm6, %v1087_v56, %v1054_v47 }
  0xe0   : > { %2616 = vmatmul.mubr.msk.bf16.gmra.mrb[4].mxu0 %vm1183_vm7, %v1106_v54 }
  0xe1   : > { %2619 = vmatprep.mubr.msk.bf16.mxu0 %vm1183_vm7, %v1108_v62 }
  0xe4   : > { %v939_v9 = vpop.permute.xlu0 %938 }
  0xe5   : > { %v1085_v18 = vsel %vm1061_vm5, %v3217_v36, %v939_v9 }
  0xe8   : > { %v1052_v13 = vpop.permute.xlu0 %1051  ;;  %2620 = vmatmul.mubr.msk.bf16.gmra.mrb[8].mxu0 %vm1183_vm7, %v1110_v3 }
  0xe9   : > { %v1118_v63 = vsel %vm1094_vm6, %v1085_v18, %v1052_v13  ;;  %v945_v52 = vpop.permute.xlu1 %944  ;;  %2623 = vmatprep.mubr.msk.bf16.mxu0 %vm1183_vm7, %v1112_v14 }
  0xea   : > { %2555 = vmatprep.mubr.msk.bf16.mxu1 %vm1183_vm7, %v1118_v63  ;;  %v1091_v43 = vsel %vm1061_vm5, %v3234_v22, %v945_v52 }
  0xeb   : > { %2556 = vmatmul.mubr.msk.bf16.gmra.mrb[20].mxu1 %vm1183_vm7, %v1120_v11 }
  0xed   : > { %v1058_v21 = vpop.permute.xlu1 %1057 }
  0xee   : > { %v943_v2 = vpop.permute.xlu0 %942  ;;  %v1124_v57 = vsel %vm1094_vm6, %v1091_v43, %v1058_v21 }
  0xef   : > { %v1089_v36 = vsel %vm1061_vm5, %v3247_v12, %v943_v2 }
  0xf0   : > { %2624 = vmatmul.mubr.msk.bf16.gmra.mrb[12].mxu0 %vm1183_vm7, %v1114_v41 }
  0xf1   : > { %v1060_v31 = vpop.permute.xlu1 %1059  ;;  %2627 = vmatprep.mubr.msk.bf16.mxu0 %vm1183_vm7, %v1116_v25 }
  0xf2   : > { %v1056_v58 = vpop.permute.xlu0 %1055 }
  0xf3   : > { %v1122_v4 = vsel %vm1094_vm6, %v1089_v36, %v1056_v58 }
  0xf4   : > { %2559 = vmatprep.mubr.msk.bf16.mxu1 %vm1183_vm7, %v1122_v4 }
  0xf5   : > { %2560 = vmatmul.mubr.msk.bf16.gmra.mrb[24].mxu1 %vm1183_vm7, %v1124_v57  ;;  %v1153_v17 = vpop.permute.xlu1 %1152 }
  0xf6   : > { %v947_v5 = vpop.permute.xlu0 %946 }
  0xf7   : > { %v1093_v22 = vsel %vm1061_vm5, %v3261_v49, %v947_v5 }
  0xf8   : > { %v1126_v12 = vsel %vm1094_vm6, %v1093_v22, %v1060_v31  ;;  %2628 = vmatmul.mubr.msk.bf16.gmra.mrb[16].mxu0 %vm1183_vm7, %v1118_v63 }
  0xf9   : > { %2563 = vmatprep.mubr.msk.bf16.mxu1 %vm1183_vm7, %v1126_v12  ;;  %2631 = vmatprep.mubr.msk.bf16.mxu0 %vm1183_vm7, %v1120_v11 }
  0xfa   : > { %v1146_v20 = vpop.permute.xlu0 %1145 }
  0xfb   : > { %v1155_v6 = vsel %vm1061_vm5, %v3277_v35, %v1146_v20 }
  0xfc   : > { %v1157_v39 = vsel %vm1094_vm6, %v1155_v6, %v1153_v17 }
  0xfd   : > { %2564 = vmatmul.mubr.msk.bf16.gmra.mrb[28].mxu1 %vm1183_vm7, %v1157_v39 }
  0xfe   : > { %2589 = vmatprep.mubr.msk.bf16.mxu1 %vm1183_vm7, %v1112_v14 }
 0x100   : > { %2632 = vmatmul.mubr.msk.bf16.gmra.mrb[20].mxu0 %vm1183_vm7, %v1122_v4 }
 0x101   : > { %2635 = vmatprep.mubr.msk.bf16.mxu0 %vm1183_vm7, %v1124_v57 }
 0x105   : > { %2590 = vmatmul.mubr.msk.bf16.vlgmr.msra.gmra.mrb[16].mxu1 %vm1183_vm7, %v1114_v41 }
 0x106   : > { %2593 = vmatprep.mubr.msk.bf16.mxu1 %vm1183_vm7, %v1116_v25 }
 0x108   : > { %2636 = vmatmul.mubr.msk.bf16.gmra.mrb[24].mxu0 %vm1183_vm7, %v1126_v12 }
 0x109   : > { %2639 = vmatprep.mubr.msk.bf16.mxu0 %vm1183_vm7, %v1157_v39 }
 0x10d   : > { %2594 = vmatmul.mubr.msk.bf16.gmra.mrb[20].mxu1 %vm1183_vm7, %v1118_v63 }
 0x10e   : > { %2597 = vmatprep.mubr.msk.bf16.mxu1 %vm1183_vm7, %v1120_v11 }
 0x110   : > { %2640 = vmatmul.mubr.msk.bf16.gmra.mrb[28].mxu0 %vm1183_vm7, %v3288_v40 }
 0x115   : > { %2598 = vmatmul.mubr.msk.bf16.gmra.mrb[24].mxu1 %vm1183_vm7, %v1122_v4 }
 0x116   : > { %2601 = vmatprep.mubr.msk.bf16.mxu1 %vm1183_vm7, %v1124_v57 }
 0x11d   : > { %2602 = vmatmul.mubr.msk.bf16.gmra.mrb[28].mxu1 %vm1183_vm7, %v1126_v12 }
 0x186   : > { %v2537_v49 = vpop.f32.mrb[0].mxu1 }
 0x187   : > { %v1250_v35 = vpop.f32.mrb[1].mxu1 }
 0x188   : > { %v2538_v26 = vpop.f32.mrb[2].mxu1 }
 0x189   : > { %v1253_v29 = vpop.f32.mrb[3].mxu1 }
 0x18e   : > { %v2541_v30 = vpop.f32.mrb[4].mxu1 }
 0x18f   : > { %v1266_v32 = vpop.f32.mrb[5].mxu1 }
 0x190   : > { %v2542_v23 = vpop.f32.mrb[6].mxu1 }
 0x191   : > { %v1269_v16 = vpop.f32.mrb[7].mxu1 }
 0x197   : > { %v3407_v60 = vpop.f32.mrb[8].mxu1 }
 0x198   : > { %v3409_v59 = vpop.f32.mrb[9].mxu1 }
 0x199   : > { %v3411_v40 = vpop.f32.mrb[10].mxu1 }
 0x19a   : > { %v3413_v24 = vpop.f32.mrb[11].mxu1 }
 0x1a4   : > { %v3415_v51 = vpop.f32.mrb[12].mxu1 }
 0x1a5   : > { %v3417_v33 = vpop.f32.mrb[13].mxu1 }
 0x1a6   : > { %v3419_v48 = vpop.f32.mrb[14].mxu1 }
 0x1a7   : > { %v3421_v28 = vpop.f32.mrb[15].mxu1 }
 0x1ab   : > { %v2613_v19 = vpop.f32.mrb[0].mxu0 }
 0x1ac   : > { %v2649_v45 = vadd.f32 %v2613_v19, %v2537_v49  ;;  %v1617_v42 = vpop.f32.mrb[1].mxu0 }
 0x1ad   : > { %v2650_v53 = vadd.f32 %v1617_v42, %v1250_v35  ;;  %v2614_v44 = vpop.f32.mrb[2].mxu0 }
 0x1ae   : > { %v2363_v62 = vpack.c.bf16 %v2649_v45, %v2649_v45  ;;  %v2651_v38 = vadd.f32 %v2614_v44, %v2538_v26  ;;  %v1620_v54 = vpop.f32.mrb[3].mxu0 }
 0x1af   : > { %v2361_v37 = vpack.c.bf16 %v2650_v53, %v2650_v53  ;;  %v2652_v10 = vadd.f32 %v1620_v54, %v1253_v29 }
 0x1b0   : > { %1907 = vst.msk [vmem:[%s3428_s10 + $0x8] sm:$0xf] %vm1904_vm8, %v2363_v62  ;;  %v1777_v61 = vpack.c.bf16 %v2651_v38, %v2649_v45  ;;  %v2364_v8 = vpack.c.bf16 %v2651_v38, %v2651_v38 }
 0x1b1   : > { %1905 = vst.msk [vmem:[%s3428_s10] sm:$0xf] %vm1904_vm8, %v2361_v37  ;;  %v1776_v0 = vpack.c.bf16 %v2652_v10, %v2650_v53  ;;  %v2362_v14 = vpack.c.bf16 %v2652_v10, %v2652_v10 }
 0x1b2   : > { %1908 = vst.msk [vmem:[%s3428_s10 + $0xc] sm:$0xf] %vm1904_vm8, %v2364_v8  ;;  %v1939_v50 = vunpack.c.l.bf16 %v1777_v61  ;;  %v1940_v3 = vunpack.c.h.bf16 %v1777_v61 }
 0x1b3   : > { %1906 = vst.msk [vmem:[%s3428_s10 + $0x4] sm:$0xf] %vm1904_vm8, %v2362_v14  ;;  %v1937_v7 = vunpack.c.l.bf16 %v1776_v0  ;;  %v1938_v15 = vunpack.c.h.bf16 %v1776_v0  ;;  %v2617_v46 = vpop.f32.mrb[4].mxu0 }
 0x1b4   : > { %v1972_v1 = vsel %vm1061_vm5, %v1939_v50, 0.0  ;;  %v2035_v27 = vmul.f32 %v1939_v50, %v1939_v50  ;;  %v1633_v25 = vpop.f32.mrb[5].mxu0  ;;  %v1974_v56 = vsel %vm1061_vm5, %v1940_v3, 0.0  ;;  %v2036_v18 = vmul.f32 %v1940_v3, %v1940_v3 }
 0x1b5   : > { %v1969_v55 = vsel %vm1061_vm5, %v1937_v7, 0.0  ;;  %v1970_v41 = vsel %vm1061_vm5, %v1938_v15, 0.0  ;;  %v2033_v34 = vmul.f32 %v1937_v7, %v1937_v7  ;;  %v2034_v9 = vmul.f32 %v1938_v15, %v1938_v15  ;;  %v2618_v47 = vpop.f32.mrb[6].mxu0 }
 0x1b6   : > { %v1971_v11 = vadd.f32 %v1970_v41, %v1969_v55  ;;  %v2653_v13 = vadd.f32 %v2617_v46, %v2541_v30  ;;  %v1636_v63 = vpop.f32.mrb[7].mxu0  ;;  %v2654_v21 = vadd.f32 %v1633_v25, %v1266_v32  ;;  %v2655_v43 = vadd.f32 %v2618_v47, %v2542_v23 }
 0x1b7   : > { %v2065_v52 = vsel %vm1061_vm5, %v2033_v34, 0.0  ;;  %v2066_v2 = vsel %vm1061_vm5, %v2034_v9, 0.0  ;;  %v2656_v4 = vadd.f32 %v1636_v63, %v1269_v16  ;;  %v2068_v31 = vsel %vm1061_vm5, %v2035_v27, 0.0 }
 0x1b8   : > { %v1973_v36 = vadd.f32 %v1972_v1, %v1971_v11  ;;  %v2067_v57 = vadd.f32 %v2066_v2, %v2065_v52  ;;  %v2367_v58 = vpack.c.bf16 %v2653_v13, %v2653_v13  ;;  %v2365_v5 = vpack.c.bf16 %v2654_v21, %v2654_v21 }
 0x1b9   : > { %v1779_v22 = vpack.c.bf16 %v2655_v43, %v2653_v13  ;;  %v2368_v12 = vpack.c.bf16 %v2655_v43, %v2655_v43  ;;  %v1778_v20 = vpack.c.bf16 %v2656_v4, %v2654_v21  ;;  %v2366_v6 = vpack.c.bf16 %v2656_v4, %v2656_v4 }
 0x1ba   : > { %v2069_v17 = vadd.f32 %v2068_v31, %v2067_v57  ;;  %1911 = vst.msk [vmem:[%s3428_s10 + $0x18] sm:$0xf] %vm1904_vm8, %v2367_v58  ;;  %v1975_v39 = vadd.f32 %v1974_v56, %v1973_v36  ;;  %v2070_v49 = vsel %vm1061_vm5, %v2036_v18, 0.0  ;;  %1909 = vst.msk [vmem:[%s3428_s10 + $0x10] sm:$0xf] %vm1904_vm8, %v2365_v5 }
 0x1bb   : > { %1912 = vst.msk [vmem:[%s3428_s10 + $0x1c] sm:$0xf] %vm1904_vm8, %v2368_v12  ;;  %v1943_v35 = vunpack.c.l.bf16 %v1779_v22  ;;  %v2621_v26 = vpop.f32.mrb[8].mxu0  ;;  %1910 = vst.msk [vmem:[%s3428_s10 + $0x14] sm:$0xf] %vm1904_vm8, %v2366_v6  ;;  %v1941_v29 = vunpack.c.l.bf16 %v1778_v20  ;;  %v1942_v30 = vunpack.c.h.bf16 %v1778_v20  ;;  %v1944_v19 = vunpack.c.h.bf16 %v1779_v22 }
 0x1bc   : > { %v2071_v32 = vadd.f32 %v2070_v49, %v2069_v17  ;;  %v2657_v23 = vadd.f32 %v2621_v26, %v3407_v60  ;;  %v1649_v16 = vpop.f32.mrb[9].mxu0 }
 0x1bd   : > { %v2622_v45 = vpop.f32.mrb[10].mxu0  ;;  %v1976_v42 = vsel %vm1061_vm5, %v1941_v29, 0.0  ;;  %v2037_v53 = vmul.f32 %v1941_v29, %v1941_v29  ;;  %v2038_v44 = vmul.f32 %v1942_v30, %v1942_v30  ;;  %v1980_v38 = vsel %vm1061_vm5, %v1943_v35, 0.0 }
 0x1be   : > { %v1652_v62 = vpop.f32.mrb[11].mxu0  ;;  %v2039_v54 = vmul.f32 %v1943_v35, %v1943_v35  ;;  %v1977_v37 = vadd.f32 %v1976_v42, %v1975_v39  ;;  %v2371_v10 = vpack.c.bf16 %v2657_v23, %v2657_v23  ;;  %v1978_v61 = vsel %vm1061_vm5, %v1942_v30, 0.0 }
 0x1bf   : > { %v2072_v8 = vsel %vm1061_vm5, %v2037_v53, 0.0  ;;  %v2658_v60 = vadd.f32 %v1649_v16, %v3409_v59  ;;  %v2659_v0 = vadd.f32 %v2622_v45, %v3411_v40  ;;  %v2040_v14 = vmul.f32 %v1944_v19, %v1944_v19 }
 0x1c0   : > { %v1979_v50 = vadd.f32 %v1978_v61, %v1977_v37  ;;  %v2073_v3 = vadd.f32 %v2072_v8, %v2071_v32  ;;  %1915 = vst.msk [vmem:[%s3428_s10 + $0x28] sm:$0xf] %vm1904_vm8, %v2371_v10  ;;  %v2660_v7 = vadd.f32 %v1652_v62, %v3413_v24  ;;  %v2074_v15 = vsel %vm1061_vm5, %v2038_v44, 0.0 }
 0x1c1   : > { %v2369_v46 = vpack.c.bf16 %v2658_v60, %v2658_v60  ;;  %v1781_v1 = vpack.c.bf16 %v2659_v0, %v2657_v23  ;;  %v2372_v27 = vpack.c.bf16 %v2659_v0, %v2659_v0  ;;  %v1982_v34 = vsel %vm1061_vm5, %v1944_v19, 0.0 }
 0x1c2   : > { %v1981_v25 = vadd.f32 %v1980_v38, %v1979_v50  ;;  %v2075_v55 = vadd.f32 %v2074_v15, %v2073_v3  ;;  %v1780_v59 = vpack.c.bf16 %v2660_v7, %v2658_v60  ;;  %v2370_v41 = vpack.c.bf16 %v2660_v7, %v2660_v7 }
 0x1c3   : > { %v2625_v40 = vpop.f32.mrb[12].mxu0  ;;  %v2076_v9 = vsel %vm1061_vm5, %v2039_v54, 0.0  ;;  %1913 = vst.msk [vmem:[%s3428_s10 + $0x20] sm:$0xf] %vm1904_vm8, %v2369_v46  ;;  %1916 = vst.msk [vmem:[%s3428_s10 + $0x2c] sm:$0xf] %vm1904_vm8, %v2372_v27  ;;  %v1947_v24 = vunpack.c.l.bf16 %v1781_v1  ;;  %v1948_v43 = vunpack.c.h.bf16 %v1781_v1 }
 0x1c4   : > { %v2661_v47 = vadd.f32 %v2625_v40, %v3415_v51  ;;  %v1665_v56 = vpop.f32.mrb[13].mxu0  ;;  %v2077_v18 = vadd.f32 %v2076_v9, %v2075_v55  ;;  %1914 = vst.msk [vmem:[%s3428_s10 + $0x24] sm:$0xf] %vm1904_vm8, %v2370_v41  ;;  %v1945_v11 = vunpack.c.l.bf16 %v1780_v59  ;;  %v1946_v13 = vunpack.c.h.bf16 %v1780_v59 }
 0x1c5   : > { %v1983_v63 = vadd.f32 %v1982_v34, %v1981_v25  ;;  %v2626_v52 = vpop.f32.mrb[14].mxu0  ;;  %v2078_v2 = vsel %vm1061_vm5, %v2040_v14, 0.0  ;;  %v2043_v4 = vmul.f32 %v1947_v24, %v1947_v24  ;;  %v2662_v17 = vadd.f32 %v1665_v56, %v3417_v33 }
 0x1c6   : > { %v1668_v21 = vpop.f32.mrb[15].mxu0  ;;  %v1984_v36 = vsel %vm1061_vm5, %v1945_v11, 0.0  ;;  %v2041_v57 = vmul.f32 %v1945_v11, %v1945_v11  ;;  %v2042_v58 = vmul.f32 %v1946_v13, %v1946_v13  ;;  %v2079_v51 = vadd.f32 %v2078_v2, %v2077_v18 }
 0x1c7   : > { %v1985_v31 = vadd.f32 %v1984_v36, %v1983_v63  ;;  %v1986_v5 = vsel %vm1061_vm5, %v1946_v13, 0.0  ;;  %v2375_v12 = vpack.c.bf16 %v2661_v47, %v2661_v47  ;;  %v2663_v39 = vadd.f32 %v2626_v52, %v3419_v48 }
 0x1c8   : > { %v2080_v22 = vsel %vm1061_vm5, %v2041_v57, 0.0  ;;  %v2664_v49 = vadd.f32 %v1668_v21, %v3421_v28  ;;  %v1988_v35 = vsel %vm1061_vm5, %v1947_v24, 0.0  ;;  %v2044_v26 = vmul.f32 %v1948_v43, %v1948_v43 }
 0x1c9   : > { %v1987_v20 = vadd.f32 %v1986_v5, %v1985_v31  ;;  %v2081_v6 = vadd.f32 %v2080_v22, %v2079_v51  ;;  %v2082_v29 = vsel %vm1061_vm5, %v2042_v58, 0.0  ;;  %1919 = vst.msk [vmem:[%s3428_s10 + $0x38] sm:$0xf] %vm1904_vm8, %v2375_v12  ;;  %v2373_v30 = vpack.c.bf16 %v2662_v17, %v2662_v17 }
 0x1ca   : > { %v1783_v16 = vpack.c.bf16 %v2663_v39, %v2661_v47  ;;  %v2376_v19 = vpack.c.bf16 %v2663_v39, %v2663_v39  ;;  %v1990_v48 = vsel %vm1061_vm5, %v1948_v43, 0.0  ;;  %v2084_v28 = vsel %vm1061_vm5, %v2043_v4, 0.0 }
 0x1cb   : > { %v2629_v32 = vpop.f32.mrb[16].mxu0  ;;  %v1989_v23 = vadd.f32 %v1988_v35, %v1987_v20  ;;  %v2083_v33 = vadd.f32 %v2082_v29, %v2081_v6  ;;  %1917 = vst.msk [vmem:[%s3428_s10 + $0x30] sm:$0xf] %vm1904_vm8, %v2373_v30  ;;  %v1782_v42 = vpack.c.bf16 %v2664_v49, %v2662_v17  ;;  %v2374_v53 = vpack.c.bf16 %v2664_v49, %v2664_v49 }
 0x1cc   : > { %v1681_v45 = vpop.f32.mrb[17].mxu0  ;;  %1920 = vst.msk [vmem:[%s3428_s10 + $0x3c] sm:$0xf] %vm1904_vm8, %v2376_v19  ;;  %v1951_v37 = vunpack.c.l.bf16 %v1783_v16  ;;  %v2086_v8 = vsel %vm1061_vm5, %v2044_v26, 0.0  ;;  %v1952_v60 = vunpack.c.h.bf16 %v1783_v16 }
 0x1cd   : > { %v2630_v44 = vpop.f32.mrb[18].mxu0  ;;  %v2085_v62 = vadd.f32 %v2084_v28, %v2083_v33  ;;  %v1991_v38 = vadd.f32 %v1990_v48, %v1989_v23  ;;  %1918 = vst.msk [vmem:[%s3428_s10 + $0x34] sm:$0xf] %vm1904_vm8, %v2374_v53  ;;  %v1949_v10 = vunpack.c.l.bf16 %v1782_v42  ;;  %v1950_v61 = vunpack.c.h.bf16 %v1782_v42 }
 0x1ce   : > { %v1684_v54 = vpop.f32.mrb[19].mxu0  ;;  %v2047_v15 = vmul.f32 %v1951_v37, %v1951_v37  ;;  %v1996_v41 = vsel %vm1061_vm5, %v1951_v37, 0.0  ;;  %v2048_v40 = vmul.f32 %v1952_v60, %v1952_v60  ;;  %v1998_v11 = vsel %vm1061_vm5, %v1952_v60, 0.0 }
 0x1cf   : > { %v1992_v0 = vsel %vm1061_vm5, %v1949_v10, 0.0  ;;  %v2045_v14 = vmul.f32 %v1949_v10, %v1949_v10  ;;  %v2046_v50 = vmul.f32 %v1950_v61, %v1950_v61  ;;  %v2087_v7 = vadd.f32 %v2086_v8, %v2085_v62 }
 0x1d0   : > { %v1993_v3 = vadd.f32 %v1992_v0, %v1991_v38  ;;  %v1994_v46 = vsel %vm1061_vm5, %v1950_v61, 0.0  ;;  %v2092_v13 = vsel %vm1061_vm5, %v2047_v15, 0.0  ;;  %v2094_v57 = vsel %vm1061_vm5, %v2048_v40, 0.0 }
 0x1d1   : > { %v2088_v1 = vsel %vm1061_vm5, %v2045_v14, 0.0  ;;  %v2090_v34 = vsel %vm1061_vm5, %v2046_v50, 0.0 }
 0x1d2   : > { %v1995_v25 = vadd.f32 %v1994_v46, %v1993_v3  ;;  %v2089_v55 = vadd.f32 %v2088_v1, %v2087_v7 }
 0x1d3   : > { %v2633_v27 = vpop.f32.mrb[20].mxu0 }
 0x1d4   : > { %v1697_v59 = vpop.f32.mrb[21].mxu0  ;;  %v1997_v24 = vadd.f32 %v1996_v41, %v1995_v25  ;;  %v2091_v47 = vadd.f32 %v2090_v34, %v2089_v55 }
 0x1d5   : > { %v2634_v9 = vpop.f32.mrb[22].mxu0 }
 0x1d6   : > { %v1700_v18 = vpop.f32.mrb[23].mxu0  ;;  %v2093_v2 = vadd.f32 %v2092_v13, %v2091_v47  ;;  %v1999_v36 = vadd.f32 %v1998_v11, %v1997_v24 }
 0x1d8   : > { %v2591_v56 = vpop.f32.mrb[16].mxu1  ;;  %v2095_v22 = vadd.f32 %v2094_v57, %v2093_v2 }
 0x1d9   : > { %v2665_v63 = vadd.f32 %v2629_v32, %v2591_v56  ;;  %v1495_v52 = vpop.f32.mrb[17].mxu1 }
 0x1da   : > { %v2666_v21 = vadd.f32 %v1681_v45, %v1495_v52  ;;  %v2592_v43 = vpop.f32.mrb[18].mxu1 }
 0x1db   : > { %v2379_v58 = vpack.c.bf16 %v2665_v63, %v2665_v63  ;;  %v2667_v4 = vadd.f32 %v2630_v44, %v2592_v43  ;;  %v1498_v31 = vpop.f32.mrb[19].mxu1  ;;  %v3504_v20 = vpop.f32.mrb[24].mxu0 }
 0x1dc   : > { %v2377_v51 = vpack.c.bf16 %v2666_v21, %v2666_v21  ;;  %v2668_v5 = vadd.f32 %v1684_v54, %v1498_v31  ;;  %v3508_v49 = vpop.f32.mrb[25].mxu0 }
 0x1dd   : > { %1923 = vst.msk [vmem:[%s3428_s10 + $0x48] sm:$0xf] %vm1904_vm8, %v2379_v58  ;;  %v1785_v12 = vpack.c.bf16 %v2667_v4, %v2665_v63  ;;  %v2380_v17 = vpack.c.bf16 %v2667_v4, %v2667_v4  ;;  %v3512_v29 = vpop.f32.mrb[26].mxu0 }
 0x1de   : > { %1921 = vst.msk [vmem:[%s3428_s10 + $0x40] sm:$0xf] %vm1904_vm8, %v2377_v51  ;;  %v1784_v6 = vpack.c.bf16 %v2668_v5, %v2666_v21  ;;  %v2378_v39 = vpack.c.bf16 %v2668_v5, %v2668_v5  ;;  %v3516_v33 = vpop.f32.mrb[27].mxu0 }
 0x1df   : > { %1924 = vst.msk [vmem:[%s3428_s10 + $0x4c] sm:$0xf] %vm1904_vm8, %v2380_v17  ;;  %v1955_v35 = vunpack.c.l.bf16 %v1785_v12  ;;  %v1956_v26 = vunpack.c.h.bf16 %v1785_v12 }
 0x1e0   : > { %1922 = vst.msk [vmem:[%s3428_s10 + $0x44] sm:$0xf] %vm1904_vm8, %v2378_v39  ;;  %v1953_v30 = vunpack.c.l.bf16 %v1784_v6  ;;  %v1954_v32 = vunpack.c.h.bf16 %v1784_v6  ;;  %v2595_v23 = vpop.f32.mrb[20].mxu1 }
 0x1e1   : > { %v1511_v16 = vpop.f32.mrb[21].mxu1  ;;  %v2004_v19 = vsel %vm1061_vm5, %v1955_v35, 0.0  ;;  %v2051_v53 = vmul.f32 %v1955_v35, %v1955_v35  ;;  %v2052_v44 = vmul.f32 %v1956_v26, %v1956_v26  ;;  %v2669_v38 = vadd.f32 %v2633_v27, %v2595_v23 }
 0x1e2   : > { %v2000_v45 = vsel %vm1061_vm5, %v1953_v30, 0.0  ;;  %v2049_v48 = vmul.f32 %v1953_v30, %v1953_v30  ;;  %v2050_v28 = vmul.f32 %v1954_v32, %v1954_v32  ;;  %v2596_v42 = vpop.f32.mrb[22].mxu1  ;;  %v2002_v37 = vsel %vm1061_vm5, %v1954_v32, 0.0 }
 0x1e3   : > { %v2001_v62 = vadd.f32 %v2000_v45, %v1999_v36  ;;  %v1514_v54 = vpop.f32.mrb[23].mxu1  ;;  %v2670_v61 = vadd.f32 %v1697_v59, %v1511_v16  ;;  %v2671_v8 = vadd.f32 %v2634_v9, %v2596_v42  ;;  %v2383_v14 = vpack.c.bf16 %v2669_v38, %v2669_v38  ;;  %v2641_v3 = vpop.f32.mrb[28].mxu0 }
 0x1e4   : > { %v2096_v10 = vsel %vm1061_vm5, %v2049_v48, 0.0  ;;  %v2672_v50 = vadd.f32 %v1700_v18, %v1514_v54  ;;  %v2098_v7 = vsel %vm1061_vm5, %v2050_v28, 0.0  ;;  %v3523_v27 = vpop.f32.mrb[29].mxu0  ;;  %v2006_v34 = vsel %vm1061_vm5, %v1956_v26, 0.0 }
 0x1e5   : > { %v2003_v60 = vadd.f32 %v2002_v37, %v2001_v62  ;;  %v2097_v0 = vadd.f32 %v2096_v10, %v2095_v22  ;;  %v2381_v15 = vpack.c.bf16 %v2670_v61, %v2670_v61  ;;  %v1787_v46 = vpack.c.bf16 %v2671_v8, %v2669_v38  ;;  %1927 = vst.msk [vmem:[%s3428_s10 + $0x58] sm:$0xf] %vm1904_vm8, %v2383_v14  ;;  %v3527_v40 = vpop.f32.mrb[30].mxu0 }
 0x1e6   : > { %v2384_v1 = vpack.c.bf16 %v2671_v8, %v2671_v8  ;;  %v1786_v59 = vpack.c.bf16 %v2672_v50, %v2670_v61  ;;  %v2382_v41 = vpack.c.bf16 %v2672_v50, %v2672_v50  ;;  %v2100_v9 = vsel %vm1061_vm5, %v2051_v53, 0.0  ;;  %v3535_v18 = vpop.f32.mrb[31].mxu0 }
 0x1e7   : > { %v2005_v25 = vadd.f32 %v2004_v19, %v2003_v60  ;;  %v2099_v55 = vadd.f32 %v2098_v7, %v2097_v0  ;;  %1925 = vst.msk [vmem:[%s3428_s10 + $0x50] sm:$0xf] %vm1904_vm8, %v2381_v15  ;;  %v1959_v24 = vunpack.c.l.bf16 %v1787_v46  ;;  %v1960_v47 = vunpack.c.h.bf16 %v1787_v46 }
 0x1e8   : > { %1928 = vst.msk [vmem:[%s3428_s10 + $0x5c] sm:$0xf] %vm1904_vm8, %v2384_v1  ;;  %v2599_v56 = vpop.f32.mrb[24].mxu1  ;;  %1926 = vst.msk [vmem:[%s3428_s10 + $0x54] sm:$0xf] %vm1904_vm8, %v2382_v41  ;;  %v1957_v13 = vunpack.c.l.bf16 %v1786_v59  ;;  %v1958_v63 = vunpack.c.h.bf16 %v1786_v59  ;;  %v2102_v21 = vsel %vm1061_vm5, %v2052_v44, 0.0 }
 0x1e9   : > { %v2101_v11 = vadd.f32 %v2100_v9, %v2099_v55  ;;  %v2007_v52 = vadd.f32 %v2006_v34, %v2005_v25  ;;  %v1527_v2 = vpop.f32.mrb[25].mxu1  ;;  %v2012_v36 = vsel %vm1061_vm5, %v1959_v24, 0.0  ;;  %v2014_v51 = vsel %vm1061_vm5, %v1960_v47, 0.0 }
 0x1ea   : > { %v2600_v43 = vpop.f32.mrb[26].mxu1  ;;  %v2008_v57 = vsel %vm1061_vm5, %v1957_v13, 0.0  ;;  %v2053_v58 = vmul.f32 %v1957_v13, %v1957_v13  ;;  %v2054_v4 = vmul.f32 %v1958_v63, %v1958_v63  ;;  %v2055_v5 = vmul.f32 %v1959_v24, %v1959_v24 }
 0x1eb   : > { %v1530_v31 = vpop.f32.mrb[27].mxu1  ;;  %v2009_v22 = vadd.f32 %v2008_v57, %v2007_v52  ;;  %v2103_v12 = vadd.f32 %v2102_v21, %v2101_v11  ;;  %v2010_v17 = vsel %vm1061_vm5, %v1958_v63, 0.0  ;;  %v2673_v39 = vadd.f32 %v3504_v20, %v2599_v56 }
 0x1ec   : > { %v2104_v6 = vsel %vm1061_vm5, %v2053_v58, 0.0  ;;  %v2674_v35 = vadd.f32 %v3508_v49, %v1527_v2  ;;  %v2675_v32 = vadd.f32 %v3512_v29, %v2600_v43  ;;  %v2676_v23 = vadd.f32 %v3516_v33, %v1530_v31 }
 0x1ed   : > { %v2011_v26 = vadd.f32 %v2010_v17, %v2009_v22  ;;  %v2105_v30 = vadd.f32 %v2104_v6, %v2103_v12  ;;  %v2056_v16 = vmul.f32 %v1960_v47, %v1960_v47  ;;  %v2106_v19 = vsel %vm1061_vm5, %v2054_v4, 0.0 }
 0x1ee   : > { %v2387_v45 = vpack.c.bf16 %v2673_v39, %v2673_v39  ;;  %v2385_v48 = vpack.c.bf16 %v2674_v35, %v2674_v35  ;;  %v1789_v20 = vpack.c.bf16 %v2675_v32, %v2673_v39  ;;  %v2388_v53 = vpack.c.bf16 %v2675_v32, %v2675_v32 }
 0x1ef   : > { %v2013_v28 = vadd.f32 %v2012_v36, %v2011_v26  ;;  %v2107_v42 = vadd.f32 %v2106_v19, %v2105_v30  ;;  %v2108_v49 = vsel %vm1061_vm5, %v2055_v5, 0.0  ;;  %v1788_v29 = vpack.c.bf16 %v2676_v23, %v2674_v35 }
 0x1f0   : > { %v2603_v44 = vpop.f32.mrb[28].mxu1  ;;  %1931 = vst.msk [vmem:[%s3428_s10 + $0x68] sm:$0xf] %vm1904_vm8, %v2387_v45  ;;  %1929 = vst.msk [vmem:[%s3428_s10 + $0x60] sm:$0xf] %vm1904_vm8, %v2385_v48  ;;  %v2386_v33 = vpack.c.bf16 %v2676_v23, %v2676_v23  ;;  %v1963_v37 = vunpack.c.l.bf16 %v1789_v20  ;;  %v2110_v7 = vsel %vm1061_vm5, %v2056_v16, 0.0  ;;  %v1964_v15 = vunpack.c.h.bf16 %v1789_v20 }
 0x1f1   : > { %v2677_v62 = vadd.f32 %v2641_v3, %v2603_v44  ;;  %v1543_v38 = vpop.f32.mrb[29].mxu1  ;;  %v2109_v54 = vadd.f32 %v2108_v49, %v2107_v42  ;;  %1932 = vst.msk [vmem:[%s3428_s10 + $0x6c] sm:$0xf] %vm1904_vm8, %v2388_v53  ;;  %v2015_v10 = vadd.f32 %v2014_v51, %v2013_v28  ;;  %v1961_v8 = vunpack.c.l.bf16 %v1788_v29 }
 0x1f2   : > { %v2604_v61 = vpop.f32.mrb[30].mxu1  ;;  %1930 = vst.msk [vmem:[%s3428_s10 + $0x64] sm:$0xf] %vm1904_vm8, %v2386_v33  ;;  %v1962_v60 = vunpack.c.h.bf16 %v1788_v29  ;;  %v2678_v14 = vadd.f32 %v3523_v27, %v1543_v38  ;;  %v2059_v25 = vmul.f32 %v1963_v37, %v1963_v37  ;;  %v2020_v24 = vsel %vm1061_vm5, %v1963_v37, 0.0 }
 0x1f3   : > { %v2391_v0 = vpack.c.bf16 %v2677_v62, %v2677_v62  ;;  %v1546_v50 = vpop.f32.mrb[31].mxu1  ;;  %v2016_v3 = vsel %vm1061_vm5, %v1961_v8, 0.0  ;;  %v2057_v46 = vmul.f32 %v1961_v8, %v1961_v8  ;;  %v2111_v59 = vadd.f32 %v2110_v7, %v2109_v54 }
 0x1f4   : > { %v2058_v1 = vmul.f32 %v1962_v60, %v1962_v60  ;;  %v2017_v55 = vadd.f32 %v2016_v3, %v2015_v10  ;;  %v2018_v41 = vsel %vm1061_vm5, %v1962_v60, 0.0  ;;  %v2389_v27 = vpack.c.bf16 %v2678_v14, %v2678_v14 }
 0x1f5   : > { %1935 = vst.msk [vmem:[%s3428_s10 + $0x78] sm:$0xf] %vm1904_vm8, %v2391_v0  ;;  %v2112_v34 = vsel %vm1061_vm5, %v2057_v46, 0.0  ;;  %v2679_v9 = vadd.f32 %v3527_v40, %v2604_v61  ;;  %v2680_v11 = vadd.f32 %v3535_v18, %v1546_v50  ;;  %v2060_v13 = vmul.f32 %v1964_v15, %v1964_v15 }
 0x1f6   : > { %v2019_v47 = vadd.f32 %v2018_v41, %v2017_v55  ;;  %v2113_v56 = vadd.f32 %v2112_v34, %v2111_v59  ;;  %v2114_v63 = vsel %vm1061_vm5, %v2058_v1, 0.0  ;;  %1933 = vst.msk [vmem:[%s3428_s10 + $0x70] sm:$0xf] %vm1904_vm8, %v2389_v27  ;;  %v2022_v57 = vsel %vm1061_vm5, %v1964_v15, 0.0 }
 0x1f7   : > { %v1791_v52 = vpack.c.bf16 %v2679_v9, %v2677_v62  ;;  %v2392_v2 = vpack.c.bf16 %v2679_v9, %v2679_v9  ;;  %v1790_v43 = vpack.c.bf16 %v2680_v11, %v2678_v14  ;;  %v2390_v36 = vpack.c.bf16 %v2680_v11, %v2680_v11 }
 0x1f8   : > { %v2021_v21 = vadd.f32 %v2020_v24, %v2019_v47  ;;  %v2115_v40 = vadd.f32 %v2114_v63, %v2113_v56  ;;  %v2116_v58 = vsel %vm1061_vm5, %v2059_v25, 0.0  ;;  %v2118_v22 = vsel %vm1061_vm5, %v2060_v13, 0.0 }
 0x1f9   : > { %1936 = vst.msk [vmem:[%s3428_s10 + $0x7c] sm:$0xf] %vm1904_vm8, %v2392_v2  ;;  %v1967_v18 = vunpack.c.l.bf16 %v1791_v52  ;;  %1934 = vst.msk [vmem:[%s3428_s10 + $0x74] sm:$0xf] %vm1904_vm8, %v2390_v36  ;;  %v1965_v31 = vunpack.c.l.bf16 %v1790_v43  ;;  %v1966_v51 = vunpack.c.h.bf16 %v1790_v43  ;;  %v1968_v12 = vunpack.c.h.bf16 %v1791_v52 }
 0x1fa   : > { %v2117_v4 = vadd.f32 %v2116_v58, %v2115_v40  ;;  %v2023_v5 = vadd.f32 %v2022_v57, %v2021_v21 }
 0x1fb   : > { %v2024_v17 = vsel %vm1061_vm5, %v1965_v31, 0.0  ;;  %v2061_v6 = vmul.f32 %v1965_v31, %v1965_v31  ;;  %v2062_v39 = vmul.f32 %v1966_v51, %v1966_v51  ;;  %v2063_v30 = vmul.f32 %v1967_v18, %v1967_v18 }
 0x1fc   : > { %v2025_v35 = vadd.f32 %v2024_v17, %v2023_v5  ;;  %v2119_v26 = vadd.f32 %v2118_v22, %v2117_v4  ;;  %v2026_v32 = vsel %vm1061_vm5, %v1966_v51, 0.0  ;;  %v2028_v45 = vsel %vm1061_vm5, %v1967_v18, 0.0 }
 0x1fd   : > { %v2120_v23 = vsel %vm1061_vm5, %v2061_v6, 0.0  ;;  %v2064_v48 = vmul.f32 %v1968_v12, %v1968_v12  ;;  %v2122_v28 = vsel %vm1061_vm5, %v2062_v39, 0.0  ;;  %v2030_v53 = vsel %vm1061_vm5, %v1968_v12, 0.0 }
 0x1fe   : > { %v2027_v16 = vadd.f32 %v2026_v32, %v2025_v35  ;;  %v2121_v19 = vadd.f32 %v2120_v23, %v2119_v26  ;;  %v2124_v44 = vsel %vm1061_vm5, %v2063_v30, 0.0 }
 0x1ff   : > { %v2126_v33 = vsel %vm1061_vm5, %v2064_v48, 0.0 }
 0x200   : > { %v2029_v42 = vadd.f32 %v2028_v45, %v2027_v16  ;;  %v2123_v20 = vadd.f32 %v2122_v28, %v2121_v19 }
 0x202   : > { %v2031_v49 = vadd.f32 %v2030_v53, %v2029_v42  ;;  %v2125_v29 = vadd.f32 %v2124_v44, %v2123_v20 }
 0x204   : > { %2032 = vst.msk [vmem:[%s325_s12] sm:$0xff] %vm1061_vm5, %v2031_v49  ;;  %v2127_v62 = vadd.f32 %v2126_v33, %v2125_v29 }
 0x206   : > { %2128 = vst.msk [vmem:[%s329_s14] sm:$0xff] %vm1061_vm5, %v2127_v62 }
 0x207 PF: > { %s19_s27 = sadd.s32 1, %s2743_s27  }
 0x208   : > { %p16_p5 = scmp.ge.s32.totalorder %s19_s27, 4  }
 0x20a   :  { %18 = sbr.rel (!%p16_p5) target bundleno = 1 (0x1), region = 100 }

</bundles_post_ra>
